<compile_context>
chip_gen: v7x
topology: tpu7x:2x2x1
jax: 0.10.0
libtpu: 0.0.40
codegen_flags: <defaults>
</compile_context>

<pallas_src>
import math
import functools

import jax
import jax.numpy as jnp
from jax.experimental import pallas as pl
from jax.experimental.pallas import tpu as pltpu


_VMEM_LIMIT = 32 * 1024 * 1024          # explicit scoped-VMEM limit (safe on v5e/v6e/v7x)
# Set to jnp.bfloat16 to get bf16 MXU rate / half the VMEM traffic on v6e/v7x
# (accumulation stays f32 either way).  Kept f32 by default to preserve the
# exact forward-pass numerics of the PyTorch reference.
_MXU_DTYPE = jnp.float32


def _mxu(x):
    return x.astype(_MXU_DTYPE)


# ----------------------------- kernels ------------------------------------ #

def _linear_kernel(x_ref, w_ref, b_ref, o_ref):
    # x: (tm, K), w: (K, N) (pre-transposed), b: (1, N)
    o_ref[...] = (
        jnp.dot(_mxu(x_ref[...]), _mxu(w_ref[...]),
                preferred_element_type=jnp.float32)
        + b_ref[...]
    )


def _linear_residual_kernel(x_ref, w_ref, b_ref, r_ref, o_ref):
    # fused: residual + Linear(x)   (used for `x = x + Wo(attn)`)
    o_ref[...] = (
        jnp.dot(_mxu(x_ref[...]), _mxu(w_ref[...]),
                preferred_element_type=jnp.float32)
        + b_ref[...]
        + r_ref[...]
    )


def _qkv_kernel(x_ref, wq_ref, bq_ref, wkv_ref, bkv_ref, q_ref, kv_ref):
    # fused Q / (K|V) projection: reads x once per row tile.
    x = _mxu(x_ref[...])
    q_ref[...] = (
        jnp.dot(x, _mxu(wq_ref[...]), preferred_element_type=jnp.float32)
        + bq_ref[...]
    )
    kv_ref[...] = (
        jnp.dot(x, _mxu(wkv_ref[...]), preferred_element_type=jnp.float32)
        + bkv_ref[...]
    )


def _ffn_kernel(x_ref, w1_ref, b1_ref, w2_ref, b2_ref, o_ref):
    # linear2(relu(linear1(x))), tiled over rows.
    h = (jnp.dot(_mxu(x_ref[...]), _mxu(w1_ref[...]),
                 preferred_element_type=jnp.float32) + b1_ref[...])
    h = jnp.maximum(h, 0.0)
    o_ref[...] = (
        jnp.dot(_mxu(h), _mxu(w2_ref[...]), preferred_element_type=jnp.float32)
        + b2_ref[...]
    )


def _attention_kernel(mask_ref, q_ref, kv_ref, o_ref, *, num_heads):
    # one batch element per grid step; lane-dense blocks (last dim = d_model).
    # q: (1, Sq, D)  (already scaled by 1/sqrt(depth) via the Wq fold)
    # kv: (1, Sk, 2D) = [K | V] from the fused projection
    # mask: (H, Sk) additive bias -- torch's `scores += mask.unsqueeze(1)`
    # semantics (bias depends on head/key only, see _mask_bias()).
    D = q_ref.shape[2]
    depth = D // num_heads
    q = q_ref[0]                 # (Sq, D)
    kv = kv_ref[0]               # (Sk, 2D)
    k = kv[:, :D]
    v = kv[:, D:]
    mask = mask_ref[...]         # (H, Sk)

    ctx = []
    for h in range(num_heads):   # static, small head loop -- all in-register
        lo = h * depth
        qh = q[:, lo:lo + depth]
        kh = k[:, lo:lo + depth]
        vh = v[:, lo:lo + depth]
        s = jax.lax.dot_general(qh, kh, (((1,), (1,)), ((), ())),
                                preferred_element_type=jnp.float32)  # (Sq, Sk)
        s = s + mask[h:h + 1, :]
        m = jnp.max(s, axis=-1, keepdims=True)
        e = jnp.exp(s - m)
        p = e * pl.reciprocal(jnp.sum(e, axis=-1, keepdims=True), approx=True)
        ctx.append(jnp.dot(_mxu(p), _mxu(vh),
                           preferred_element_type=jnp.float32))      # (Sq, depth)
    # heads merged in-register -> single lane-dense (Sq, D) store.
    o_ref[0] = jnp.concatenate(ctx, axis=-1)


# ----------------------------- wrappers ------------------------------------ #

def _row_tile(m):
    """Largest row tile (mult. of 8) dividing m that leaves >= 2 grid steps."""
    for c in (512, 256, 128, 64, 32, 16, 8):
        if m % c == 0 and m // c >= 2:
            return c
    return m


def _compiler_params(n_axes=1):
    return pltpu.CompilerParams(
        dimension_semantics=("parallel",) * n_axes,
        vmem_limit_bytes=_VMEM_LIMIT,
    )


def pallas_linear(x2d, w, b, residual=None):
    """y = x @ w + b (+ residual).  w is (K, N), b is (1, N) (pre-transposed)."""
    M, K = x2d.shape
    N = w.shape[1]
    tm = _row_tile(M)
    grid = (M // tm,)
    x_spec = pl.BlockSpec((tm, K), lambda i: (i, 0))
    w_spec = pl.BlockSpec((K, N), lambda i: (0, 0))
    b_spec = pl.BlockSpec((1, N), lambda i: (0, 0))
    o_spec = pl.BlockSpec((tm, N), lambda i: (i, 0))
    if residual is None:
        return pl.pallas_call(
            _linear_kernel,
            out_shape=jax.ShapeDtypeStruct((M, N), jnp.float32),
            grid=grid,
            in_specs=[x_spec, w_spec, b_spec],
            out_specs=o_spec,
            compiler_params=_compiler_params(),
        )(x2d, w, b)
    r_spec = pl.BlockSpec((tm, N), lambda i: (i, 0))
    return pl.pallas_call(
        _linear_residual_kernel,
        out_shape=jax.ShapeDtypeStruct((M, N), jnp.float32),
        grid=grid,
        in_specs=[x_spec, w_spec, b_spec, r_spec],
        out_specs=o_spec,
        compiler_params=_compiler_params(),
    )(x2d, w, b, residual)


def pallas_qkv(x2d, wq, bq, wkv, bkv):
    """Fused Q + KV projection (self-attention): one pass over x."""
    M, K = x2d.shape
    D = wq.shape[1]
    tm = _row_tile(M)
    return pl.pallas_call(
        _qkv_kernel,
        out_shape=(jax.ShapeDtypeStruct((M, D), jnp.float32),
                   jax.ShapeDtypeStruct((M, 2 * D), jnp.float32)),
        grid=(M // tm,),
        in_specs=[pl.BlockSpec((tm, K), lambda i: (i, 0)),
                  pl.BlockSpec((K, D), lambda i: (0, 0)),
                  pl.BlockSpec((1, D), lambda i: (0, 0)),
                  pl.BlockSpec((K, 2 * D), lambda i: (0, 0)),
                  pl.BlockSpec((1, 2 * D), lambda i: (0, 0))],
        out_specs=(pl.BlockSpec((tm, D), lambda i: (i, 0)),
                   pl.BlockSpec((tm, 2 * D), lambda i: (i, 0))),
        compiler_params=_compiler_params(),
    )(x2d, wq, bq, wkv, bkv)


def pallas_attention(q3, kv3, mask_bias, num_heads):
    """q3: (B, Sq, D); kv3: (B, Sk, 2D); mask_bias: (H, Sk) additive bias."""
    B, Sq, D = q3.shape
    Sk = kv3.shape[1]
    kern = functools.partial(_attention_kernel, num_heads=num_heads)
    return pl.pallas_call(
        kern,
        out_shape=jax.ShapeDtypeStruct((B, Sq, D), jnp.float32),
        grid=(B,),
        in_specs=[pl.BlockSpec((num_heads, Sk), lambda b: (0, 0)),
                  pl.BlockSpec((1, Sq, D), lambda b: (b, 0, 0)),
                  pl.BlockSpec((1, Sk, 2 * D), lambda b: (b, 0, 0))],
        out_specs=pl.BlockSpec((1, Sq, D), lambda b: (b, 0, 0)),
        compiler_params=_compiler_params(),
    )(mask_bias, q3, kv3)


def pallas_ffn(x, p):
    B, S, D = x.shape
    Dff = p["w1"].shape[1]
    M = B * S
    tm = _row_tile(M)
    out = pl.pallas_call(
        _ffn_kernel,
        out_shape=jax.ShapeDtypeStruct((M, D), jnp.float32),
        grid=(M // tm,),
        in_specs=[pl.BlockSpec((tm, D), lambda i: (i, 0)),
                  pl.BlockSpec((D, Dff), lambda i: (0, 0)),
                  pl.BlockSpec((1, Dff), lambda i: (0, 0)),
                  pl.BlockSpec((Dff, D), lambda i: (0, 0)),
                  pl.BlockSpec((1, D), lambda i: (0, 0))],
        out_specs=pl.BlockSpec((tm, D), lambda i: (i, 0)),
        compiler_params=_compiler_params(),
    )(x.reshape(M, D), p["w1"], p["b1"], p["w2"], p["b2"])
    return out.reshape(B, S, D)


def _mask_bias(mask, num_heads, Sk):
    # PyTorch: `scores += mask.unsqueeze(1)` with scores (B, H, Sq, Sk) and mask
    # (B, Sk).  Right-aligned broadcast => bias[b, h, q, k] = mask[h, k]; only
    # well-defined when mask batch is 1 or num_heads.  We pass just this tiny
    # (H, Sk) bias instead of materializing a (B*H, Sq, Sk) tensor in HBM.
    if mask is None:
        return jnp.zeros((num_heads, Sk), jnp.float32)
    assert mask.shape[0] in (1, num_heads), (
        "torch broadcast of mask.unsqueeze(1) requires mask batch in {1, num_heads}")
    return jnp.broadcast_to(mask.astype(jnp.float32), (num_heads, Sk))


def multi_head_attention(query, kv_input, mask, p, num_heads,
                         residual=None, fused_qkv=False):
    # In this decoder layer key == value always, so K/V share kv_input.
    B, Sq, D = query.shape
    Sk = kv_input.shape[1]
    q_in = query.reshape(B * Sq, D)
    if fused_qkv:                       # self-attention: one fused projection call
        q2, kv2 = pallas_qkv(q_in, p["wq"], p["bq"], p["wkv"], p["bkv"])
    else:                               # cross-attention: Q from x, fused KV from encoder
        q2 = pallas_linear(q_in, p["wq"], p["bq"])
        kv2 = pallas_linear(kv_input.reshape(B * Sk, D), p["wkv"], p["bkv"])

    attn = pallas_attention(q2.reshape(B, Sq, D),
                            kv2.reshape(B, Sk, 2 * D),
                            _mask_bias(mask, num_heads, Sk),
                            num_heads)                  # (B, Sq, D), heads merged

    res2 = None if residual is None else residual.reshape(B * Sq, D)
    out = pallas_linear(attn.reshape(B * Sq, D), p["wo"], p["bo"], residual=res2)
    return out.reshape(B, Sq, D)


def transformer_decoder_layer(x, encoder_output, src_mask, tgt_mask, params, num_heads):
    # x = x + MaskedMHA(x, x, x, tgt_mask)
    x = multi_head_attention(x, x, tgt_mask, params["self_attn"], num_heads,
                             residual=x, fused_qkv=True)
    # x = x + MHA(x, enc, enc, src_mask)
    x = multi_head_attention(x, encoder_output, src_mask, params["cross_attn"],
                             num_heads, residual=x, fused_qkv=False)
    # output = linear2(relu(linear1(x)))   (no residual / layernorm, as in torch ref)
    return pallas_ffn(x, params["ffn"])


# --------------------------- parameter setup -------------------------------- #

def _init_linear(key, fan_in, fan_out):
    # deterministic, nn.Linear-style uniform(-1/sqrt(fan_in), 1/sqrt(fan_in))
    kw, kb = jax.random.split(key)
    bound = 1.0 / math.sqrt(fan_in)
    W = jax.random.uniform(kw, (fan_out, fan_in), jnp.float32, -bound, bound)
    b = jax.random.uniform(kb, (fan_out,), jnp.float32, -bound, bound)
    return W, b


def init_torch_params(key, d_model, d_ff):
    """Parameters in the PyTorch nn.Linear (out_features, in_features) layout."""
    def mha(k):
        ks = jax.random.split(k, 4)
        Wq, bq = _init_linear(ks[0], d_model, d_model)
        Wk, bk = _init_linear(ks[1], d_model, d_model)
        Wv, bv = _init_linear(ks[2], d_model, d_model)
        Wo, bo = _init_linear(ks[3], d_model, d_model)
        return {"Wq": Wq, "bq": bq, "Wk": Wk, "bk": bk,
                "Wv": Wv, "bv": bv, "Wo": Wo, "bo": bo}

    k1, k2, k3, k4 = jax.random.split(key, 4)
    W1, b1 = _init_linear(k3, d_model, d_ff)
    W2, b2 = _init_linear(k4, d_ff, d_model)
    return {"self_attn": mha(k1), "cross_attn": mha(k2),
            "ffn": {"W1": W1, "b1": b1, "W2": W2, "b2": b2}}


def prepare_params(torch_params, d_model, num_heads):
    """One-time glue: transpose to (in, out), fuse K/V weights, fold the
    1/sqrt(depth) score scale into Wq/bq."""
    scale = 1.0 / math.sqrt(float(d_model // num_heads))

    def mha(p):
        return {
            "wq": p["Wq"].T * scale,
            "bq": (p["bq"] * scale).reshape(1, -1),
            "wkv": jnp.concatenate([p["Wk"].T, p["Wv"].T], axis=1),
            "bkv": jnp.concatenate([p["bk"], p["bv"]]).reshape(1, -1),
            "wo": p["Wo"].T,
            "bo": p["bo"].reshape(1, -1),
        }

    return {
        "self_attn": mha(torch_params["self_attn"]),
        "cross_attn": mha(torch_params["cross_attn"]),
        "ffn": {"w1": torch_params["ffn"]["W1"].T,
                "b1": torch_params["ffn"]["b1"].reshape(1, -1),
                "w2": torch_params["ffn"]["W2"].T,
                "b2": torch_params["ffn"]["b2"].reshape(1, -1)},
    }


# -------------------------------- main -------------------------------------- #

if __name__ == "__main__":
    # Small shapes consistent with the module (d_model divisible by num_heads,
    # lane-dense D).  Note: torch's `scores += mask.unsqueeze(1)` broadcast is
    # only well-defined when batch == num_heads (or batch == 1), so B == H here.
    B, S, D, H, DFF = 8, 16, 128, 8, 256

    key = jax.random.PRNGKey(0)
    kx, ke, kp = jax.random.split(key, 3)
    x = jax.random.normal(kx, (B, S, D), jnp.float32)
    encoder_output = jax.random.normal(ke, (B, S, D), jnp.float32)
    src_mask = jnp.ones((B, S), jnp.float32)
    tgt_mask = jnp.ones((B, S), jnp.float32)

    params = prepare_params(init_torch_params(kp, D, DFF), D, H)

    fwd = jax.jit(functools.partial(transformer_decoder_layer, num_heads=H))
    out = fwd(x, encoder_output, src_mask, tgt_mask, params)
    out = jax.block_until_ready(out)
    assert out.shape == (B, S, D) and out.dtype == jnp.float32
    assert bool(jnp.all(jnp.isfinite(out)))
    print("KERNEL_OK")
</pallas_src>

<mosaic_0001>
module attributes {stable_mosaic.version = 11 : i64} {
  func.func @_linear_kernel(%arg0: i32, %arg1: memref<64x128xf32, #tpu.memory_space<vmem>>, %arg2: memref<128x128xf32, #tpu.memory_space<vmem>>, %arg3: memref<1x128xf32, #tpu.memory_space<vmem>>, %arg4: memref<64x128xf32, #tpu.memory_space<vmem>>) attributes {dimension_semantics = [#tpu.dimension_semantics<parallel>], iteration_bounds = array<i64: 2>, scalar_prefetch = 0 : i64, scratch_operands = 0 : i64, tpu.core_type = #tpu.core_type<tc>, window_params = [{transform_indices = @transform_0, window_bounds = array<i64: 64, 128>}, {pipeline_mode = #tpu.pipeline_mode<synchronous>, transform_indices = @transform_1, window_bounds = array<i64: 128, 128>}, {pipeline_mode = #tpu.pipeline_mode<synchronous>, transform_indices = @transform_2, window_bounds = array<i64: 1, 128>}, {transform_indices = @transform_3, window_bounds = array<i64: 64, 128>}]} {
    %c0 = arith.constant 0 : index
    %c0_0 = arith.constant 0 : index
    %0 = vector.load %arg1[%c0, %c0_0] : memref<64x128xf32, #tpu.memory_space<vmem>>, vector<64x128xf32>
    %c0_1 = arith.constant 0 : index
    %c0_2 = arith.constant 0 : index
    %1 = vector.load %arg2[%c0_1, %c0_2] : memref<128x128xf32, #tpu.memory_space<vmem>>, vector<128x128xf32>
    %cst = arith.constant dense<0.000000e+00> : vector<64x128xf32>
    %2 = tpu.matmul %0, %1, %cst {dimension_numbers = #tpu.dot_dimension_numbers<[1], [0], [0], [1], [0, 0, 1, 1], [], []>} : vector<64x128xf32>, vector<128x128xf32>, vector<64x128xf32> -> vector<64x128xf32>
    %c0_3 = arith.constant 0 : index
    %c0_4 = arith.constant 0 : index
    %3 = vector.load %arg3[%c0_3, %c0_4] : memref<1x128xf32, #tpu.memory_space<vmem>>, vector<1x128xf32>
    %4 = vector.broadcast %3 : vector<1x128xf32> to vector<64x128xf32>
    %5 = arith.addf %2, %4 : vector<64x128xf32>
    %c0_5 = arith.constant 0 : index
    %c0_6 = arith.constant 0 : index
    %6 = vector.load %arg4[%c0_5, %c0_6] : memref<64x128xf32, #tpu.memory_space<vmem>>, vector<64x128xf32>
    tpu.vector_store %arg4[%c0_5, %c0_6], %5 {strides = array<i32>} : memref<64x128xf32, #tpu.memory_space<vmem>>, vector<64x128xf32>,
    return
  }
  func.func @transform_0(%arg0: i32) -> (i32, i32) {
    %c0_i32 = arith.constant 0 : i32
    %c0_i32_0 = arith.constant 0 : i32
    return %arg0, %c0_i32 : i32, i32
  }
  func.func @transform_1(%arg0: i32) -> (i32, i32) {
    %c0_i32 = arith.constant 0 : i32
    %c0_i32_0 = arith.constant 0 : i32
    %c0_i32_1 = arith.constant 0 : i32
    return %c0_i32, %c0_i32_0 : i32, i32
  }
  func.func @transform_2(%arg0: i32) -> (i32, i32) {
    %c0_i32 = arith.constant 0 : i32
    %c0_i32_0 = arith.constant 0 : i32
    %c0_i32_1 = arith.constant 0 : i32
    return %c0_i32, %c0_i32_0 : i32, i32
  }
  func.func @transform_3(%arg0: i32) -> (i32, i32) {
    %c0_i32 = arith.constant 0 : i32
    %c0_i32_0 = arith.constant 0 : i32
    return %arg0, %c0_i32 : i32, i32
  }
}

module attributes {stable_mosaic.version = 11 : i64} {
  func.func @_linear_residual_kernel(%arg0: i32, %arg1: memref<64x128xf32, #tpu.memory_space<vmem>>, %arg2: memref<128x128xf32, #tpu.memory_space<vmem>>, %arg3: memref<1x128xf32, #tpu.memory_space<vmem>>, %arg4: memref<64x128xf32, #tpu.memory_space<vmem>>, %arg5: memref<64x128xf32, #tpu.memory_space<vmem>>) attributes {dimension_semantics = [#tpu.dimension_semantics<parallel>], iteration_bounds = array<i64: 2>, scalar_prefetch = 0 : i64, scratch_operands = 0 : i64, tpu.core_type = #tpu.core_type<tc>, window_params = [{transform_indices = @transform_0, window_bounds = array<i64: 64, 128>}, {pipeline_mode = #tpu.pipeline_mode<synchronous>, transform_indices = @transform_1, window_bounds = array<i64: 128, 128>}, {pipeline_mode = #tpu.pipeline_mode<synchronous>, transform_indices = @transform_2, window_bounds = array<i64: 1, 128>}, {transform_indices = @transform_3, window_bounds = array<i64: 64, 128>}, {transform_indices = @transform_4, window_bounds = array<i64: 64, 128>}]} {
    %c0 = arith.constant 0 : index
    %c0_0 = arith.constant 0 : index
    %0 = vector.load %arg1[%c0, %c0_0] : memref<64x128xf32, #tpu.memory_space<vmem>>, vector<64x128xf32>
    %c0_1 = arith.constant 0 : index
    %c0_2 = arith.constant 0 : index
    %1 = vector.load %arg2[%c0_1, %c0_2] : memref<128x128xf32, #tpu.memory_space<vmem>>, vector<128x128xf32>
    %cst = arith.constant dense<0.000000e+00> : vector<64x128xf32>
    %2 = tpu.matmul %0, %1, %cst {dimension_numbers = #tpu.dot_dimension_numbers<[1], [0], [0], [1], [0, 0, 1, 1], [], []>} : vector<64x128xf32>, vector<128x128xf32>, vector<64x128xf32> -> vector<64x128xf32>
    %c0_3 = arith.constant 0 : index
    %c0_4 = arith.constant 0 : index
    %3 = vector.load %arg3[%c0_3, %c0_4] : memref<1x128xf32, #tpu.memory_space<vmem>>, vector<1x128xf32>
    %4 = vector.broadcast %3 : vector<1x128xf32> to vector<64x128xf32>
    %5 = arith.addf %2, %4 : vector<64x128xf32>
    %c0_5 = arith.constant 0 : index
    %c0_6 = arith.constant 0 : index
    %6 = vector.load %arg4[%c0_5, %c0_6] : memref<64x128xf32, #tpu.memory_space<vmem>>, vector<64x128xf32>
    %7 = arith.addf %5, %6 : vector<64x128xf32>
    %c0_7 = arith.constant 0 : index
    %c0_8 = arith.constant 0 : index
    %8 = vector.load %arg5[%c0_7, %c0_8] : memref<64x128xf32, #tpu.memory_space<vmem>>, vector<64x128xf32>
    tpu.vector_store %arg5[%c0_7, %c0_8], %7 {strides = array<i32>} : memref<64x128xf32, #tpu.memory_space<vmem>>, vector<64x128xf32>,
    return
  }
  func.func @transform_0(%arg0: i32) -> (i32, i32) {
    %c0_i32 = arith.constant 0 : i32
    %c0_i32_0 = arith.constant 0 : i32
    return %arg0, %c0_i32 : i32, i32
  }
  func.func @transform_1(%arg0: i32) -> (i32, i32) {
    %c0_i32 = arith.constant 0 : i32
    %c0_i32_0 = arith.constant 0 : i32
    %c0_i32_1 = arith.constant 0 : i32
    return %c0_i32, %c0_i32_0 : i32, i32
  }
  func.func @transform_2(%arg0: i32) -> (i32, i32) {
    %c0_i32 = arith.constant 0 : i32
    %c0_i32_0 = arith.constant 0 : i32
    %c0_i32_1 = arith.constant 0 : i32
    return %c0_i32, %c0_i32_0 : i32, i32
  }
  func.func @transform_3(%arg0: i32) -> (i32, i32) {
    %c0_i32 = arith.constant 0 : i32
    %c0_i32_0 = arith.constant 0 : i32
    return %arg0, %c0_i32 : i32, i32
  }
  func.func @transform_4(%arg0: i32) -> (i32, i32) {
    %c0_i32 = arith.constant 0 : i32
    %c0_i32_0 = arith.constant 0 : i32
    return %arg0, %c0_i32 : i32, i32
  }
}

module attributes {stable_mosaic.version = 11 : i64} {
  func.func @_qkv_kernel(%arg0: i32, %arg1: memref<64x128xf32, #tpu.memory_space<vmem>>, %arg2: memref<128x128xf32, #tpu.memory_space<vmem>>, %arg3: memref<1x128xf32, #tpu.memory_space<vmem>>, %arg4: memref<128x256xf32, #tpu.memory_space<vmem>>, %arg5: memref<1x256xf32, #tpu.memory_space<vmem>>, %arg6: memref<64x128xf32, #tpu.memory_space<vmem>>, %arg7: memref<64x256xf32, #tpu.memory_space<vmem>>) attributes {dimension_semantics = [#tpu.dimension_semantics<parallel>], iteration_bounds = array<i64: 2>, scalar_prefetch = 0 : i64, scratch_operands = 0 : i64, tpu.core_type = #tpu.core_type<tc>, window_params = [{transform_indices = @transform_0, window_bounds = array<i64: 64, 128>}, {pipeline_mode = #tpu.pipeline_mode<synchronous>, transform_indices = @transform_1, window_bounds = array<i64: 128, 128>}, {pipeline_mode = #tpu.pipeline_mode<synchronous>, transform_indices = @transform_2, window_bounds = array<i64: 1, 128>}, {pipeline_mode = #tpu.pipeline_mode<synchronous>, transform_indices = @transform_3, window_bounds = array<i64: 128, 256>}, {pipeline_mode = #tpu.pipeline_mode<synchronous>, transform_indices = @transform_4, window_bounds = array<i64: 1, 256>}, {transform_indices = @transform_5, window_bounds = array<i64: 64, 128>}, {transform_indices = @transform_6, window_bounds = array<i64: 64, 256>}]} {
    %c0 = arith.constant 0 : index
    %c0_0 = arith.constant 0 : index
    %0 = vector.load %arg1[%c0, %c0_0] : memref<64x128xf32, #tpu.memory_space<vmem>>, vector<64x128xf32>
    %c0_1 = arith.constant 0 : index
    %c0_2 = arith.constant 0 : index
    %1 = vector.load %arg2[%c0_1, %c0_2] : memref<128x128xf32, #tpu.memory_space<vmem>>, vector<128x128xf32>
    %cst = arith.constant dense<0.000000e+00> : vector<64x128xf32>
    %2 = tpu.matmul %0, %1, %cst {dimension_numbers = #tpu.dot_dimension_numbers<[1], [0], [0], [1], [0, 0, 1, 1], [], []>} : vector<64x128xf32>, vector<128x128xf32>, vector<64x128xf32> -> vector<64x128xf32>
    %c0_3 = arith.constant 0 : index
    %c0_4 = arith.constant 0 : index
    %3 = vector.load %arg3[%c0_3, %c0_4] : memref<1x128xf32, #tpu.memory_space<vmem>>, vector<1x128xf32>
    %4 = vector.broadcast %3 : vector<1x128xf32> to vector<64x128xf32>
    %5 = arith.addf %2, %4 : vector<64x128xf32>
    %c0_5 = arith.constant 0 : index
    %c0_6 = arith.constant 0 : index
    %6 = vector.load %arg6[%c0_5, %c0_6] : memref<64x128xf32, #tpu.memory_space<vmem>>, vector<64x128xf32>
    tpu.vector_store %arg6[%c0_5, %c0_6], %5 {strides = array<i32>} : memref<64x128xf32, #tpu.memory_space<vmem>>, vector<64x128xf32>,
    %c0_7 = arith.constant 0 : index
    %c0_8 = arith.constant 0 : index
    %7 = vector.load %arg4[%c0_7, %c0_8] : memref<128x256xf32, #tpu.memory_space<vmem>>, vector<128x256xf32>
    %cst_9 = arith.constant dense<0.000000e+00> : vector<64x256xf32>
    %8 = tpu.matmul %0, %7, %cst_9 {dimension_numbers = #tpu.dot_dimension_numbers<[1], [0], [0], [1], [0, 0, 1, 1], [], []>} : vector<64x128xf32>, vector<128x256xf32>, vector<64x256xf32> -> vector<64x256xf32>
    %c0_10 = arith.constant 0 : index
    %c0_11 = arith.constant 0 : index
    %9 = vector.load %arg5[%c0_10, %c0_11] : memref<1x256xf32, #tpu.memory_space<vmem>>, vector<1x256xf32>
    %10 = vector.broadcast %9 : vector<1x256xf32> to vector<64x256xf32>
    %11 = arith.addf %8, %10 : vector<64x256xf32>
    %c0_12 = arith.constant 0 : index
    %c0_13 = arith.constant 0 : index
    %12 = vector.load %arg7[%c0_12, %c0_13] : memref<64x256xf32, #tpu.memory_space<vmem>>, vector<64x256xf32>
    tpu.vector_store %arg7[%c0_12, %c0_13], %11 {strides = array<i32>} : memref<64x256xf32, #tpu.memory_space<vmem>>, vector<64x256xf32>,
    return
  }
  func.func @transform_0(%arg0: i32) -> (i32, i32) {
    %c0_i32 = arith.constant 0 : i32
    %c0_i32_0 = arith.constant 0 : i32
    return %arg0, %c0_i32 : i32, i32
  }
  func.func @transform_1(%arg0: i32) -> (i32, i32) {
    %c0_i32 = arith.constant 0 : i32
    %c0_i32_0 = arith.constant 0 : i32
    %c0_i32_1 = arith.constant 0 : i32
    return %c0_i32, %c0_i32_0 : i32, i32
  }
  func.func @transform_2(%arg0: i32) -> (i32, i32) {
    %c0_i32 = arith.constant 0 : i32
    %c0_i32_0 = arith.constant 0 : i32
    %c0_i32_1 = arith.constant 0 : i32
    return %c0_i32, %c0_i32_0 : i32, i32
  }
  func.func @transform_3(%arg0: i32) -> (i32, i32) {
    %c0_i32 = arith.constant 0 : i32
    %c0_i32_0 = arith.constant 0 : i32
    %c0_i32_1 = arith.constant 0 : i32
    return %c0_i32, %c0_i32_0 : i32, i32
  }
  func.func @transform_4(%arg0: i32) -> (i32, i32) {
    %c0_i32 = arith.constant 0 : i32
    %c0_i32_0 = arith.constant 0 : i32
    %c0_i32_1 = arith.constant 0 : i32
    return %c0_i32, %c0_i32_0 : i32, i32
  }
  func.func @transform_5(%arg0: i32) -> (i32, i32) {
    %c0_i32 = arith.constant 0 : i32
    %c0_i32_0 = arith.constant 0 : i32
    return %arg0, %c0_i32 : i32, i32
  }
  func.func @transform_6(%arg0: i32) -> (i32, i32) {
    %c0_i32 = arith.constant 0 : i32
    %c0_i32_0 = arith.constant 0 : i32
    return %arg0, %c0_i32 : i32, i32
  }
}

module attributes {stable_mosaic.version = 11 : i64} {
  func.func @_attention_kernel(%arg0: i32, %arg1: memref<8x16xf32, #tpu.memory_space<vmem>>, %arg2: memref<1x16x128xf32, #tpu.memory_space<vmem>>, %arg3: memref<1x16x256xf32, #tpu.memory_space<vmem>>, %arg4: memref<1x16x128xf32, #tpu.memory_space<vmem>>) attributes {dimension_semantics = [#tpu.dimension_semantics<parallel>], iteration_bounds = array<i64: 8>, scalar_prefetch = 0 : i64, scratch_operands = 0 : i64, tpu.core_type = #tpu.core_type<tc>, window_params = [{pipeline_mode = #tpu.pipeline_mode<synchronous>, transform_indices = @transform_0, window_bounds = array<i64: 8, 16>}, {transform_indices = @transform_1, window_bounds = array<i64: 1, 16, 128>}, {transform_indices = @transform_2, window_bounds = array<i64: 1, 16, 256>}, {transform_indices = @transform_3, window_bounds = array<i64: 1, 16, 128>}]} {
    %c0 = arith.constant 0 : index
    %c0_0 = arith.constant 0 : index
    %c0_1 = arith.constant 0 : index
    %0 = vector.load %arg2[%c0, %c0_0, %c0_1] : memref<1x16x128xf32, #tpu.memory_space<vmem>>, vector<1x16x128xf32>
    %1 = vector.shape_cast %0 : vector<1x16x128xf32> to vector<16x128xf32>
    %c0_2 = arith.constant 0 : index
    %c0_3 = arith.constant 0 : index
    %c0_4 = arith.constant 0 : index
    %2 = vector.load %arg3[%c0_2, %c0_3, %c0_4] : memref<1x16x256xf32, #tpu.memory_space<vmem>>, vector<1x16x256xf32>
    %3 = vector.shape_cast %2 : vector<1x16x256xf32> to vector<16x256xf32>
    %4 = vector.extract_strided_slice %3 {offsets = [0, 0], sizes = [16, 128], strides = [1, 1]} : vector<16x256xf32> to vector<16x128xf32>
    %5 = vector.extract_strided_slice %3 {offsets = [0, 128], sizes = [16, 128], strides = [1, 1]} : vector<16x256xf32> to vector<16x128xf32>
    %c0_5 = arith.constant 0 : index
    %c0_6 = arith.constant 0 : index
    %6 = vector.load %arg1[%c0_5, %c0_6] : memref<8x16xf32, #tpu.memory_space<vmem>>, vector<8x16xf32>
    %7 = vector.extract_strided_slice %1 {offsets = [0, 0], sizes = [16, 16], strides = [1, 1]} : vector<16x128xf32> to vector<16x16xf32>
    %8 = vector.extract_strided_slice %4 {offsets = [0, 0], sizes = [16, 16], strides = [1, 1]} : vector<16x128xf32> to vector<16x16xf32>
    %9 = vector.extract_strided_slice %5 {offsets = [0, 0], sizes = [16, 16], strides = [1, 1]} : vector<16x128xf32> to vector<16x16xf32>
    %cst = arith.constant dense<0.000000e+00> : vector<16x16xf32>
    %10 = tpu.matmul %7, %8, %cst {dimension_numbers = #tpu.dot_dimension_numbers<[1], [1], [0], [0], [0, 0, 1, 0], [], []>} : vector<16x16xf32>, vector<16x16xf32>, vector<16x16xf32> -> vector<16x16xf32>
    %11 = vector.extract_strided_slice %6 {offsets = [0, 0], sizes = [1, 16], strides = [1, 1]} : vector<8x16xf32> to vector<1x16xf32>
    %12 = vector.broadcast %11 : vector<1x16xf32> to vector<16x16xf32>
    %13 = arith.addf %10, %12 : vector<16x16xf32>
    %cst_7 = arith.constant dense<0xFF800000> : vector<16xf32>
    %14 = vector.multi_reduction <maximumf>, %13, %cst_7 [1] : vector<16x16xf32> to vector<16xf32>
    %15 = vector.shape_cast %14 : vector<16xf32> to vector<16x1xf32>
    %16 = vector.broadcast %15 : vector<16x1xf32> to vector<16x16xf32>
    %17 = arith.subf %13, %16 : vector<16x16xf32>
    %18 = math.exp %17 : vector<16x16xf32>
    %cst_8 = arith.constant dense<0.000000e+00> : vector<16xf32>
    %19 = vector.multi_reduction <add>, %18, %cst_8 [1] : vector<16x16xf32> to vector<16xf32>
    %20 = vector.shape_cast %19 : vector<16xf32> to vector<16x1xf32>
    %21 = tpu.reciprocal %20 {approx = true} : vector<16x1xf32> -> vector<16x1xf32>
    %22 = vector.broadcast %21 : vector<16x1xf32> to vector<16x16xf32>
    %23 = arith.mulf %18, %22 : vector<16x16xf32>
    %cst_9 = arith.constant dense<0.000000e+00> : vector<16x16xf32>
    %24 = tpu.matmul %23, %9, %cst_9 {dimension_numbers = #tpu.dot_dimension_numbers<[1], [0], [0], [1], [0, 0, 1, 1], [], []>} : vector<16x16xf32>, vector<16x16xf32>, vector<16x16xf32> -> vector<16x16xf32>
    %25 = vector.extract_strided_slice %1 {offsets = [0, 16], sizes = [16, 16], strides = [1, 1]} : vector<16x128xf32> to vector<16x16xf32>
    %26 = vector.extract_strided_slice %4 {offsets = [0, 16], sizes = [16, 16], strides = [1, 1]} : vector<16x128xf32> to vector<16x16xf32>
    %27 = vector.extract_strided_slice %5 {offsets = [0, 16], sizes = [16, 16], strides = [1, 1]} : vector<16x128xf32> to vector<16x16xf32>
    %cst_10 = arith.constant dense<0.000000e+00> : vector<16x16xf32>
    %28 = tpu.matmul %25, %26, %cst_10 {dimension_numbers = #tpu.dot_dimension_numbers<[1], [1], [0], [0], [0, 0, 1, 0], [], []>} : vector<16x16xf32>, vector<16x16xf32>, vector<16x16xf32> -> vector<16x16xf32>
    %29 = vector.extract_strided_slice %6 {offsets = [1, 0], sizes = [1, 16], strides = [1, 1]} : vector<8x16xf32> to vector<1x16xf32>
    %30 = vector.broadcast %29 : vector<1x16xf32> to vector<16x16xf32>
    %31 = arith.addf %28, %30 : vector<16x16xf32>
    %cst_11 = arith.constant dense<0xFF800000> : vector<16xf32>
    %32 = vector.multi_reduction <maximumf>, %31, %cst_11 [1] : vector<16x16xf32> to vector<16xf32>
    %33 = vector.shape_cast %32 : vector<16xf32> to vector<16x1xf32>
    %34 = vector.broadcast %33 : vector<16x1xf32> to vector<16x16xf32>
    %35 = arith.subf %31, %34 : vector<16x16xf32>
    %36 = math.exp %35 : vector<16x16xf32>
    %cst_12 = arith.constant dense<0.000000e+00> : vector<16xf32>
    %37 = vector.multi_reduction <add>, %36, %cst_12 [1] : vector<16x16xf32> to vector<16xf32>
    %38 = vector.shape_cast %37 : vector<16xf32> to vector<16x1xf32>
    %39 = tpu.reciprocal %38 {approx = true} : vector<16x1xf32> -> vector<16x1xf32>
    %40 = vector.broadcast %39 : vector<16x1xf32> to vector<16x16xf32>
    %41 = arith.mulf %36, %40 : vector<16x16xf32>
    %cst_13 = arith.constant dense<0.000000e+00> : vector<16x16xf32>
    %42 = tpu.matmul %41, %27, %cst_13 {dimension_numbers = #tpu.dot_dimension_numbers<[1], [0], [0], [1], [0, 0, 1, 1], [], []>} : vector<16x16xf32>, vector<16x16xf32>, vector<16x16xf32> -> vector<16x16xf32>
    %43 = vector.extract_strided_slice %1 {offsets = [0, 32], sizes = [16, 16], strides = [1, 1]} : vector<16x128xf32> to vector<16x16xf32>
    %44 = vector.extract_strided_slice %4 {offsets = [0, 32], sizes = [16, 16], strides = [1, 1]} : vector<16x128xf32> to vector<16x16xf32>
    %45 = vector.extract_strided_slice %5 {offsets = [0, 32], sizes = [16, 16], strides = [1, 1]} : vector<16x128xf32> to vector<16x16xf32>
    %cst_14 = arith.constant dense<0.000000e+00> : vector<16x16xf32>
    %46 = tpu.matmul %43, %44, %cst_14 {dimension_numbers = #tpu.dot_dimension_numbers<[1], [1], [0], [0], [0, 0, 1, 0], [], []>} : vector<16x16xf32>, vector<16x16xf32>, vector<16x16xf32> -> vector<16x16xf32>
    %47 = vector.extract_strided_slice %6 {offsets = [2, 0], sizes = [1, 16], strides = [1, 1]} : vector<8x16xf32> to vector<1x16xf32>
    %48 = vector.broadcast %47 : vector<1x16xf32> to vector<16x16xf32>
    %49 = arith.addf %46, %48 : vector<16x16xf32>
    %cst_15 = arith.constant dense<0xFF800000> : vector<16xf32>
    %50 = vector.multi_reduction <maximumf>, %49, %cst_15 [1] : vector<16x16xf32> to vector<16xf32>
    %51 = vector.shape_cast %50 : vector<16xf32> to vector<16x1xf32>
    %52 = vector.broadcast %51 : vector<16x1xf32> to vector<16x16xf32>
    %53 = arith.subf %49, %52 : vector<16x16xf32>
    %54 = math.exp %53 : vector<16x16xf32>
    %cst_16 = arith.constant dense<0.000000e+00> : vector<16xf32>
    %55 = vector.multi_reduction <add>, %54, %cst_16 [1] : vector<16x16xf32> to vector<16xf32>
    %56 = vector.shape_cast %55 : vector<16xf32> to vector<16x1xf32>
    %57 = tpu.reciprocal %56 {approx = true} : vector<16x1xf32> -> vector<16x1xf32>
    %58 = vector.broadcast %57 : vector<16x1xf32> to vector<16x16xf32>
    %59 = arith.mulf %54, %58 : vector<16x16xf32>
    %cst_17 = arith.constant dense<0.000000e+00> : vector<16x16xf32>
    %60 = tpu.matmul %59, %45, %cst_17 {dimension_numbers = #tpu.dot_dimension_numbers<[1], [0], [0], [1], [0, 0, 1, 1], [], []>} : vector<16x16xf32>, vector<16x16xf32>, vector<16x16xf32> -> vector<16x16xf32>
    %61 = vector.extract_strided_slice %1 {offsets = [0, 48], sizes = [16, 16], strides = [1, 1]} : vector<16x128xf32> to vector<16x16xf32>
    %62 = vector.extract_strided_slice %4 {offsets = [0, 48], sizes = [16, 16], strides = [1, 1]} : vector<16x128xf32> to vector<16x16xf32>
    %63 = vector.extract_strided_slice %5 {offsets = [0, 48], sizes = [16, 16], strides = [1, 1]} : vector<16x128xf32> to vector<16x16xf32>
    %cst_18 = arith.constant dense<0.000000e+00> : vector<16x16xf32>
    %64 = tpu.matmul %61, %62, %cst_18 {dimension_numbers = #tpu.dot_dimension_numbers<[1], [1], [0], [0], [0, 0, 1, 0], [], []>} : vector<16x16xf32>, vector<16x16xf32>, vector<16x16xf32> -> vector<16x16xf32>
    %65 = vector.extract_strided_slice %6 {offsets = [3, 0], sizes = [1, 16], strides = [1, 1]} : vector<8x16xf32> to vector<1x16xf32>
    %66 = vector.broadcast %65 : vector<1x16xf32> to vector<16x16xf32>
    %67 = arith.addf %64, %66 : vector<16x16xf32>
    %cst_19 = arith.constant dense<0xFF800000> : vector<16xf32>
    %68 = vector.multi_reduction <maximumf>, %67, %cst_19 [1] : vector<16x16xf32> to vector<16xf32>
    %69 = vector.shape_cast %68 : vector<16xf32> to vector<16x1xf32>
    %70 = vector.broadcast %69 : vector<16x1xf32> to vector<16x16xf32>
    %71 = arith.subf %67, %70 : vector<16x16xf32>
    %72 = math.exp %71 : vector<16x16xf32>
    %cst_20 = arith.constant dense<0.000000e+00> : vector<16xf32>
    %73 = vector.multi_reduction <add>, %72, %cst_20 [1] : vector<16x16xf32> to vector<16xf32>
    %74 = vector.shape_cast %73 : vector<16xf32> to vector<16x1xf32>
    %75 = tpu.reciprocal %74 {approx = true} : vector<16x1xf32> -> vector<16x1xf32>
    %76 = vector.broadcast %75 : vector<16x1xf32> to vector<16x16xf32>
    %77 = arith.mulf %72, %76 : vector<16x16xf32>
    %cst_21 = arith.constant dense<0.000000e+00> : vector<16x16xf32>
    %78 = tpu.matmul %77, %63, %cst_21 {dimension_numbers = #tpu.dot_dimension_numbers<[1], [0], [0], [1], [0, 0, 1, 1], [], []>} : vector<16x16xf32>, vector<16x16xf32>, vector<16x16xf32> -> vector<16x16xf32>
    %79 = vector.extract_strided_slice %1 {offsets = [0, 64], sizes = [16, 16], strides = [1, 1]} : vector<16x128xf32> to vector<16x16xf32>
    %80 = vector.extract_strided_slice %4 {offsets = [0, 64], sizes = [16, 16], strides = [1, 1]} : vector<16x128xf32> to vector<16x16xf32>
    %81 = vector.extract_strided_slice %5 {offsets = [0, 64], sizes = [16, 16], strides = [1, 1]} : vector<16x128xf32> to vector<16x16xf32>
    %cst_22 = arith.constant dense<0.000000e+00> : vector<16x16xf32>
    %82 = tpu.matmul %79, %80, %cst_22 {dimension_numbers = #tpu.dot_dimension_numbers<[1], [1], [0], [0], [0, 0, 1, 0], [], []>} : vector<16x16xf32>, vector<16x16xf32>, vector<16x16xf32> -> vector<16x16xf32>
    %83 = vector.extract_strided_slice %6 {offsets = [4, 0], sizes = [1, 16], strides = [1, 1]} : vector<8x16xf32> to vector<1x16xf32>
    %84 = vector.broadcast %83 : vector<1x16xf32> to vector<16x16xf32>
    %85 = arith.addf %82, %84 : vector<16x16xf32>
    %cst_23 = arith.constant dense<0xFF800000> : vector<16xf32>
    %86 = vector.multi_reduction <maximumf>, %85, %cst_23 [1] : vector<16x16xf32> to vector<16xf32>
    %87 = vector.shape_cast %86 : vector<16xf32> to vector<16x1xf32>
    %88 = vector.broadcast %87 : vector<16x1xf32> to vector<16x16xf32>
    %89 = arith.subf %85, %88 : vector<16x16xf32>
    %90 = math.exp %89 : vector<16x16xf32>
    %cst_24 = arith.constant dense<0.000000e+00> : vector<16xf32>
    %91 = vector.multi_reduction <add>, %90, %cst_24 [1] : vector<16x16xf32> to vector<16xf32>
    %92 = vector.shape_cast %91 : vector<16xf32> to vector<16x1xf32>
    %93 = tpu.reciprocal %92 {approx = true} : vector<16x1xf32> -> vector<16x1xf32>
    %94 = vector.broadcast %93 : vector<16x1xf32> to vector<16x16xf32>
    %95 = arith.mulf %90, %94 : vector<16x16xf32>
    %cst_25 = arith.constant dense<0.000000e+00> : vector<16x16xf32>
    %96 = tpu.matmul %95, %81, %cst_25 {dimension_numbers = #tpu.dot_dimension_numbers<[1], [0], [0], [1], [0, 0, 1, 1], [], []>} : vector<16x16xf32>, vector<16x16xf32>, vector<16x16xf32> -> vector<16x16xf32>
    %97 = vector.extract_strided_slice %1 {offsets = [0, 80], sizes = [16, 16], strides = [1, 1]} : vector<16x128xf32> to vector<16x16xf32>
    %98 = vector.extract_strided_slice %4 {offsets = [0, 80], sizes = [16, 16], strides = [1, 1]} : vector<16x128xf32> to vector<16x16xf32>
    %99 = vector.extract_strided_slice %5 {offsets = [0, 80], sizes = [16, 16], strides = [1, 1]} : vector<16x128xf32> to vector<16x16xf32>
    %cst_26 = arith.constant dense<0.000000e+00> : vector<16x16xf32>
    %100 = tpu.matmul %97, %98, %cst_26 {dimension_numbers = #tpu.dot_dimension_numbers<[1], [1], [0], [0], [0, 0, 1, 0], [], []>} : vector<16x16xf32>, vector<16x16xf32>, vector<16x16xf32> -> vector<16x16xf32>
    %101 = vector.extract_strided_slice %6 {offsets = [5, 0], sizes = [1, 16], strides = [1, 1]} : vector<8x16xf32> to vector<1x16xf32>
    %102 = vector.broadcast %101 : vector<1x16xf32> to vector<16x16xf32>
    %103 = arith.addf %100, %102 : vector<16x16xf32>
    %cst_27 = arith.constant dense<0xFF800000> : vector<16xf32>
    %104 = vector.multi_reduction <maximumf>, %103, %cst_27 [1] : vector<16x16xf32> to vector<16xf32>
    %105 = vector.shape_cast %104 : vector<16xf32> to vector<16x1xf32>
    %106 = vector.broadcast %105 : vector<16x1xf32> to vector<16x16xf32>
    %107 = arith.subf %103, %106 : vector<16x16xf32>
    %108 = math.exp %107 : vector<16x16xf32>
    %cst_28 = arith.constant dense<0.000000e+00> : vector<16xf32>
    %109 = vector.multi_reduction <add>, %108, %cst_28 [1] : vector<16x16xf32> to vector<16xf32>
    %110 = vector.shape_cast %109 : vector<16xf32> to vector<16x1xf32>
    %111 = tpu.reciprocal %110 {approx = true} : vector<16x1xf32> -> vector<16x1xf32>
    %112 = vector.broadcast %111 : vector<16x1xf32> to vector<16x16xf32>
    %113 = arith.mulf %108, %112 : vector<16x16xf32>
    %cst_29 = arith.constant dense<0.000000e+00> : vector<16x16xf32>
    %114 = tpu.matmul %113, %99, %cst_29 {dimension_numbers = #tpu.dot_dimension_numbers<[1], [0], [0], [1], [0, 0, 1, 1], [], []>} : vector<16x16xf32>, vector<16x16xf32>, vector<16x16xf32> -> vector<16x16xf32>
    %115 = vector.extract_strided_slice %1 {offsets = [0, 96], sizes = [16, 16], strides = [1, 1]} : vector<16x128xf32> to vector<16x16xf32>
    %116 = vector.extract_strided_slice %4 {offsets = [0, 96], sizes = [16, 16], strides = [1, 1]} : vector<16x128xf32> to vector<16x16xf32>
    %117 = vector.extract_strided_slice %5 {offsets = [0, 96], sizes = [16, 16], strides = [1, 1]} : vector<16x128xf32> to vector<16x16xf32>
    %cst_30 = arith.constant dense<0.000000e+00> : vector<16x16xf32>
    %118 = tpu.matmul %115, %116, %cst_30 {dimension_numbers = #tpu.dot_dimension_numbers<[1], [1], [0], [0], [0, 0, 1, 0], [], []>} : vector<16x16xf32>, vector<16x16xf32>, vector<16x16xf32> -> vector<16x16xf32>
    %119 = vector.extract_strided_slice %6 {offsets = [6, 0], sizes = [1, 16], strides = [1, 1]} : vector<8x16xf32> to vector<1x16xf32>
    %120 = vector.broadcast %119 : vector<1x16xf32> to vector<16x16xf32>
    %121 = arith.addf %118, %120 : vector<16x16xf32>
    %cst_31 = arith.constant dense<0xFF800000> : vector<16xf32>
    %122 = vector.multi_reduction <maximumf>, %121, %cst_31 [1] : vector<16x16xf32> to vector<16xf32>
    %123 = vector.shape_cast %122 : vector<16xf32> to vector<16x1xf32>
    %124 = vector.broadcast %123 : vector<16x1xf32> to vector<16x16xf32>
    %125 = arith.subf %121, %124 : vector<16x16xf32>
    %126 = math.exp %125 : vector<16x16xf32>
    %cst_32 = arith.constant dense<0.000000e+00> : vector<16xf32>
    %127 = vector.multi_reduction <add>, %126, %cst_32 [1] : vector<16x16xf32> to vector<16xf32>
    %128 = vector.shape_cast %127 : vector<16xf32> to vector<16x1xf32>
    %129 = tpu.reciprocal %128 {approx = true} : vector<16x1xf32> -> vector<16x1xf32>
    %130 = vector.broadcast %129 : vector<16x1xf32> to vector<16x16xf32>
    %131 = arith.mulf %126, %130 : vector<16x16xf32>
    %cst_33 = arith.constant dense<0.000000e+00> : vector<16x16xf32>
    %132 = tpu.matmul %131, %117, %cst_33 {dimension_numbers = #tpu.dot_dimension_numbers<[1], [0], [0], [1], [0, 0, 1, 1], [], []>} : vector<16x16xf32>, vector<16x16xf32>, vector<16x16xf32> -> vector<16x16xf32>
    %133 = vector.extract_strided_slice %1 {offsets = [0, 112], sizes = [16, 16], strides = [1, 1]} : vector<16x128xf32> to vector<16x16xf32>
    %134 = vector.extract_strided_slice %4 {offsets = [0, 112], sizes = [16, 16], strides = [1, 1]} : vector<16x128xf32> to vector<16x16xf32>
    %135 = vector.extract_strided_slice %5 {offsets = [0, 112], sizes = [16, 16], strides = [1, 1]} : vector<16x128xf32> to vector<16x16xf32>
    %cst_34 = arith.constant dense<0.000000e+00> : vector<16x16xf32>
    %136 = tpu.matmul %133, %134, %cst_34 {dimension_numbers = #tpu.dot_dimension_numbers<[1], [1], [0], [0], [0, 0, 1, 0], [], []>} : vector<16x16xf32>, vector<16x16xf32>, vector<16x16xf32> -> vector<16x16xf32>
    %137 = vector.extract_strided_slice %6 {offsets = [7, 0], sizes = [1, 16], strides = [1, 1]} : vector<8x16xf32> to vector<1x16xf32>
    %138 = vector.broadcast %137 : vector<1x16xf32> to vector<16x16xf32>
    %139 = arith.addf %136, %138 : vector<16x16xf32>
    %cst_35 = arith.constant dense<0xFF800000> : vector<16xf32>
    %140 = vector.multi_reduction <maximumf>, %139, %cst_35 [1] : vector<16x16xf32> to vector<16xf32>
    %141 = vector.shape_cast %140 : vector<16xf32> to vector<16x1xf32>
    %142 = vector.broadcast %141 : vector<16x1xf32> to vector<16x16xf32>
    %143 = arith.subf %139, %142 : vector<16x16xf32>
    %144 = math.exp %143 : vector<16x16xf32>
    %cst_36 = arith.constant dense<0.000000e+00> : vector<16xf32>
    %145 = vector.multi_reduction <add>, %144, %cst_36 [1] : vector<16x16xf32> to vector<16xf32>
    %146 = vector.shape_cast %145 : vector<16xf32> to vector<16x1xf32>
    %147 = tpu.reciprocal %146 {approx = true} : vector<16x1xf32> -> vector<16x1xf32>
    %148 = vector.broadcast %147 : vector<16x1xf32> to vector<16x16xf32>
    %149 = arith.mulf %144, %148 : vector<16x16xf32>
    %cst_37 = arith.constant dense<0.000000e+00> : vector<16x16xf32>
    %150 = tpu.matmul %149, %135, %cst_37 {dimension_numbers = #tpu.dot_dimension_numbers<[1], [0], [0], [1], [0, 0, 1, 1], [], []>} : vector<16x16xf32>, vector<16x16xf32>, vector<16x16xf32> -> vector<16x16xf32>
    %151 = tpu.concatenate %24, %42, %60, %78, %96, %114, %132, %150 in 1 : vector<16x16xf32>, vector<16x16xf32>, vector<16x16xf32>, vector<16x16xf32>, vector<16x16xf32>, vector<16x16xf32>, vector<16x16xf32>, vector<16x16xf32> -> vector<16x128xf32>
    %c0_38 = arith.constant 0 : index
    %c0_39 = arith.constant 0 : index
    %c0_40 = arith.constant 0 : index
    %152 = vector.load %arg4[%c0_38, %c0_39, %c0_40] : memref<1x16x128xf32, #tpu.memory_space<vmem>>, vector<1x16x128xf32>
    %153 = vector.shape_cast %152 : vector<1x16x128xf32> to vector<16x128xf32>
    %154 = vector.shape_cast %151 : vector<16x128xf32> to vector<1x16x128xf32>
    tpu.vector_store %arg4[%c0_38, %c0_39, %c0_40], %154 {strides = array<i32>} : memref<1x16x128xf32, #tpu.memory_space<vmem>>, vector<1x16x128xf32>,
    return
  }
  func.func @transform_0(%arg0: i32) -> (i32, i32) {
    %c0_i32 = arith.constant 0 : i32
    %c0_i32_0 = arith.constant 0 : i32
    %c0_i32_1 = arith.constant 0 : i32
    return %c0_i32, %c0_i32_0 : i32, i32
  }
  func.func @transform_1(%arg0: i32) -> (i32, i32, i32) {
    %c0_i32 = arith.constant 0 : i32
    %c0_i32_0 = arith.constant 0 : i32
    %c0_i32_1 = arith.constant 0 : i32
    return %arg0, %c0_i32, %c0_i32_0 : i32, i32, i32
  }
  func.func @transform_2(%arg0: i32) -> (i32, i32, i32) {
    %c0_i32 = arith.constant 0 : i32
    %c0_i32_0 = arith.constant 0 : i32
    %c0_i32_1 = arith.constant 0 : i32
    return %arg0, %c0_i32, %c0_i32_0 : i32, i32, i32
  }
  func.func @transform_3(%arg0: i32) -> (i32, i32, i32) {
    %c0_i32 = arith.constant 0 : i32
    %c0_i32_0 = arith.constant 0 : i32
    %c0_i32_1 = arith.constant 0 : i32
    return %arg0, %c0_i32, %c0_i32_0 : i32, i32, i32
  }
}

module attributes {stable_mosaic.version = 11 : i64} {
  func.func @_linear_kernel(%arg0: i32, %arg1: memref<64x128xf32, #tpu.memory_space<vmem>>, %arg2: memref<128x256xf32, #tpu.memory_space<vmem>>, %arg3: memref<1x256xf32, #tpu.memory_space<vmem>>, %arg4: memref<64x256xf32, #tpu.memory_space<vmem>>) attributes {dimension_semantics = [#tpu.dimension_semantics<parallel>], iteration_bounds = array<i64: 2>, scalar_prefetch = 0 : i64, scratch_operands = 0 : i64, tpu.core_type = #tpu.core_type<tc>, window_params = [{transform_indices = @transform_0, window_bounds = array<i64: 64, 128>}, {pipeline_mode = #tpu.pipeline_mode<synchronous>, transform_indices = @transform_1, window_bounds = array<i64: 128, 256>}, {pipeline_mode = #tpu.pipeline_mode<synchronous>, transform_indices = @transform_2, window_bounds = array<i64: 1, 256>}, {transform_indices = @transform_3, window_bounds = array<i64: 64, 256>}]} {
    %c0 = arith.constant 0 : index
    %c0_0 = arith.constant 0 : index
    %0 = vector.load %arg1[%c0, %c0_0] : memref<64x128xf32, #tpu.memory_space<vmem>>, vector<64x128xf32>
    %c0_1 = arith.constant 0 : index
    %c0_2 = arith.constant 0 : index
    %1 = vector.load %arg2[%c0_1, %c0_2] : memref<128x256xf32, #tpu.memory_space<vmem>>, vector<128x256xf32>
    %cst = arith.constant dense<0.000000e+00> : vector<64x256xf32>
    %2 = tpu.matmul %0, %1, %cst {dimension_numbers = #tpu.dot_dimension_numbers<[1], [0], [0], [1], [0, 0, 1, 1], [], []>} : vector<64x128xf32>, vector<128x256xf32>, vector<64x256xf32> -> vector<64x256xf32>
    %c0_3 = arith.constant 0 : index
    %c0_4 = arith.constant 0 : index
    %3 = vector.load %arg3[%c0_3, %c0_4] : memref<1x256xf32, #tpu.memory_space<vmem>>, vector<1x256xf32>
    %4 = vector.broadcast %3 : vector<1x256xf32> to vector<64x256xf32>
    %5 = arith.addf %2, %4 : vector<64x256xf32>
    %c0_5 = arith.constant 0 : index
    %c0_6 = arith.constant 0 : index
    %6 = vector.load %arg4[%c0_5, %c0_6] : memref<64x256xf32, #tpu.memory_space<vmem>>, vector<64x256xf32>
    tpu.vector_store %arg4[%c0_5, %c0_6], %5 {strides = array<i32>} : memref<64x256xf32, #tpu.memory_space<vmem>>, vector<64x256xf32>,
    return
  }
  func.func @transform_0(%arg0: i32) -> (i32, i32) {
    %c0_i32 = arith.constant 0 : i32
    %c0_i32_0 = arith.constant 0 : i32
    return %arg0, %c0_i32 : i32, i32
  }
  func.func @transform_1(%arg0: i32) -> (i32, i32) {
    %c0_i32 = arith.constant 0 : i32
    %c0_i32_0 = arith.constant 0 : i32
    %c0_i32_1 = arith.constant 0 : i32
    return %c0_i32, %c0_i32_0 : i32, i32
  }
  func.func @transform_2(%arg0: i32) -> (i32, i32) {
    %c0_i32 = arith.constant 0 : i32
    %c0_i32_0 = arith.constant 0 : i32
    %c0_i32_1 = arith.constant 0 : i32
    return %c0_i32, %c0_i32_0 : i32, i32
  }
  func.func @transform_3(%arg0: i32) -> (i32, i32) {
    %c0_i32 = arith.constant 0 : i32
    %c0_i32_0 = arith.constant 0 : i32
    return %arg0, %c0_i32 : i32, i32
  }
}

module attributes {stable_mosaic.version = 11 : i64} {
  func.func @_ffn_kernel(%arg0: i32, %arg1: memref<64x128xf32, #tpu.memory_space<vmem>>, %arg2: memref<128x256xf32, #tpu.memory_space<vmem>>, %arg3: memref<1x256xf32, #tpu.memory_space<vmem>>, %arg4: memref<256x128xf32, #tpu.memory_space<vmem>>, %arg5: memref<1x128xf32, #tpu.memory_space<vmem>>, %arg6: memref<64x128xf32, #tpu.memory_space<vmem>>) attributes {dimension_semantics = [#tpu.dimension_semantics<parallel>], iteration_bounds = array<i64: 2>, scalar_prefetch = 0 : i64, scratch_operands = 0 : i64, tpu.core_type = #tpu.core_type<tc>, window_params = [{transform_indices = @transform_0, window_bounds = array<i64: 64, 128>}, {pipeline_mode = #tpu.pipeline_mode<synchronous>, transform_indices = @transform_1, window_bounds = array<i64: 128, 256>}, {pipeline_mode = #tpu.pipeline_mode<synchronous>, transform_indices = @transform_2, window_bounds = array<i64: 1, 256>}, {pipeline_mode = #tpu.pipeline_mode<synchronous>, transform_indices = @transform_3, window_bounds = array<i64: 256, 128>}, {pipeline_mode = #tpu.pipeline_mode<synchronous>, transform_indices = @transform_4, window_bounds = array<i64: 1, 128>}, {transform_indices = @transform_5, window_bounds = array<i64: 64, 128>}]} {
    %c0 = arith.constant 0 : index
    %c0_0 = arith.constant 0 : index
    %0 = vector.load %arg1[%c0, %c0_0] : memref<64x128xf32, #tpu.memory_space<vmem>>, vector<64x128xf32>
    %c0_1 = arith.constant 0 : index
    %c0_2 = arith.constant 0 : index
    %1 = vector.load %arg2[%c0_1, %c0_2] : memref<128x256xf32, #tpu.memory_space<vmem>>, vector<128x256xf32>
    %cst = arith.constant dense<0.000000e+00> : vector<64x256xf32>
    %2 = tpu.matmul %0, %1, %cst {dimension_numbers = #tpu.dot_dimension_numbers<[1], [0], [0], [1], [0, 0, 1, 1], [], []>} : vector<64x128xf32>, vector<128x256xf32>, vector<64x256xf32> -> vector<64x256xf32>
    %c0_3 = arith.constant 0 : index
    %c0_4 = arith.constant 0 : index
    %3 = vector.load %arg3[%c0_3, %c0_4] : memref<1x256xf32, #tpu.memory_space<vmem>>, vector<1x256xf32>
    %4 = vector.broadcast %3 : vector<1x256xf32> to vector<64x256xf32>
    %5 = arith.addf %2, %4 : vector<64x256xf32>
    %cst_5 = arith.constant 0.000000e+00 : f32
    %6 = vector.broadcast %cst_5 : f32 to vector<64x256xf32>
    %7 = arith.maximumf %5, %6 : vector<64x256xf32>
    %c0_6 = arith.constant 0 : index
    %c0_7 = arith.constant 0 : index
    %8 = vector.load %arg4[%c0_6, %c0_7] : memref<256x128xf32, #tpu.memory_space<vmem>>, vector<256x128xf32>
    %cst_8 = arith.constant dense<0.000000e+00> : vector<64x128xf32>
    %9 = tpu.matmul %7, %8, %cst_8 {dimension_numbers = #tpu.dot_dimension_numbers<[1], [0], [0], [1], [0, 0, 1, 1], [], []>} : vector<64x256xf32>, vector<256x128xf32>, vector<64x128xf32> -> vector<64x128xf32>
    %c0_9 = arith.constant 0 : index
    %c0_10 = arith.constant 0 : index
    %10 = vector.load %arg5[%c0_9, %c0_10] : memref<1x128xf32, #tpu.memory_space<vmem>>, vector<1x128xf32>
    %11 = vector.broadcast %10 : vector<1x128xf32> to vector<64x128xf32>
    %12 = arith.addf %9, %11 : vector<64x128xf32>
    %c0_11 = arith.constant 0 : index
    %c0_12 = arith.constant 0 : index
    %13 = vector.load %arg6[%c0_11, %c0_12] : memref<64x128xf32, #tpu.memory_space<vmem>>, vector<64x128xf32>
    tpu.vector_store %arg6[%c0_11, %c0_12], %12 {strides = array<i32>} : memref<64x128xf32, #tpu.memory_space<vmem>>, vector<64x128xf32>,
    return
  }
  func.func @transform_0(%arg0: i32) -> (i32, i32) {
    %c0_i32 = arith.constant 0 : i32
    %c0_i32_0 = arith.constant 0 : i32
    return %arg0, %c0_i32 : i32, i32
  }
  func.func @transform_1(%arg0: i32) -> (i32, i32) {
    %c0_i32 = arith.constant 0 : i32
    %c0_i32_0 = arith.constant 0 : i32
    %c0_i32_1 = arith.constant 0 : i32
    return %c0_i32, %c0_i32_0 : i32, i32
  }
  func.func @transform_2(%arg0: i32) -> (i32, i32) {
    %c0_i32 = arith.constant 0 : i32
    %c0_i32_0 = arith.constant 0 : i32
    %c0_i32_1 = arith.constant 0 : i32
    return %c0_i32, %c0_i32_0 : i32, i32
  }
  func.func @transform_3(%arg0: i32) -> (i32, i32) {
    %c0_i32 = arith.constant 0 : i32
    %c0_i32_0 = arith.constant 0 : i32
    %c0_i32_1 = arith.constant 0 : i32
    return %c0_i32, %c0_i32_0 : i32, i32
  }
  func.func @transform_4(%arg0: i32) -> (i32, i32) {
    %c0_i32 = arith.constant 0 : i32
    %c0_i32_0 = arith.constant 0 : i32
    %c0_i32_1 = arith.constant 0 : i32
    return %c0_i32, %c0_i32_0 : i32, i32
  }
  func.func @transform_5(%arg0: i32) -> (i32, i32) {
    %c0_i32 = arith.constant 0 : i32
    %c0_i32_0 = arith.constant 0 : i32
    return %arg0, %c0_i32 : i32, i32
  }
}

</mosaic_0001>

<bundles_post_ra>
// kernel: transformer_decoder_layer.11
= control target key start
LH: loop header
LB: loop body
LE: loop exit
PB: predicated region body
PF: predicated region fallthrough
CT: control target
= control target key end

     0   :  { %s538_s12 = smov 0   ;;  %s623_s0 = inlined_call_operand.vmem [shape: f32[128,128], index: 0, kind: input, shape index: {}]   ;;  %s624_s1 = inlined_call_operand.vmem [shape: f32[128,128], index: 1, kind: input, shape index: {}]   ;;  %s625_s2 = inlined_call_operand.vmem [shape: f32[1,128], index: 2, kind: input, shape index: {}]   ;;  %s626_s3 = inlined_call_operand.vmem [shape: f32[128,128], index: 3, kind: output, shape index: {}]  }
   0x1 LB: > { %s374_s13 = sadd.s32 4294967295, %s516_s12   ;;  %p378_p0 = scmp.ge.s32.totalorder %s516_s12, 1  ;;  %s516_s12 = sphi %s538_s12, %s13_s12  }
   0x2   : > { %p138_p1 = scmp.lt.s32.totalorder %s516_s12, 3 }
   0x4   : > { %p139_p2 = pnand %p378_p0, %p138_p1 }
   0x5   : > { %v182_v0 = vld [vmem:[%s624_s1] sm:$0xff] (!%p139_p2)  ;;  %v183_v1 = vld [vmem:[%s624_s1 + $0x8] sm:$0xff] (!%p139_p2)  ;;  %v184_v2 = vld [vmem:[%s624_s1 + $0x10] sm:$0xff] (!%p139_p2)  ;;  %s379_s20 = sshll.u32 (!%p139_p2), %s374_s13, 3 }
   0x6   : > { %142 = sbr.rel (%p139_p2) target bundleno = 261 (0x105), region = 32  ;;  %v454_v3 = vpack.c.bf16 (!%p139_p2), %v183_v1, %v182_v0  ;;  %v185_v4 = vld [vmem:[%s624_s1 + $0x18] sm:$0xff] (!%p139_p2)  ;;  %p163_p3 = scmp.lt.s32.totalorder (!%p139_p2), %s379_s20, 15  ;;  %v186_v6 = vld [vmem:[%s624_s1 + $0x20] sm:$0xff] (!%p139_p2)  ;;  %v187_v7 = vld [vmem:[%s624_s1 + $0x28] sm:$0xff] (!%p139_p2) }
   0x7   : > { %v458_v5 = vpack.c.bf16 (!%p139_p2), %v185_v4, %v184_v2  ;;  %v462_v8 = vpack.c.bf16 (!%p139_p2), %v187_v7, %v186_v6  ;;  %v188_v9 = vld [vmem:[%s624_s1 + $0x30] sm:$0xff] (!%p139_p2)  ;;  %v189_v10 = vld [vmem:[%s624_s1 + $0x38] sm:$0xff] (!%p139_p2)  ;;  %v190_v14 = vld [vmem:[%s624_s1 + $0x40] sm:$0xff] (!%p139_p2) }
   0x8   : > { %455 = vmatprep.subr.bf16.mxu0 (!%p139_p2), %v454_v3  ;;  %486 = vmatprep.subr.bf16.mxu1 (!%p139_p2), %v454_v3  ;;  %v466_v13 = vpack.c.bf16 (!%p139_p2), %v189_v10, %v188_v9  ;;  %v191_v15 = vld [vmem:[%s624_s1 + $0x48] sm:$0xff] (!%p139_p2)  ;;  %v192_v17 = vld [vmem:[%s624_s1 + $0x50] sm:$0xff] (!%p139_p2)  ;;  %v193_v18 = vld [vmem:[%s624_s1 + $0x58] sm:$0xff] (!%p139_p2) }
   0x9   : > { %457 = vmatpush3.bf16.msra.mxu0 (!%p139_p2), %v454_v3  ;;  %494 = vmatpush3.bf16.msra.mxu1 (!%p139_p2), %v454_v3  ;;  %v470_v16 = vpack.c.bf16 (!%p139_p2), %v191_v15, %v190_v14  ;;  %v474_v19 = vpack.c.bf16 (!%p139_p2), %v193_v18, %v192_v17  ;;  %v194_v20 = vld [vmem:[%s624_s1 + $0x60] sm:$0xff] (!%p139_p2)  ;;  %v195_v21 = vld [vmem:[%s624_s1 + $0x68] sm:$0xff] (!%p139_p2)  ;;  %v196_v23 = vld [vmem:[%s624_s1 + $0x70] sm:$0xff] (!%p139_p2) }
   0xa   : > { %459 = vmatprep.subr.bf16.mxu0 (!%p139_p2), %v458_v5  ;;  %487 = vmatprep.subr.bf16.mxu1 (!%p139_p2), %v458_v5  ;;  %v478_v22 = vpack.c.bf16 (!%p139_p2), %v195_v21, %v194_v20  ;;  %v197_v24 = vld [vmem:[%s624_s1 + $0x78] sm:$0xff] (!%p139_p2)  ;;  %v383_v32 = vld [vmem:[%s625_s2] ss:$0 sm:$0xff] (!%p139_p2) }
   0xb   : > { %v482_v25 = vpack.c.bf16 (!%p139_p2), %v197_v24, %v196_v23 }
   0xd   : > { %s628_s20 = smov (!%p163_p3, %s379_s20), 15  ;;  %461 = vmatpush3.bf16.msra.mxu0 %v458_v5  ;;  %495 = vmatpush3.bf16.msra.mxu1 %v458_v5 }
   0xe   : > { %s380_s27 = sshll.u32 %s628_s20, 3  ;;  %463 = vmatprep.subr.bf16.mxu0 %v462_v8  ;;  %488 = vmatprep.subr.bf16.mxu1 %v462_v8 }
   0xf   : > { %s578_s7 = scalar_lea.vmem %s623_s0, %s380_s27  ;;  %s172_s4 = scalar_lea.vmem %s626_s3, %s380_s27 }
  0x10   : > { %v174_v11 = vld [vmem:[%s578_s7] sm:$0xff]  ;;  %v175_v26 = vld [vmem:[%s578_s7 + $0x8] sm:$0xff]  ;;  %v176_v28 = vld [vmem:[%s578_s7 + $0x10] sm:$0xff] }
  0x11   : > { %v178_v12 = vld [vmem:[%s578_s7 + $0x20] sm:$0xff]  ;;  %442 = vmatprep.mubr.f32.mxu0 %v174_v11  ;;  %465 = vmatpush3.bf16.msra.mxu0 %v462_v8  ;;  %v179_v27 = vld [vmem:[%s578_s7 + $0x28] sm:$0xff]  ;;  %v180_v29 = vld [vmem:[%s578_s7 + $0x30] sm:$0xff] }
  0x12   : > { %448 = vmatprep.mubr.f32.mxu1 %v178_v12  ;;  %496 = vmatpush3.bf16.msra.mxu1 %v462_v8  ;;  %v177_v30 = vld [vmem:[%s578_s7 + $0x18] sm:$0xff] }
  0x13   : > { %467 = vmatprep.subr.bf16.mxu0 %v466_v13  ;;  %489 = vmatprep.subr.bf16.mxu1 %v466_v13  ;;  %v181_v31 = vld [vmem:[%s578_s7 + $0x38] sm:$0xff] }
  0x15   : > { %469 = vmatpush3.bf16.msra.mxu0 %v466_v13 }
  0x16   : > { %497 = vmatpush3.bf16.msra.mxu1 %v466_v13  ;;  %471 = vmatprep.subr.bf16.mxu0 %v470_v16 }
  0x17   : > { %490 = vmatprep.subr.bf16.mxu1 %v470_v16 }
  0x19   : > { %473 = vmatpush3.bf16.msra.mxu0 %v470_v16 }
  0x1a   : > { %498 = vmatpush3.bf16.msra.mxu1 %v470_v16  ;;  %475 = vmatprep.subr.bf16.mxu0 %v474_v19 }
  0x1b   : > { %491 = vmatprep.subr.bf16.mxu1 %v474_v19 }
  0x1d   : > { %477 = vmatpush3.bf16.msra.mxu0 %v474_v19 }
  0x1e   : > { %499 = vmatpush3.bf16.msra.mxu1 %v474_v19  ;;  %479 = vmatprep.subr.bf16.mxu0 %v478_v22 }
  0x1f   : > { %492 = vmatprep.subr.bf16.mxu1 %v478_v22 }
  0x21   : > { %481 = vmatpush3.bf16.msra.mxu0 %v478_v22 }
  0x22   : > { %500 = vmatpush3.bf16.msra.mxu1 %v478_v22  ;;  %483 = vmatprep.subr.bf16.mxu0 %v482_v25 }
  0x23   : > { %493 = vmatprep.subr.bf16.mxu1 %v482_v25 }
  0x25   : > { %485 = vmatpush3.bf16.msra.mxu0 %v482_v25 }
  0x26   : > { %501 = vmatpush3.bf16.msra.mxu1 %v482_v25 }
  0x28   : > { %443 = vmatmul.mubr.f32.vlgmr.msra.gmra.mrb[0].mxu0 %v175_v26 }
  0x29   : > { %449 = vmatmul.mubr.f32.vlgmr.msra.gmra.mrb[0].mxu1 %v179_v27  ;;  %445 = vmatprep.mubr.f32.mxu0 %v176_v28 }
  0x2a   : > { %451 = vmatprep.mubr.f32.mxu1 %v180_v29 }
  0x2c   : > { %446 = vmatmul.mubr.f32.gmra.mrb[2].mxu0 %v177_v30 }
  0x2d   : > { %452 = vmatmul.mubr.f32.gmra.mrb[2].mxu1 %v181_v31 }
  0xfb   : > { %v444_v33 = vpop.f32.mrb[0].mxu0 }
  0xfc   : > { %v450_v34 = vpop.f32.mrb[0].mxu1  ;;  %v277_v35 = vadd.f32 %v444_v33, %v383_v32  ;;  %v271_v37 = vpop.f32.mrb[1].mxu0 }
  0xfd   : > { %v297_v36 = vadd.f32 %v450_v34, %v383_v32  ;;  %v291_v38 = vpop.f32.mrb[1].mxu1  ;;  %v272_v39 = vadd.f32 %v383_v32, %v271_v37 }
  0xfe   : > { %v292_v40 = vadd.f32 %v383_v32, %v291_v38  ;;  %311 = vst [vmem:[%s172_s4 + $0x8] sm:$0xff] %v277_v35 }
  0xff   : > { %315 = vst [vmem:[%s172_s4 + $0x28] sm:$0xff] %v297_v36  ;;  %310 = vst [vmem:[%s172_s4] sm:$0xff] %v272_v39  ;;  %v447_v41 = vpop.f32.mrb[2].mxu0 }
 0x100   : > { %314 = vst [vmem:[%s172_s4 + $0x20] sm:$0xff] %v292_v40  ;;  %v453_v42 = vpop.f32.mrb[2].mxu1  ;;  %v287_v43 = vadd.f32 %v447_v41, %v383_v32  ;;  %v281_v45 = vpop.f32.mrb[3].mxu0 }
 0x101   : > { %v307_v44 = vadd.f32 %v453_v42, %v383_v32  ;;  %v301_v46 = vpop.f32.mrb[3].mxu1  ;;  %v282_v47 = vadd.f32 %v383_v32, %v281_v45 }
 0x102   : > { %v302_v48 = vadd.f32 %v383_v32, %v301_v46  ;;  %313 = vst [vmem:[%s172_s4 + $0x18] sm:$0xff] %v287_v43 }
 0x103   : > { %317 = vst [vmem:[%s172_s4 + $0x38] sm:$0xff] %v307_v44  ;;  %312 = vst [vmem:[%s172_s4 + $0x10] sm:$0xff] %v282_v47 }
 0x104   : > { %316 = vst [vmem:[%s172_s4 + $0x30] sm:$0xff] %v302_v48 }
 0x105 PF: > { %s13_s12 = sadd.s32 1, %s516_s12  }
 0x106   : > { %p10_p4 = scmp.ge.s32.totalorder %s13_s12, 4  }
 0x108   :  { %12 = sbr.rel (!%p10_p4) target bundleno = 1 (0x1), region = 62 }

// kernel: transformer_decoder_layer.10
= control target key start
LH: loop header
LB: loop body
LE: loop exit
PB: predicated region body
PF: predicated region fallthrough
CT: control target
= control target key end

     0   :  { %s622_s15 = smov 0   ;;  %s708_s0 = inlined_call_operand.vmem [shape: f32[128,128], index: 0, kind: input, shape index: {}]   ;;  %s709_s1 = inlined_call_operand.vmem [shape: f32[128,128], index: 1, kind: input, shape index: {}]   ;;  %s710_s2 = inlined_call_operand.vmem [shape: f32[1,128], index: 2, kind: input, shape index: {}]   ;;  %s711_s3 = inlined_call_operand.vmem [shape: f32[128,128], index: 3, kind: input, shape index: {}]   ;;  %s712_s4 = inlined_call_operand.vmem [shape: f32[128,128], index: 4, kind: output, shape index: {}]  }
   0x1 LB: > { %s451_s16 = sadd.s32 4294967295, %s595_s15   ;;  %p455_p0 = scmp.ge.s32.totalorder %s595_s15, 1  ;;  %s595_s15 = sphi %s622_s15, %s14_s15  }
   0x2   : > { %p174_p1 = scmp.lt.s32.totalorder %s595_s15, 3 }
   0x4   : > { %p175_p2 = pnand %p455_p0, %p174_p1 }
   0x5   : > { %v231_v0 = vld [vmem:[%s709_s1] sm:$0xff] (!%p175_p2)  ;;  %v232_v1 = vld [vmem:[%s709_s1 + $0x8] sm:$0xff] (!%p175_p2)  ;;  %v233_v2 = vld [vmem:[%s709_s1 + $0x10] sm:$0xff] (!%p175_p2)  ;;  %s456_s23 = sshll.u32 (!%p175_p2), %s451_s16, 3 }
   0x6   : > { %178 = sbr.rel (%p175_p2) target bundleno = 263 (0x107), region = 36  ;;  %v533_v3 = vpack.c.bf16 (!%p175_p2), %v232_v1, %v231_v0  ;;  %v234_v4 = vld [vmem:[%s709_s1 + $0x18] sm:$0xff] (!%p175_p2)  ;;  %p206_p3 = scmp.lt.s32.totalorder (!%p175_p2), %s456_s23, 15  ;;  %v235_v6 = vld [vmem:[%s709_s1 + $0x20] sm:$0xff] (!%p175_p2)  ;;  %v236_v7 = vld [vmem:[%s709_s1 + $0x28] sm:$0xff] (!%p175_p2) }
   0x7   : > { %v537_v5 = vpack.c.bf16 (!%p175_p2), %v234_v4, %v233_v2  ;;  %v541_v8 = vpack.c.bf16 (!%p175_p2), %v236_v7, %v235_v6  ;;  %v237_v9 = vld [vmem:[%s709_s1 + $0x30] sm:$0xff] (!%p175_p2)  ;;  %v238_v10 = vld [vmem:[%s709_s1 + $0x38] sm:$0xff] (!%p175_p2)  ;;  %v239_v14 = vld [vmem:[%s709_s1 + $0x40] sm:$0xff] (!%p175_p2) }
   0x8   : > { %534 = vmatprep.subr.bf16.mxu0 (!%p175_p2), %v533_v3  ;;  %565 = vmatprep.subr.bf16.mxu1 (!%p175_p2), %v533_v3  ;;  %v545_v13 = vpack.c.bf16 (!%p175_p2), %v238_v10, %v237_v9  ;;  %v240_v15 = vld [vmem:[%s709_s1 + $0x48] sm:$0xff] (!%p175_p2)  ;;  %v241_v17 = vld [vmem:[%s709_s1 + $0x50] sm:$0xff] (!%p175_p2)  ;;  %v242_v18 = vld [vmem:[%s709_s1 + $0x58] sm:$0xff] (!%p175_p2) }
   0x9   : > { %536 = vmatpush3.bf16.msra.mxu0 (!%p175_p2), %v533_v3  ;;  %573 = vmatpush3.bf16.msra.mxu1 (!%p175_p2), %v533_v3  ;;  %v549_v16 = vpack.c.bf16 (!%p175_p2), %v240_v15, %v239_v14  ;;  %v553_v19 = vpack.c.bf16 (!%p175_p2), %v242_v18, %v241_v17  ;;  %v243_v20 = vld [vmem:[%s709_s1 + $0x60] sm:$0xff] (!%p175_p2)  ;;  %v244_v21 = vld [vmem:[%s709_s1 + $0x68] sm:$0xff] (!%p175_p2)  ;;  %v245_v23 = vld [vmem:[%s709_s1 + $0x70] sm:$0xff] (!%p175_p2) }
   0xa   : > { %538 = vmatprep.subr.bf16.mxu0 (!%p175_p2), %v537_v5  ;;  %566 = vmatprep.subr.bf16.mxu1 (!%p175_p2), %v537_v5  ;;  %v557_v22 = vpack.c.bf16 (!%p175_p2), %v244_v21, %v243_v20  ;;  %v246_v24 = vld [vmem:[%s709_s1 + $0x78] sm:$0xff] (!%p175_p2)  ;;  %v462_v32 = vld [vmem:[%s710_s2] ss:$0 sm:$0xff] (!%p175_p2) }
   0xb   : > { %v561_v25 = vpack.c.bf16 (!%p175_p2), %v246_v24, %v245_v23 }
   0xd   : > { %s714_s23 = smov (!%p206_p3, %s456_s23), 15  ;;  %540 = vmatpush3.bf16.msra.mxu0 %v537_v5  ;;  %574 = vmatpush3.bf16.msra.mxu1 %v537_v5 }
   0xe   : > { %s648_s30 = sshll.u32 %s714_s23, 3  ;;  %542 = vmatprep.subr.bf16.mxu0 %v541_v8  ;;  %567 = vmatprep.subr.bf16.mxu1 %v541_v8 }
   0xf   : > { %s660_s11 = scalar_lea.vmem %s708_s0, %s648_s30  ;;  %s215_s6 = scalar_lea.vmem %s711_s3, %s648_s30 }
  0x10   : > { %v223_v11 = vld [vmem:[%s660_s11] sm:$0xff]  ;;  %v224_v26 = vld [vmem:[%s660_s11 + $0x8] sm:$0xff]  ;;  %v225_v28 = vld [vmem:[%s660_s11 + $0x10] sm:$0xff] }
  0x11   : > { %v227_v12 = vld [vmem:[%s660_s11 + $0x20] sm:$0xff]  ;;  %521 = vmatprep.mubr.f32.mxu0 %v223_v11  ;;  %544 = vmatpush3.bf16.msra.mxu0 %v541_v8  ;;  %v228_v27 = vld [vmem:[%s660_s11 + $0x28] sm:$0xff]  ;;  %v229_v29 = vld [vmem:[%s660_s11 + $0x30] sm:$0xff] }
  0x12   : > { %527 = vmatprep.mubr.f32.mxu1 %v227_v12  ;;  %575 = vmatpush3.bf16.msra.mxu1 %v541_v8  ;;  %v226_v30 = vld [vmem:[%s660_s11 + $0x18] sm:$0xff]  ;;  %v360_v34 = vld [vmem:[%s215_s6 + $0x8] sm:$0xff]  ;;  %v359_v40 = vld [vmem:[%s215_s6] sm:$0xff] }
  0x13   : > { %546 = vmatprep.subr.bf16.mxu0 %v545_v13  ;;  %568 = vmatprep.subr.bf16.mxu1 %v545_v13  ;;  %v230_v31 = vld [vmem:[%s660_s11 + $0x38] sm:$0xff]  ;;  %v364_v36 = vld [vmem:[%s215_s6 + $0x28] sm:$0xff]  ;;  %v363_v42 = vld [vmem:[%s215_s6 + $0x20] sm:$0xff]  ;;  %s221_s11 = scalar_lea.vmem %s712_s4, %s648_s30 }
  0x14   : > { %v362_v50 = vld [vmem:[%s215_s6 + $0x18] sm:$0xff]  ;;  %v361_v56 = vld [vmem:[%s215_s6 + $0x10] sm:$0xff] }
  0x15   : > { %548 = vmatpush3.bf16.msra.mxu0 %v545_v13  ;;  %v366_v52 = vld [vmem:[%s215_s6 + $0x38] sm:$0xff]  ;;  %v365_v58 = vld [vmem:[%s215_s6 + $0x30] sm:$0xff] }
  0x16   : > { %576 = vmatpush3.bf16.msra.mxu1 %v545_v13  ;;  %550 = vmatprep.subr.bf16.mxu0 %v549_v16 }
  0x17   : > { %569 = vmatprep.subr.bf16.mxu1 %v549_v16 }
  0x19   : > { %552 = vmatpush3.bf16.msra.mxu0 %v549_v16 }
  0x1a   : > { %577 = vmatpush3.bf16.msra.mxu1 %v549_v16  ;;  %554 = vmatprep.subr.bf16.mxu0 %v553_v19 }
  0x1b   : > { %570 = vmatprep.subr.bf16.mxu1 %v553_v19 }
  0x1d   : > { %556 = vmatpush3.bf16.msra.mxu0 %v553_v19 }
  0x1e   : > { %578 = vmatpush3.bf16.msra.mxu1 %v553_v19  ;;  %558 = vmatprep.subr.bf16.mxu0 %v557_v22 }
  0x1f   : > { %571 = vmatprep.subr.bf16.mxu1 %v557_v22 }
  0x21   : > { %560 = vmatpush3.bf16.msra.mxu0 %v557_v22 }
  0x22   : > { %579 = vmatpush3.bf16.msra.mxu1 %v557_v22  ;;  %562 = vmatprep.subr.bf16.mxu0 %v561_v25 }
  0x23   : > { %572 = vmatprep.subr.bf16.mxu1 %v561_v25 }
  0x25   : > { %564 = vmatpush3.bf16.msra.mxu0 %v561_v25 }
  0x26   : > { %580 = vmatpush3.bf16.msra.mxu1 %v561_v25 }
  0x28   : > { %522 = vmatmul.mubr.f32.vlgmr.msra.gmra.mrb[0].mxu0 %v224_v26 }
  0x29   : > { %528 = vmatmul.mubr.f32.vlgmr.msra.gmra.mrb[0].mxu1 %v228_v27  ;;  %524 = vmatprep.mubr.f32.mxu0 %v225_v28 }
  0x2a   : > { %530 = vmatprep.mubr.f32.mxu1 %v229_v29 }
  0x2c   : > { %525 = vmatmul.mubr.f32.gmra.mrb[2].mxu0 %v226_v30 }
  0x2d   : > { %531 = vmatmul.mubr.f32.gmra.mrb[2].mxu1 %v230_v31 }
  0xfb   : > { %v523_v33 = vpop.f32.mrb[0].mxu0 }
  0xfc   : > { %v529_v35 = vpop.f32.mrb[0].mxu1  ;;  %v326_v37 = vadd.f32 %v523_v33, %v462_v32  ;;  %v320_v39 = vpop.f32.mrb[1].mxu0 }
  0xfd   : > { %v346_v38 = vadd.f32 %v529_v35, %v462_v32  ;;  %v340_v41 = vpop.f32.mrb[1].mxu1  ;;  %v321_v43 = vadd.f32 %v462_v32, %v320_v39 }
  0xfe   : > { %v341_v44 = vadd.f32 %v462_v32, %v340_v41  ;;  %v368_v45 = vadd.f32 %v360_v34, %v326_v37 }
  0xff   : > { %v372_v46 = vadd.f32 %v364_v36, %v346_v38  ;;  %v367_v47 = vadd.f32 %v359_v40, %v321_v43  ;;  %v526_v49 = vpop.f32.mrb[2].mxu0 }
 0x100   : > { %v371_v48 = vadd.f32 %v363_v42, %v341_v44  ;;  %v532_v51 = vpop.f32.mrb[2].mxu1  ;;  %376 = vst [vmem:[%s221_s11 + $0x8] sm:$0xff] %v368_v45  ;;  %v336_v53 = vadd.f32 %v526_v49, %v462_v32  ;;  %v330_v55 = vpop.f32.mrb[3].mxu0 }
 0x101   : > { %380 = vst [vmem:[%s221_s11 + $0x28] sm:$0xff] %v372_v46  ;;  %v356_v54 = vadd.f32 %v532_v51, %v462_v32  ;;  %v350_v57 = vpop.f32.mrb[3].mxu1  ;;  %375 = vst [vmem:[%s221_s11] sm:$0xff] %v367_v47  ;;  %v331_v59 = vadd.f32 %v462_v32, %v330_v55 }
 0x102   : > { %379 = vst [vmem:[%s221_s11 + $0x20] sm:$0xff] %v371_v48  ;;  %v351_v60 = vadd.f32 %v462_v32, %v350_v57  ;;  %v370_v61 = vadd.f32 %v362_v50, %v336_v53 }
 0x103   : > { %v374_v62 = vadd.f32 %v366_v52, %v356_v54  ;;  %v369_v63 = vadd.f32 %v361_v56, %v331_v59 }
 0x104   : > { %v373_v0 = vadd.f32 %v365_v58, %v351_v60  ;;  %378 = vst [vmem:[%s221_s11 + $0x18] sm:$0xff] %v370_v61 }
 0x105   : > { %382 = vst [vmem:[%s221_s11 + $0x38] sm:$0xff] %v374_v62  ;;  %377 = vst [vmem:[%s221_s11 + $0x10] sm:$0xff] %v369_v63 }
 0x106   : > { %381 = vst [vmem:[%s221_s11 + $0x30] sm:$0xff] %v373_v0 }
 0x107 PF: > { %s14_s15 = sadd.s32 1, %s595_s15  }
 0x108   : > { %p11_p4 = scmp.ge.s32.totalorder %s14_s15, 4  }
 0x10a   :  { %13 = sbr.rel (!%p11_p4) target bundleno = 1 (0x1), region = 69 }

// kernel: transformer_decoder_layer.8
= control target key start
LH: loop header
LB: loop body
LE: loop exit
PB: predicated region body
PF: predicated region fallthrough
CT: control target
= control target key end

     0   :  { %12 = vsyncpa [#allocation3], 0  ;;  %s1406_s0 = inlined_call_operand.hbm [shape: f32[128,128], index: 0, kind: input, shape index: {}]   ;;  %s1407_s1 = inlined_call_operand.hbm [shape: f32[128,128], index: 1, kind: input, shape index: {}]   ;;  %s1408_s2 = inlined_call_operand.vmem [shape: f32[1,128], index: 2, kind: input, shape index: {}]   ;;  %s1409_s3 = inlined_call_operand.hbm [shape: f32[128,256], index: 3, kind: input, shape index: {}]   ;;  %s1410_s4 = inlined_call_operand.vmem [shape: f32[1,256], index: 4, kind: input, shape index: {}]   ;;  %s1411_s5 = inlined_call_operand.vmem [shape: f32[128,128], index: 5, kind: output, shape index: {0}]   ;;  %s1412_s6 = inlined_call_operand.vmem [shape: f32[128,256], index: 6, kind: output, shape index: {1}]  }
   0x1   :  { %14 = vsyncpa [#allocation3 + $0x1], 0 }
   0x2   :  { %15 = vsyncpa [#allocation5], 0  ;;  %s1147_s21 = smov 0   ;;  %s1149_s22 = smov 0  }
   0x3   :  { %s1151_s23 = smov 0   ;;  %s1153_s24 = smov 0  }
   0x4 LB: > { %s758_s25 = sadd.s32 4294967295, %s1102_s24   ;;  %p41_p0 = scmp.ne.s32.totalorder %s1094_s22, %s1090_s21  ;;  %s1102_s24 = sphi %s1153_s24, %s1429_s24   ;;  %s1098_s23 = sphi %s1151_s23, %s1428_s23   ;;  %s1094_s22 = sphi %s1149_s22, %s1427_s22   ;;  %s1090_s21 = sphi %s1147_s21, %s1426_s21  }
   0x5   : > { %p1169_p1 = scmp.eq.s32.totalorder %s758_s25, 0  ;;  %p760_p2 = scmp.ge.s32.totalorder %s1102_s24, 1 }
   0x6   : > { %p188_p3 = scmp.lt.s32.totalorder %s1102_s24, 3  ;;  %s1104_s29 = smov [#allocation4]  }
   0x7   : > { %s1417_s26 = scalar_select %p1169_p1, 1, 0 }
   0x8   : > { %p1177_p4 = por %p1169_p1, %p41_p0  ;;  %p1181_p5 = pnand %p760_p2, %p188_p3 }
   0x9   : > { %s200_s30 = sshll.u32 %s1104_s29, 4  ;;  %s1105_s8 = smov [#allocation6]   ;;  %s201_s30 = int_to_ptr.vmem [resolvable:$true] %s200_s30 }
   0xa   : > { %s1418_s27 = scalar_select %p1177_p4, 1, 0 }
   0xb   : > { %s1419_s28 = scalar_select %p1181_p5, 1, 0 }
   0xc   : > { %p923_p6 = pneg %p1181_p5  ;;  %s216_s9 = sshll.u32 %s1105_s8, 4  ;;  %s1193_s9 = int_to_ptr.vmem [resolvable:$true] %s216_s9 }
   0xd   : > { %s978_s12 = scalar_lea.hbm %s1407_s1, 2048 }
   0xe   : > { %p1189_p7 = pnand %p923_p6, %p1169_p1  ;;  %p979_p8 = scmp.ne.s32.totalorder %s1407_s1, %s978_s12 }
   0xf   : > { %p985_p12 = scmp.lt.u32.totalorder %s978_s12, %s1407_s1 }
  0x10   : > { %p980_p9 = pneg %p1189_p7 }
  0x12   : > { %p981_p10 = pnand %p980_p9, %p979_p8 }
  0x14   : > { %p982_p11 = pneg %p981_p10 }
  0x16   : > { %p987_p13 = pnand %p985_p12, %p982_p11 }
  0x18   : > { %990 = shalt.err (!%p987_p13)
}
  0x19   : > { %s991_s17 = scalar_lea.vmem %s201_s30, 2048  ;;  %p999_p6 = scmp.lt.s32.totalorder %s201_s30, %s201_s30 }
  0x1a   : > { %p992_p0 = scmp.ne.s32.totalorder %s201_s30, %s991_s17  ;;  %p1000_p1 = scmp.lt.s32.totalorder %s991_s17, %s991_s17 }
  0x1c   : > { %p994_p2 = pnand %p992_p0, %p980_p9  ;;  %p1001_p4 = por %p1000_p1, %p999_p6 }
  0x1e   : > { %p995_p3 = pneg %p994_p2 }
  0x20   : > { %p1002_p5 = pnand %p1001_p4, %p995_p3 }
  0x22   : > { %1005 = shalt.err (!%p1002_p5)
}
  0x23   : > { %s1106_s18 = smov 128   ;;  %s1107_s19 = smov 8  }
  0x24   : > { %926 = dma.hbm_to_vmem [thread:$0]  (!%p1189_p7), %s1407_s1, 2048, %s201_s30, [#allocation5], %s1106_s18, %s1106_s18, %s1107_s19  }
  0x25   : > { %s1006_s10 = scalar_lea.hbm %s1409_s3, 4096 }
  0x26   : > { %p1007_p1 = scmp.ne.s32.totalorder %s1409_s3, %s1006_s10  ;;  %p1013_p8 = scmp.lt.u32.totalorder %s1006_s10, %s1409_s3 }
  0x28   : > { %p1009_p4 = pnand %p1007_p1, %p980_p9 }
  0x2a   : > { %p1010_p5 = pneg %p1009_p4 }
  0x2c   : > { %p1015_p10 = pnand %p1013_p8, %p1010_p5 }
  0x2e   : > { %1018 = shalt.err (!%p1015_p10)
}
  0x2f   : > { %s1019_s30 = scalar_lea.vmem %s1193_s9, 4096  ;;  %p1027_p0 = scmp.lt.s32.totalorder %s1193_s9, %s1193_s9 }
  0x30   : > { %p1020_p11 = scmp.ne.s32.totalorder %s1193_s9, %s1019_s30  ;;  %p1028_p2 = scmp.lt.s32.totalorder %s1019_s30, %s1019_s30 }
  0x32   : > { %p1022_p12 = pnand %p1020_p11, %p980_p9  ;;  %p1029_p3 = por %p1028_p2, %p1027_p0 }
  0x34   : > { %p1023_p13 = pneg %p1022_p12 }
  0x36   : > { %p1030_p6 = pnand %p1029_p3, %p1023_p13 }
  0x38   : > { %1033 = shalt.err (!%p1030_p6)
}
  0x39   : > { %s1108_s15 = smov 256   ;;  %s1109_s16 = smov 16  }
  0x3a   : > { %929 = dma.hbm_to_vmem [thread:$0]  (!%p1189_p7), %s1409_s3, 4096, %s1193_s9, [#allocation5], %s1108_s15, %s1108_s15, %s1109_s16  }
  0x3b   : > { %s1246_s21 = sadd.s32 1, %s1102_s24   ;;  %s28_s8 = sadd.s32 1, %s1098_s23 }
  0x3c   : > { %s25_s29 = ssub.s32 %s1102_s24, %s1246_s21  ;;  %p35_p1 = scmp.ne.s32.totalorder %s1098_s23, %s1094_s22 }
  0x3d   : > { %p26_p9 = scmp.eq.s32.totalorder %s25_s29, 0  ;;  %p36_p4 = scmp.eq.s32.totalorder %s1102_s24, 0 }
  0x3e   : > { %p936_p8 = scmp.lt.s32.totalorder %s1102_s24, 2  ;;  %s233_s11 = sand.u32 1, %s1098_s23  }
  0x3f   : > { %s1255_s10 = scalar_select %p26_p9, %s1098_s23, %s28_s8  }
  0x40   : > { %p37_p5 = por %p36_p4, %p35_p1  ;;  %s779_s12 = sshll.u32 %s1102_s24, 10 }
  0x41   : > { %s764_s13 = sshll.u32 %s233_s11, 6  ;;  %s1263_s30 = scalar_lea.hbm %s1406_s0, %s779_s12 }
  0x42   : > { %s237_s9 = scalar_lea.vmem [#allocation2], %s764_s13  ;;  %p1265_p7 = pnand %p936_p8, %p37_p5 }
  0x43   : > { %s244_s15 = sshll.u32 %s237_s9, 4  ;;  %s1271_s17 = scalar_lea.sflag [#allocation3], %s233_s11  ;;  %s1269_s15 = int_to_ptr.vmem [resolvable:$true] %s244_s15 }
  0x44   : > { %s1034_s20 = scalar_lea.hbm %s1263_s30, 1024  ;;  %p1036_p11 = pneg %p1265_p7 }
  0x45   : > { %p1035_p10 = scmp.ne.s32.totalorder %s1263_s30, %s1034_s20  ;;  %s1039_s12 = scalar_lea.hbm %s1406_s0, 2048 }
  0x46   : > { %p1040_p0 = scmp.lt.u32.totalorder %s1263_s30, %s1406_s0  ;;  %p1041_p2 = scmp.lt.u32.totalorder %s1039_s12, %s1034_s20 }
  0x47   : > { %p1037_p12 = pnand %p1036_p11, %p1035_p10  ;;  %p1043_p6 = scmp.lt.u32.totalorder %s1034_s20, %s1263_s30 }
  0x48   : > { %p1042_p3 = por %p1041_p2, %p1040_p0 }
  0x49   : > { %p1038_p13 = pneg %p1037_p12 }
  0x4a   : > { %p1044_p9 = por %p1043_p6, %p1042_p3 }
  0x4c   : > { %p1045_p1 = pnand %p1044_p9, %p1038_p13 }
  0x4e   : > { %1048 = shalt.err (!%p1045_p1)
}
  0x4f   : > { %s1049_s11 = scalar_lea.vmem %s1269_s15, 1024  ;;  %s1110_s14 = smov [#allocation2]  }
  0x50   : > { %p1050_p4 = scmp.ne.s32.totalorder %s1269_s15, %s1049_s11  ;;  %s1054_s9 = sshll.u32 %s1110_s14, 4  ;;  %s1055_s9 = int_to_ptr.vmem [resolvable:$false] %s1054_s9 }
  0x51   : > { %s1056_s29 = scalar_lea.vmem %s1055_s9, 2048  ;;  %p1057_p10 = scmp.lt.s32.totalorder %s1269_s15, %s1055_s9 }
  0x52   : > { %p1052_p5 = pnand %p1050_p4, %p1036_p11  ;;  %p1058_p12 = scmp.lt.s32.totalorder %s1056_s29, %s1049_s11 }
  0x54   : > { %p1053_p8 = pneg %p1052_p5  ;;  %p1059_p0 = por %p1058_p12, %p1057_p10 }
  0x56   : > { %p1060_p2 = pnand %p1059_p0, %p1053_p8 }
  0x58   : > { %1063 = shalt.err (!%p1060_p2)
}
  0x59   : > { %933 = dma.hbm_to_vmem [thread:$0]  (!%p1265_p7), %s1263_s30, 1024, %s1269_s15, %s1271_s17, %s1106_s18, %s1106_s18, %s1107_s19  }
  0x5a   : > { %p1422_p11 = scmp.ne.s32.totalorder %s1419_s28, 0 }
  0x5b   : > { %s258_s20 = sand.u32 (!%p1422_p11), 1, %s1094_s22   ;;  %p1423_p13 = scmp.ne.s32.totalorder (!%p1422_p11), %s1418_s27, 0 }
  0x5c   : > { %256 = sbr.rel (%p1422_p11) target bundleno = 382 (0x17e), region = 40  ;;  %s768_s8 = sshll.u32 (!%p1422_p11), %s258_s20, 6 }
  0x5d   : > { %s259_s12 = scalar_lea.sflag (!%p1422_p11), [#allocation3], %s258_s20  ;;  %s1305_s13 = scalar_lea.vmem (!%p1422_p11), [#allocation2], %s768_s8 }
  0x63   : > { %1081 = dma.done.wait (%p1423_p13), %s259_s12, 1024  }
  0x64   : > { %1083 = vsyncadd (%p1423_p13), %s259_s12, 4294966272  ;;  %p1424_p3 = scmp.ne.s32.totalorder %s1417_s26, 0 }
  0x66   : > { %1085 = dma.done.wait (%p1424_p3), [#allocation5], 6144  }
  0x67   : > { %1087 = vsyncadd (%p1424_p3), [#allocation5], 4294961152  ;;  %v1111_v0 = vmov 0.0   ;;  %v464_v1 = vld [vmem:[#allocation6 + $0x8] sm:$0xff]  ;;  %v466_v2 = vld [vmem:[#allocation6 + $0x18] sm:$0xff]  ;;  %s771_s26 = sshll.u32 %s758_s25, 3 }
  0x68   : > { %571 = vmatprep.mubr.f32.mxu1 %v1111_v0  ;;  %v463_v3 = vld [vmem:[#allocation6] sm:$0xff]  ;;  %v881_v4 = vpack.c.bf16 %v466_v2, %v464_v1  ;;  %v465_v5 = vld [vmem:[#allocation6 + $0x10] sm:$0xff]  ;;  %v468_v6 = vld [vmem:[#allocation6 + $0x28] sm:$0xff]  ;;  %p307_p7 = scmp.lt.s32.totalorder %s771_s26, 15 }
  0x69   : > { %v470_v7 = vld [vmem:[#allocation6 + $0x38] sm:$0xff]  ;;  %v883_v8 = vpack.c.bf16 %v465_v5, %v463_v3  ;;  %v467_v10 = vld [vmem:[#allocation6 + $0x20] sm:$0xff]  ;;  %v469_v11 = vld [vmem:[#allocation6 + $0x30] sm:$0xff] }
  0x6a   : > { %v885_v9 = vpack.c.bf16 %v470_v7, %v468_v6  ;;  %v472_v12 = vld [vmem:[#allocation6 + $0x48] sm:$0xff]  ;;  %882 = vmatprep.subr.bf16.mxu1 %v881_v4  ;;  %v474_v13 = vld [vmem:[#allocation6 + $0x58] sm:$0xff]  ;;  %v887_v14 = vpack.c.bf16 %v469_v11, %v467_v10  ;;  %v471_v15 = vld [vmem:[#allocation6 + $0x40] sm:$0xff]  ;;  %s1431_s26 = smov (!%p307_p7, %s771_s26), 15 }
  0x6b   : > { %884 = vmatpush1.bf16.msra.mxu1 %v883_v8  ;;  %v889_v16 = vpack.c.bf16 %v474_v13, %v472_v12  ;;  %v473_v17 = vld [vmem:[#allocation6 + $0x50] sm:$0xff]  ;;  %v327_v18 = vld [vmem:[#allocation4] sm:$0xff]  ;;  %v328_v19 = vld [vmem:[#allocation4 + $0x8] sm:$0xff]  ;;  %s780_s18 = sshll.u32 %s1431_s26, 4  ;;  %s772_s24 = sshll.u32 %s1431_s26, 3 }
  0x6c   : > { %886 = vmatprep.subr.bf16.mxu1 %v885_v9  ;;  %v476_v20 = vld [vmem:[#allocation6 + $0x68] sm:$0xff]  ;;  %v478_v21 = vld [vmem:[#allocation6 + $0x78] sm:$0xff]  ;;  %v849_v22 = vpack.c.bf16 %v328_v19, %v327_v18  ;;  %v329_v23 = vld [vmem:[#allocation4 + $0x10] sm:$0xff]  ;;  %v891_v25 = vpack.c.bf16 %v473_v17, %v471_v15  ;;  %v497_v18 = vlaneseq  ;;  %s1343_s15 = scalar_lea.vmem %s1412_s6, %s780_s18  ;;  %s1356_s11 = scalar_lea.vmem %s1411_s5, %s772_s24 }
  0x6d   : > { %v330_v24 = vld [vmem:[#allocation4 + $0x18] sm:$0xff]  ;;  %v475_v26 = vld [vmem:[#allocation6 + $0x60] sm:$0xff]  ;;  %v893_v28 = vpack.c.bf16 %v478_v21, %v476_v20  ;;  %v477_v29 = vld [vmem:[#allocation6 + $0x70] sm:$0xff] }
  0x6e   : > { %850 = vmatprep.subr.bf16.mxu0 %v849_v22  ;;  %v853_v27 = vpack.c.bf16 %v330_v24, %v329_v23  ;;  %v331_v30 = vld [vmem:[#allocation4 + $0x20] sm:$0xff]  ;;  %v332_v31 = vld [vmem:[#allocation4 + $0x28] sm:$0xff]  ;;  %v482_v33 = vld [vmem:[#allocation6 + $0x98] sm:$0xff]  ;;  %v895_v37 = vpack.c.bf16 %v477_v29, %v475_v26  ;;  %v498_v19 = vshrl.u32 %v497_v18, 7 }
  0x6f   : > { %888 = vmatpush1.bf16.msra.mxu1 %v887_v14  ;;  %852 = vmatpush3.bf16.msra.mxu0 %v849_v22  ;;  %v480_v32 = vld [vmem:[#allocation6 + $0x88] sm:$0xff]  ;;  %v857_v34 = vpack.c.bf16 %v332_v31, %v331_v30  ;;  %v333_v35 = vld [vmem:[#allocation4 + $0x30] sm:$0xff]  ;;  %v334_v36 = vld [vmem:[#allocation4 + $0x38] sm:$0xff] }
  0x70   : > { %890 = vmatprep.subr.bf16.mxu1 %v889_v16  ;;  %854 = vmatprep.subr.bf16.mxu0 %v853_v27  ;;  %v897_v38 = vpack.c.bf16 %v482_v33, %v480_v32  ;;  %v479_v39 = vld [vmem:[#allocation6 + $0x80] sm:$0xff]  ;;  %v481_v40 = vld [vmem:[#allocation6 + $0x90] sm:$0xff]  ;;  %v484_v41 = vld [vmem:[#allocation6 + $0xa8] sm:$0xff]  ;;  %v861_v43 = vpack.c.bf16 %v334_v36, %v333_v35  ;;  %v499_v20 = vsub.s32 0, %v498_v19  ;;  %v503_v22 = vsub.s32 1, %v498_v19 }
  0x71   : > { %v486_v42 = vld [vmem:[#allocation6 + $0xb8] sm:$0xff]  ;;  %v319_v44 = vld [vmem:[%s1305_s13] sm:$0xff]  ;;  %v336_v46 = vld [vmem:[#allocation4 + $0x48] sm:$0xff]  ;;  %v899_v47 = vpack.c.bf16 %v481_v40, %v479_v39 }
  0x72   : > { %v335_v45 = vld [vmem:[#allocation4 + $0x40] sm:$0xff]  ;;  %837 = vmatprep.mubr.f32.mxu0 %v319_v44  ;;  %v901_v48 = vpack.c.bf16 %v486_v42, %v484_v41  ;;  %v485_v50 = vld [vmem:[#allocation6 + $0xb0] sm:$0xff]  ;;  %v488_v51 = vld [vmem:[#allocation6 + $0xc8] sm:$0xff] }
  0x73   : > { %892 = vmatpush1.bf16.msra.mxu1 %v891_v25  ;;  %856 = vmatpush3.bf16.msra.mxu0 %v853_v27  ;;  %v483_v49 = vld [vmem:[#allocation6 + $0xa0] sm:$0xff]  ;;  %v490_v52 = vld [vmem:[#allocation6 + $0xd8] sm:$0xff]  ;;  %v865_v53 = vpack.c.bf16 %v336_v46, %v335_v45  ;;  %v337_v54 = vld [vmem:[#allocation4 + $0x50] sm:$0xff] }
  0x74   : > { %894 = vmatprep.subr.bf16.mxu1 %v893_v28  ;;  %858 = vmatprep.subr.bf16.mxu0 %v857_v34  ;;  %v338_v55 = vld [vmem:[#allocation4 + $0x58] sm:$0xff]  ;;  %v903_v56 = vpack.c.bf16 %v485_v50, %v483_v49  ;;  %v905_v57 = vpack.c.bf16 %v490_v52, %v488_v51  ;;  %v487_v58 = vld [vmem:[#allocation6 + $0xc0] sm:$0xff]  ;;  %v489_v59 = vld [vmem:[#allocation6 + $0xd0] sm:$0xff] }
  0x75   : > { %v492_v60 = vld [vmem:[#allocation6 + $0xe8] sm:$0xff]  ;;  %v494_v61 = vld [vmem:[#allocation6 + $0xf8] sm:$0xff]  ;;  %v869_v62 = vpack.c.bf16 %v338_v55, %v337_v54  ;;  %v339_v63 = vld [vmem:[#allocation4 + $0x60] sm:$0xff]  ;;  %v907_v2 = vpack.c.bf16 %v489_v59, %v487_v58 }
  0x76   : > { %v340_v1 = vld [vmem:[#allocation4 + $0x68] sm:$0xff]  ;;  %v909_v3 = vpack.c.bf16 %v494_v61, %v492_v60  ;;  %v491_v4 = vld [vmem:[#allocation6 + $0xe0] sm:$0xff]  ;;  %v493_v5 = vld [vmem:[#allocation6 + $0xf0] sm:$0xff] }
  0x77   : > { %896 = vmatpush1.bf16.msra.mxu1 %v895_v37  ;;  %860 = vmatpush3.bf16.msra.mxu0 %v857_v34  ;;  %v873_v6 = vpack.c.bf16 %v340_v1, %v339_v63  ;;  %v341_v7 = vld [vmem:[#allocation4 + $0x70] sm:$0xff]  ;;  %v342_v8 = vld [vmem:[#allocation4 + $0x78] sm:$0xff]  ;;  %v911_v9 = vpack.c.bf16 %v493_v5, %v491_v4  ;;  %v320_v11 = vld [vmem:[%s1305_s13 + $0x8] sm:$0xff] }
  0x78   : > { %898 = vmatprep.subr.bf16.mxu1 %v897_v38  ;;  %862 = vmatprep.subr.bf16.mxu0 %v861_v43  ;;  %v877_v10 = vpack.c.bf16 %v342_v8, %v341_v7  ;;  %v321_v12 = vld [vmem:[%s1305_s13 + $0x10] sm:$0xff]  ;;  %v322_v13 = vld [vmem:[%s1305_s13 + $0x18] sm:$0xff]  ;;  %v323_v14 = vld [vmem:[%s1305_s13 + $0x20] sm:$0xff] }
  0x79   : > { %v324_v15 = vld [vmem:[%s1305_s13 + $0x28] sm:$0xff]  ;;  %v325_v16 = vld [vmem:[%s1305_s13 + $0x30] sm:$0xff]  ;;  %v326_v17 = vld [vmem:[%s1305_s13 + $0x38] sm:$0xff] }
  0x7a   : > { %v495_v21 = vld [vmem:[%s1410_s4] sm:$0x3] }
  0x7b   : > { %900 = vmatpush1.bf16.msra.mxu1 %v899_v47  ;;  %864 = vmatpush3.bf16.msra.mxu0 %v861_v43  ;;  %v1336_v23 = vrot.slane %v495_v21, %v499_v20  ;;  %v1338_v24 = vrot.slane %v495_v21, %v503_v22  ;;  %v776_v28 = vld [vmem:[%s1408_s2] ss:$0 sm:$0xff] }
  0x7c   : > { %902 = vmatprep.subr.bf16.mxu1 %v901_v48  ;;  %866 = vmatprep.subr.bf16.mxu0 %v865_v53 }
  0x7f   : > { %904 = vmatpush1.bf16.msra.mxu1 %v903_v56  ;;  %868 = vmatpush3.bf16.msra.mxu0 %v865_v53 }
  0x80   : > { %906 = vmatprep.subr.bf16.mxu1 %v905_v57  ;;  %870 = vmatprep.subr.bf16.mxu0 %v869_v62 }
  0x83   : > { %908 = vmatpush1.bf16.msra.mxu1 %v907_v2  ;;  %872 = vmatpush3.bf16.msra.mxu0 %v869_v62 }
  0x84   : > { %910 = vmatprep.subr.bf16.mxu1 %v909_v3  ;;  %874 = vmatprep.subr.bf16.mxu0 %v873_v6 }
  0x87   : > { %912 = vmatpush1.bf16.msra.mxu1 %v911_v9  ;;  %876 = vmatpush3.bf16.msra.mxu0 %v873_v6 }
  0x88   : > { %878 = vmatprep.subr.bf16.mxu0 %v877_v10 }
  0x8a   : > { %572 = vmatmul.mubr.f32.vlgmr.msra.gmra.mrb[0].mxu1 %v319_v44 }
  0x8b   : > { %577 = vmatprep.mubr.f32.mxu1 %v1111_v0  ;;  %880 = vmatpush3.bf16.msra.mxu0 %v877_v10 }
  0x8e   : > { %578 = vmatmul.mubr.f32.gmra.mrb[2].mxu1 %v320_v11  ;;  %838 = vmatmul.mubr.f32.vlgmr.msra.gmra.mrb[0].mxu0 %v320_v11 }
  0x8f   : > { %583 = vmatprep.mubr.f32.mxu1 %v1111_v0  ;;  %840 = vmatprep.mubr.f32.mxu0 %v321_v12 }
  0x92   : > { %584 = vmatmul.mubr.f32.gmra.mrb[4].mxu1 %v321_v12  ;;  %841 = vmatmul.mubr.f32.gmra.mrb[2].mxu0 %v322_v13 }
  0x93   : > { %589 = vmatprep.mubr.f32.mxu1 %v1111_v0  ;;  %843 = vmatprep.mubr.f32.mxu0 %v323_v14 }
  0x96   : > { %590 = vmatmul.mubr.f32.gmra.mrb[6].mxu1 %v322_v13  ;;  %844 = vmatmul.mubr.f32.gmra.mrb[4].mxu0 %v324_v15 }
  0x97   : > { %595 = vmatprep.mubr.f32.mxu1 %v1111_v0  ;;  %846 = vmatprep.mubr.f32.mxu0 %v325_v16 }
  0x9a   : > { %596 = vmatmul.mubr.f32.gmra.mrb[8].mxu1 %v323_v14  ;;  %847 = vmatmul.mubr.f32.gmra.mrb[6].mxu0 %v326_v17 }
  0x9b   : > { %601 = vmatprep.mubr.f32.mxu1 %v1111_v0 }
  0x9e   : > { %602 = vmatmul.mubr.f32.gmra.mrb[10].mxu1 %v324_v15 }
  0x9f   : > { %607 = vmatprep.mubr.f32.mxu1 %v1111_v0 }
  0xa2   : > { %608 = vmatmul.mubr.f32.gmra.mrb[12].mxu1 %v325_v16 }
  0xa3   : > { %613 = vmatprep.mubr.f32.mxu1 %v1111_v0 }
  0xa6   : > { %614 = vmatmul.mubr.f32.gmra.mrb[14].mxu1 %v326_v17 }
 0x15d   : > { %v573_v0 = vpop.f32.mrb[0].mxu1 }
 0x15e   : > { %v574_v25 = vadd.f32 %v573_v0, %v1336_v23  ;;  %v575_v26 = vpop.f32.mrb[1].mxu1 }
 0x15f   : > { %v576_v27 = vadd.f32 %v575_v26, %v1338_v24 }
 0x160   : > { %620 = vst [vmem:[%s1343_s15] sm:$0xff] %v574_v25 }
 0x161   : > { %621 = vst [vmem:[%s1343_s15 + $0x8] sm:$0xff] %v576_v27  ;;  %v579_v29 = vpop.f32.mrb[2].mxu1  ;;  %v839_v32 = vpop.f32.mrb[0].mxu0 }
 0x162   : > { %v580_v30 = vadd.f32 %v579_v29, %v1336_v23  ;;  %v581_v31 = vpop.f32.mrb[3].mxu1  ;;  %v422_v34 = vadd.f32 %v839_v32, %v776_v28  ;;  %v416_v35 = vpop.f32.mrb[1].mxu0 }
 0x163   : > { %v582_v33 = vadd.f32 %v581_v31, %v1338_v24  ;;  %v417_v36 = vadd.f32 %v776_v28, %v416_v35 }
 0x164   : > { %622 = vst [vmem:[%s1343_s15 + $0x10] sm:$0xff] %v580_v30  ;;  %456 = vst [vmem:[%s1356_s11 + $0x8] sm:$0xff] %v422_v34 }
 0x165   : > { %623 = vst [vmem:[%s1343_s15 + $0x18] sm:$0xff] %v582_v33  ;;  %v585_v37 = vpop.f32.mrb[4].mxu1  ;;  %455 = vst [vmem:[%s1356_s11] sm:$0xff] %v417_v36  ;;  %v842_v40 = vpop.f32.mrb[2].mxu0 }
 0x166   : > { %v586_v38 = vadd.f32 %v585_v37, %v1336_v23  ;;  %v587_v39 = vpop.f32.mrb[5].mxu1  ;;  %v432_v42 = vadd.f32 %v842_v40, %v776_v28  ;;  %v426_v43 = vpop.f32.mrb[3].mxu0 }
 0x167   : > { %v588_v41 = vadd.f32 %v587_v39, %v1338_v24  ;;  %v427_v44 = vadd.f32 %v776_v28, %v426_v43 }
 0x168   : > { %624 = vst [vmem:[%s1343_s15 + $0x20] sm:$0xff] %v586_v38  ;;  %458 = vst [vmem:[%s1356_s11 + $0x18] sm:$0xff] %v432_v42 }
 0x169   : > { %625 = vst [vmem:[%s1343_s15 + $0x28] sm:$0xff] %v588_v41  ;;  %v591_v45 = vpop.f32.mrb[6].mxu1  ;;  %457 = vst [vmem:[%s1356_s11 + $0x10] sm:$0xff] %v427_v44  ;;  %v845_v48 = vpop.f32.mrb[4].mxu0 }
 0x16a   : > { %v592_v46 = vadd.f32 %v591_v45, %v1336_v23  ;;  %v593_v47 = vpop.f32.mrb[7].mxu1  ;;  %v442_v50 = vadd.f32 %v845_v48, %v776_v28  ;;  %v436_v51 = vpop.f32.mrb[5].mxu0 }
 0x16b   : > { %v594_v49 = vadd.f32 %v593_v47, %v1338_v24  ;;  %v437_v52 = vadd.f32 %v776_v28, %v436_v51 }
 0x16c   : > { %626 = vst [vmem:[%s1343_s15 + $0x30] sm:$0xff] %v592_v46  ;;  %460 = vst [vmem:[%s1356_s11 + $0x28] sm:$0xff] %v442_v50 }
 0x16d   : > { %627 = vst [vmem:[%s1343_s15 + $0x38] sm:$0xff] %v594_v49  ;;  %v597_v53 = vpop.f32.mrb[8].mxu1  ;;  %459 = vst [vmem:[%s1356_s11 + $0x20] sm:$0xff] %v437_v52  ;;  %v848_v56 = vpop.f32.mrb[6].mxu0 }
 0x16e   : > { %v598_v54 = vadd.f32 %v597_v53, %v1336_v23  ;;  %v599_v55 = vpop.f32.mrb[9].mxu1  ;;  %v452_v58 = vadd.f32 %v848_v56, %v776_v28  ;;  %v446_v59 = vpop.f32.mrb[7].mxu0 }
 0x16f   : > { %v600_v57 = vadd.f32 %v599_v55, %v1338_v24  ;;  %v447_v60 = vadd.f32 %v776_v28, %v446_v59 }
 0x170   : > { %628 = vst [vmem:[%s1343_s15 + $0x40] sm:$0xff] %v598_v54  ;;  %462 = vst [vmem:[%s1356_s11 + $0x38] sm:$0xff] %v452_v58 }
 0x171   : > { %629 = vst [vmem:[%s1343_s15 + $0x48] sm:$0xff] %v600_v57  ;;  %v603_v61 = vpop.f32.mrb[10].mxu1  ;;  %461 = vst [vmem:[%s1356_s11 + $0x30] sm:$0xff] %v447_v60 }
 0x172   : > { %v604_v62 = vadd.f32 %v603_v61, %v1336_v23  ;;  %v605_v63 = vpop.f32.mrb[11].mxu1 }
 0x173   : > { %v606_v1 = vadd.f32 %v605_v63, %v1338_v24 }
 0x174   : > { %630 = vst [vmem:[%s1343_s15 + $0x50] sm:$0xff] %v604_v62 }
 0x175   : > { %631 = vst [vmem:[%s1343_s15 + $0x58] sm:$0xff] %v606_v1  ;;  %v609_v2 = vpop.f32.mrb[12].mxu1 }
 0x176   : > { %v610_v3 = vadd.f32 %v609_v2, %v1336_v23  ;;  %v611_v4 = vpop.f32.mrb[13].mxu1 }
 0x177   : > { %v612_v5 = vadd.f32 %v611_v4, %v1338_v24 }
 0x178   : > { %632 = vst [vmem:[%s1343_s15 + $0x60] sm:$0xff] %v610_v3 }
 0x179   : > { %633 = vst [vmem:[%s1343_s15 + $0x68] sm:$0xff] %v612_v5  ;;  %v615_v6 = vpop.f32.mrb[14].mxu1 }
 0x17a   : > { %v616_v7 = vadd.f32 %v615_v6, %v1336_v23  ;;  %v617_v8 = vpop.f32.mrb[15].mxu1 }
 0x17b   : > { %v618_v9 = vadd.f32 %v617_v8, %v1338_v24 }
 0x17c   : > { %634 = vst [vmem:[%s1343_s15 + $0x70] sm:$0xff] %v616_v7 }
 0x17d   : > { %635 = vst [vmem:[%s1343_s15 + $0x78] sm:$0xff] %v618_v9 }
 0x17e PF: > { %s1425_s14 = smov %s1246_s21  ;;  %p18_p6 = scmp.ge.s32.totalorder %s1246_s21, 4  }
 0x17f   : > { %s1426_s21 = smov %s1094_s22  ;;  %s1427_s22 = smov %s1098_s23 }
 0x180   : > { %s1428_s23 = smov %s1255_s10  ;;  %s1429_s24 = smov %s1425_s14 }
 0x181   :  { %20 = sbr.rel (!%p18_p6) target bundleno = 4 (0x4), region = 100 }
 0x188   :  { %677 = vsyncpa [#allocation3], 1 }
 0x189   :  { %679 = vsyncpa [#allocation3 + $0x1], 1 }
 0x18a   :  { %680 = vsyncpa [#allocation5], 1 }

// kernel: transformer_decoder_layer.9
= control target key start
LH: loop header
LB: loop body
LE: loop exit
PB: predicated region body
PF: predicated region fallthrough
CT: control target
= control target key end

     0   :  { %s2472_s12 = smov 0   ;;  %s2749_s0 = inlined_call_operand.vmem [shape: f32[8,16], index: 0, kind: input, shape index: {}]   ;;  %s2750_s1 = inlined_call_operand.vmem [shape: f32[8,16,128], index: 1, kind: input, shape index: {}]   ;;  %s2751_s2 = inlined_call_operand.vmem [shape: f32[8,16,256], index: 2, kind: input, shape index: {}]   ;;  %s2752_s3 = inlined_call_operand.vmem [shape: f32[8,16,128], index: 3, kind: output, shape index: {}]  }
   0x1 LB: > { %s1968_s13 = sadd.s32 4294967295, %s2443_s12   ;;  %p1972_p0 = scmp.ge.s32.totalorder %s2443_s12, 1  ;;  %s2443_s12 = sphi %s2472_s12, %s13_s12  }
   0x2   : > { %p147_p1 = scmp.lt.s32.totalorder %s2443_s12, 9 }
   0x4   : > { %p148_p2 = pnand %p1972_p0, %p147_p1 }
   0x5   : > { %p176_p3 = scmp.lt.s32.totalorder (!%p148_p2), %s1968_s13, 7  ;;  %vm202_vm0 = vcmask (!%p148_p2), 130048   ;;  %s2445_s22 = smov (!%p148_p2), 112   ;;  %v198_v6 = vlaneseq (!%p148_p2)  ;;  %v2522_v9 = vld [vmem:[%s2749_s0] sm:$0xff] (!%p148_p2)  ;;  %vm1881_vm2 = vcmask (!%p148_p2), 261120   ;;  %vm1884_vm3 = vcmask (!%p148_p2), 392192  }
   0x6   : > { %151 = sbr.rel (%p148_p2) target bundleno = 4682 (0x124a), region = 32  ;;  %vm2491_vm1 = vmpackc.low (!%p148_p2), %vm202_vm0, %vm202_vm0  ;;  %s2446_s25 = smov (!%p148_p2), 96   ;;  %vm1887_vm4 = vcmask (!%p148_p2), 523264   ;;  %vm1890_vm5 = vcmask (!%p148_p2), 654336   ;;  %vm1893_vm6 = vcmask (!%p148_p2), 785408   ;;  %vm1896_vm7 = vcmask (!%p148_p2), 916480  }
   0x7   : > { %v2516_v7 = vshrl.u32 (!%p148_p2), %v198_v6, 7  ;;  %s2447_s26 = smov (!%p148_p2), 80   ;;  %s2448_s27 = smov (!%p148_p2), 64  }
   0x8   : > { %s2449_s28 = smov (!%p148_p2), 48   ;;  %s2450_s29 = smov (!%p148_p2), 32  }
   0x9   : > { %v200_v8 = vsub.s32 (!%p148_p2), 0, %v2516_v7  ;;  %v395_v45 = vsub.s32 (!%p148_p2), 1, %v2516_v7  ;;  %s2451_s30 = smov (!%p148_p2), 16  }
   0xb   : > { %v201_v10 = vrot.slane (!%p148_p2), %v2522_v9, %v200_v8  ;;  %v396_v46 = vrot.slane (!%p148_p2), %v2522_v9, %v395_v45 }
   0xd   : > { %s2756_s13 = smov (!%p176_p3, %s1968_s13), 7 }
   0xe   : > { %s2030_s14 = sshll.u32 %s2756_s13, 5  ;;  %s2029_s15 = sshll.u32 %s2756_s13, 4 }
   0xf   : > { %s2487_s18 = scalar_lea.vmem %s2751_s2, %s2030_s14  ;;  %s180_s21 = scalar_lea.vmem %s2750_s1, %s2029_s15 }
  0x10   : > { %v193_v1 = vld [vmem:[%s2487_s18] sm:$0xff]  ;;  %v195_v2 = vld [vmem:[%s2487_s18 + $0x10] sm:$0xff]  ;;  %v2510_v5 = vld [vmem:[%s180_s21 + $0x8] sm:$0xff]  ;;  %s190_s6 = scalar_lea.vmem %s2752_s3, %s2029_s15 }
  0x11   : > { %v2502_v3 = vld [vmem:[%s180_s21] sm:$0xff]  ;;  %v2208_v4 = vpack.c.bf16 %v195_v2, %v193_v1  ;;  %v2527_v17 = vpack.i.bf16 %v195_v2, %v193_v1  ;;  %v194_v28 = vld [vmem:[%s2487_s18 + $0x8] sm:$0xff]  ;;  %v196_v29 = vld [vmem:[%s2487_s18 + $0x18] sm:$0xff] }
  0x12   : > { %2100 = vmatprep.mubr.msk.f32.mxu0 %vm202_vm0, %v2502_v3  ;;  %397 = vrot.lane.b32.xlu1 %v2502_v3, %s2445_s22  ;;  %v2214_v31 = vpack.c.bf16 %v196_v29, %v194_v28  ;;  %v2553_v53 = vpack.i.bf16 %v196_v29, %v194_v28 }
  0x13   : > { %2210 = vmatprep.subr.msk.bf16.mxu0 %vm2491_vm1, %v2208_v4 }
  0x14   : > { %2213 = vmatpush3.bf16.xpose.msk.msra.mxu0 %vm2491_vm1, %v2208_v4  ;;  %2215 = vmatprep.subr.bf16.mxu1 %v2214_v31 }
  0x15   : > { %2217 = vmatpush3.bf16.msra.mxu1 %v2214_v31 }
  0x1b   : > { %2101 = vmatmul.mubr.msk.f32.vlgmr.msra.gmra.mrb[0].mxu0 %vm202_vm0, %v2510_v5 }
  0x84   : > { %v398_v35 = vpop.permute.xlu1 %397 }
  0xee   : > { %v2102_v11 = vpop.f32.mrb[0].mxu0 }
  0xef   : > { %v281_v12 = vpop.f32.mrb[1].mxu0  ;;  %v287_v14 = vadd.f32 %v2102_v11, %v201_v10 }
  0xf0   : > { %v282_v13 = vadd.f32 %v281_v12, %v201_v10 }
  0xf1   : > { %v293_v16 = vsel %vm202_vm0, %v287_v14, -inf }
  0xf2   : > { %v290_v15 = vsel %vm202_vm0, %v282_v13, -inf }
  0xf3   : > { %291 = vmax.xlane.f32.xlu0 %v290_v15 }
  0xf7   : > { %294 = vmax.xlane.f32.xlu0 %v293_v16 }
 0x10d   : > { %2304 = vrot.lane.b32.xlu0 %v2527_v17, %s2445_s22 }
 0x180   : > { %v292_v18 = vpop.xlane.xlu0 %291 }
 0x181   : > { %v296_v19 = vsub.f32 %v282_v13, %v292_v18 }
 0x183   : > { %v298_v22 = vmul.f32 1.442695, %v296_v19 }
 0x184   : > { %v295_v20 = vpop.xlane.xlu0 %294 }
 0x185   : > { %v297_v21 = vsub.f32 %v287_v14, %v295_v20 }
 0x187   : > { %v300_v23 = vmul.f32 1.442695, %v297_v21 }
 0x188   : > { %v2305_v30 = vpop.permute.xlu0 %2304 }
 0x189   : > { %2373 = vpow2.f32 %v300_v23  ;;  %v2307_v32 = vunpack.i.h.bf16 %v2305_v30  ;;  %v2306_v33 = vunpack.i.l.bf16 %v2305_v30 }
 0x18a   : > { %2375 = vpow2.f32 %v298_v22 }
 0x18b   : > { %v2218_v34 = vpack.c.bf16 %v2307_v32, %v2306_v33 }
 0x18d   : > { %2220 = vmatprep.subr.msk.bf16.mxu1 %vm2491_vm1, %v2218_v34 }
 0x193   : > { %v2374_v24 = vpop.eup %2373 }
 0x194   : > { %v305_v25 = vsel %vm202_vm0, %v2374_v24, 0.0  ;;  %v2376_v26 = vpop.eup %2375 }
 0x195   : > { %306 = vadd.xlane.f32.xlu1 %v305_v25  ;;  %v302_v27 = vsel %vm202_vm0, %v2376_v26, 0.0 }
 0x199   : > { %303 = vadd.xlane.f32.xlu1 %v302_v27 }
 0x1aa   : > { %399 = vrot.lane.b32.xlu1 %v2510_v5, %s2445_s22 }
 0x222   : > { %v307_v36 = vpop.xlane.xlu1 %306 }
 0x223   : > { %2377 = vrcp.f32 %v307_v36 }
 0x226   : > { %v304_v37 = vpop.xlane.xlu1 %303 }
 0x227   : > { %2379 = vrcp.f32 %v304_v37 }
 0x22a   : > { %v400_v42 = vpop.permute.xlu1 %399 }
 0x22d   : > { %v2378_v38 = vpop.eup %2377 }
 0x22e   : > { %v311_v41 = vmul.f32 %v2378_v38, %v2374_v24  ;;  %v601_v24 = vsub.s32 2, %v2516_v7 }
 0x230   : > { %v602_v25 = vrot.slane %v2522_v9, %v601_v24 }
 0x231   : > { %v2380_v39 = vpop.eup %2379 }
 0x232   : > { %v310_v40 = vmul.f32 %v2380_v39, %v2376_v26 }
 0x234   : > { %2107 = vmatprep.mubr.msk.f32.mxu1 %vm202_vm0, %v310_v40 }
 0x235   : > { %2108 = vmatmul.mubr.msk.f32.vlgmr.msra.gmra.mrb[0].mxu1 %vm202_vm0, %v311_v41 }
 0x236   : > { %2223 = vmatpush3.bf16.xpose.msk.msra.mxu1 %vm2491_vm1, %v2218_v34  ;;  %2114 = vmatprep.mubr.msk.f32.mxu1 %vm202_vm0, %v398_v35 }
 0x23d   : > { %2115 = vmatmul.mubr.msk.f32.vlgmr.msra.gmra.mrb[2].mxu1 %vm202_vm0, %v400_v42 }
 0x308   : > { %v2545_v43 = vpop.f32.mrb[0].mxu1 }
 0x309   : > { %v2547_v44 = vpop.f32.mrb[1].mxu1 }
 0x310   : > { %v2116_v47 = vpop.f32.mrb[2].mxu1 }
 0x311   : > { %v485_v48 = vadd.f32 %v2116_v47, %v396_v46  ;;  %v479_v49 = vpop.f32.mrb[3].mxu1 }
 0x312   : > { %v480_v50 = vadd.f32 %v479_v49, %v396_v46 }
 0x313   : > { %v491_v51 = vsel %vm202_vm0, %v485_v48, -inf }
 0x314   : > { %492 = vmax.xlane.f32.xlu0 %v491_v51  ;;  %v488_v52 = vsel %vm202_vm0, %v480_v50, -inf }
 0x315   : > { %489 = vmax.xlane.f32.xlu1 %v488_v52 }
 0x326   : > { %2309 = vrot.lane.b32.xlu1 %v2553_v53, %s2445_s22 }
 0x32a   : > { %603 = vrot.lane.b32.xlu1 %v2502_v3, %s2446_s25 }
 0x32e   : > { %605 = vrot.lane.b32.xlu1 %v2510_v5, %s2446_s25 }
 0x3a1   : > { %v493_v54 = vpop.xlane.xlu0 %492 }
 0x3a2   : > { %v495_v55 = vsub.f32 %v485_v48, %v493_v54  ;;  %v490_v56 = vpop.xlane.xlu1 %489 }
 0x3a3   : > { %v494_v57 = vsub.f32 %v480_v50, %v490_v56 }
 0x3a4   : > { %v498_v58 = vmul.f32 1.442695, %v495_v55 }
 0x3a5   : > { %v496_v59 = vmul.f32 1.442695, %v494_v57 }
 0x3a6   : > { %2381 = vpow2.f32 %v498_v58  ;;  %v2310_v1 = vpop.permute.xlu1 %2309 }
 0x3a7   : > { %2383 = vpow2.f32 %v496_v59  ;;  %v2312_v2 = vunpack.i.h.bf16 %v2310_v1  ;;  %v2311_v4 = vunpack.i.l.bf16 %v2310_v1 }
 0x3a9   : > { %v2224_v6 = vpack.c.bf16 %v2312_v2, %v2311_v4 }
 0x3aa   : > { %v604_v20 = vpop.permute.xlu1 %603 }
 0x3ab   : > { %2225 = vmatprep.subr.bf16.mxu0 %v2224_v6 }
 0x3ac   : > { %2227 = vmatpush3.bf16.msra.mxu0 %v2224_v6 }
 0x3ae   : > { %v606_v21 = vpop.permute.xlu1 %605 }
 0x3b0   : > { %v2382_v60 = vpop.eup %2381 }
 0x3b1   : > { %v503_v61 = vsel %vm202_vm0, %v2382_v60, 0.0  ;;  %v2384_v62 = vpop.eup %2383 }
 0x3b2   : > { %504 = vadd.xlane.f32.xlu0 %v503_v61  ;;  %v500_v63 = vsel %vm202_vm0, %v2384_v62, 0.0 }
 0x3b6   : > { %501 = vadd.xlane.f32.xlu0 %v500_v63  ;;  %v805_v63 = vsub.s32 3, %v2516_v7 }
 0x3b8   : > { %v806_v1 = vrot.slane %v2522_v9, %v805_v63 }
 0x3cc   : > { %2314 = vrot.lane.b32.xlu0 %v2527_v17, %s2446_s25 }
 0x43f   : > { %v505_v8 = vpop.xlane.xlu0 %504 }
 0x440   : > { %2385 = vrcp.f32 %v505_v8 }
 0x443   : > { %v502_v10 = vpop.xlane.xlu0 %501 }
 0x444   : > { %2387 = vrcp.f32 %v502_v10 }
 0x447   : > { %v2315_v11 = vpop.permute.xlu0 %2314 }
 0x448   : > { %v2317_v12 = vunpack.i.h.bf16 %v2315_v11  ;;  %v2316_v13 = vunpack.i.l.bf16 %v2315_v11 }
 0x44a   : > { %v2228_v14 = vpack.c.bf16 %v2317_v12, %v2316_v13  ;;  %v2386_v15 = vpop.eup %2385 }
 0x44b   : > { %v509_v19 = vmul.f32 %v2386_v15, %v2382_v60 }
 0x44c   : > { %2230 = vmatprep.subr.msk.bf16.mxu0 %vm2491_vm1, %v2228_v14 }
 0x44e   : > { %v2388_v16 = vpop.eup %2387 }
 0x44f   : > { %v508_v18 = vmul.f32 %v2388_v16, %v2384_v62 }
 0x451   : > { %2121 = vmatprep.mubr.msk.f32.mxu0 %vm202_vm0, %v508_v18 }
 0x452   : > { %2122 = vmatmul.mubr.msk.f32.vlgmr.msra.gmra.mrb[2].mxu0 %vm202_vm0, %v509_v19 }
 0x453   : > { %2233 = vmatpush3.bf16.xpose.msk.msra.mxu0 %vm2491_vm1, %v2228_v14  ;;  %2128 = vmatprep.mubr.msk.f32.mxu0 %vm202_vm0, %v604_v20 }
 0x45a   : > { %2129 = vmatmul.mubr.msk.f32.vlgmr.msra.gmra.mrb[4].mxu0 %vm202_vm0, %v606_v21 }
 0x525   : > { %v2573_v22 = vpop.f32.mrb[2].mxu0 }
 0x526   : > { %v2575_v23 = vpop.f32.mrb[3].mxu0 }
 0x52d   : > { %v2130_v26 = vpop.f32.mrb[4].mxu0 }
 0x52e   : > { %v691_v27 = vadd.f32 %v2130_v26, %v602_v25  ;;  %v685_v28 = vpop.f32.mrb[5].mxu0 }
 0x52f   : > { %v686_v29 = vadd.f32 %v685_v28, %v602_v25 }
 0x530   : > { %v697_v30 = vsel %vm202_vm0, %v691_v27, -inf }
 0x531   : > { %698 = vmax.xlane.f32.xlu0 %v697_v30  ;;  %v694_v31 = vsel %vm202_vm0, %v686_v29, -inf }
 0x532   : > { %695 = vmax.xlane.f32.xlu1 %v694_v31 }
 0x543   : > { %2319 = vrot.lane.b32.xlu1 %v2553_v53, %s2446_s25 }
 0x547   : > { %807 = vrot.lane.b32.xlu1 %v2502_v3, %s2447_s26 }
 0x54b   : > { %809 = vrot.lane.b32.xlu1 %v2510_v5, %s2447_s26 }
 0x5be   : > { %v699_v32 = vpop.xlane.xlu0 %698 }
 0x5bf   : > { %v701_v33 = vsub.f32 %v691_v27, %v699_v32  ;;  %v696_v34 = vpop.xlane.xlu1 %695 }
 0x5c0   : > { %v700_v35 = vsub.f32 %v686_v29, %v696_v34 }
 0x5c1   : > { %v704_v36 = vmul.f32 1.442695, %v701_v33 }
 0x5c2   : > { %v702_v37 = vmul.f32 1.442695, %v700_v35 }
 0x5c3   : > { %2389 = vpow2.f32 %v704_v36  ;;  %v2320_v42 = vpop.permute.xlu1 %2319 }
 0x5c4   : > { %2391 = vpow2.f32 %v702_v37  ;;  %v2322_v45 = vunpack.i.h.bf16 %v2320_v42  ;;  %v2321_v46 = vunpack.i.l.bf16 %v2320_v42 }
 0x5c6   : > { %v2234_v47 = vpack.c.bf16 %v2322_v45, %v2321_v46  ;;  %v1009_v45 = vsub.s32 4, %v2516_v7 }
 0x5c7   : > { %v808_v59 = vpop.permute.xlu1 %807 }
 0x5c8   : > { %2235 = vmatprep.subr.bf16.mxu1 %v2234_v47  ;;  %v1010_v46 = vrot.slane %v2522_v9, %v1009_v45 }
 0x5c9   : > { %2237 = vmatpush3.bf16.msra.mxu1 %v2234_v47 }
 0x5cb   : > { %v810_v60 = vpop.permute.xlu1 %809 }
 0x5cd   : > { %v2390_v38 = vpop.eup %2389 }
 0x5ce   : > { %v709_v39 = vsel %vm202_vm0, %v2390_v38, 0.0  ;;  %v2392_v40 = vpop.eup %2391 }
 0x5cf   : > { %710 = vadd.xlane.f32.xlu0 %v709_v39  ;;  %v706_v41 = vsel %vm202_vm0, %v2392_v40, 0.0 }
 0x5d3   : > { %707 = vadd.xlane.f32.xlu0 %v706_v41 }
 0x5e9   : > { %2324 = vrot.lane.b32.xlu0 %v2527_v17, %s2447_s26 }
 0x65c   : > { %v711_v48 = vpop.xlane.xlu0 %710 }
 0x65d   : > { %2393 = vrcp.f32 %v711_v48 }
 0x660   : > { %v708_v49 = vpop.xlane.xlu0 %707 }
 0x661   : > { %2395 = vrcp.f32 %v708_v49 }
 0x664   : > { %v2325_v50 = vpop.permute.xlu0 %2324 }
 0x665   : > { %v2327_v51 = vunpack.i.h.bf16 %v2325_v50  ;;  %v2326_v52 = vunpack.i.l.bf16 %v2325_v50 }
 0x667   : > { %v2238_v54 = vpack.c.bf16 %v2327_v51, %v2326_v52  ;;  %v2394_v55 = vpop.eup %2393 }
 0x668   : > { %v715_v58 = vmul.f32 %v2394_v55, %v2390_v38 }
 0x669   : > { %2240 = vmatprep.subr.msk.bf16.mxu1 %vm2491_vm1, %v2238_v54 }
 0x66b   : > { %v2396_v56 = vpop.eup %2395 }
 0x66c   : > { %v714_v57 = vmul.f32 %v2396_v56, %v2392_v40 }
 0x66e   : > { %2135 = vmatprep.mubr.msk.f32.mxu1 %vm202_vm0, %v714_v57 }
 0x66f   : > { %2136 = vmatmul.mubr.msk.f32.vlgmr.msra.gmra.mrb[4].mxu1 %vm202_vm0, %v715_v58 }
 0x670   : > { %2243 = vmatpush3.bf16.xpose.msk.msra.mxu1 %vm2491_vm1, %v2238_v54  ;;  %2142 = vmatprep.mubr.msk.f32.mxu1 %vm202_vm0, %v808_v59 }
 0x677   : > { %2143 = vmatmul.mubr.msk.f32.vlgmr.msra.gmra.mrb[6].mxu1 %vm202_vm0, %v810_v60 }
 0x742   : > { %v2599_v61 = vpop.f32.mrb[4].mxu1 }
 0x743   : > { %v2601_v62 = vpop.f32.mrb[5].mxu1 }
 0x74a   : > { %v2144_v2 = vpop.f32.mrb[6].mxu1 }
 0x74b   : > { %v895_v4 = vadd.f32 %v2144_v2, %v806_v1  ;;  %v889_v6 = vpop.f32.mrb[7].mxu1 }
 0x74c   : > { %v890_v8 = vadd.f32 %v889_v6, %v806_v1 }
 0x74d   : > { %v901_v10 = vsel %vm202_vm0, %v895_v4, -inf }
 0x74e   : > { %902 = vmax.xlane.f32.xlu0 %v901_v10  ;;  %v898_v11 = vsel %vm202_vm0, %v890_v8, -inf }
 0x74f   : > { %899 = vmax.xlane.f32.xlu1 %v898_v11 }
 0x760   : > { %2329 = vrot.lane.b32.xlu1 %v2553_v53, %s2447_s26 }
 0x764   : > { %1011 = vrot.lane.b32.xlu1 %v2502_v3, %s2448_s27 }
 0x768   : > { %1013 = vrot.lane.b32.xlu1 %v2510_v5, %s2448_s27 }
 0x7db   : > { %v903_v12 = vpop.xlane.xlu0 %902 }
 0x7dc   : > { %v905_v13 = vsub.f32 %v895_v4, %v903_v12  ;;  %v900_v14 = vpop.xlane.xlu1 %899 }
 0x7dd   : > { %v904_v15 = vsub.f32 %v890_v8, %v900_v14 }
 0x7de   : > { %v908_v16 = vmul.f32 1.442695, %v905_v13 }
 0x7df   : > { %v906_v18 = vmul.f32 1.442695, %v904_v15 }
 0x7e0   : > { %2397 = vpow2.f32 %v908_v16  ;;  %v2330_v25 = vpop.permute.xlu1 %2329 }
 0x7e1   : > { %2399 = vpow2.f32 %v906_v18  ;;  %v2332_v26 = vunpack.i.h.bf16 %v2330_v25  ;;  %v2331_v27 = vunpack.i.l.bf16 %v2330_v25 }
 0x7e3   : > { %v2244_v28 = vpack.c.bf16 %v2332_v26, %v2331_v27 }
 0x7e4   : > { %v1012_v39 = vpop.permute.xlu1 %1011 }
 0x7e5   : > { %2245 = vmatprep.subr.bf16.mxu0 %v2244_v28 }
 0x7e6   : > { %2247 = vmatpush3.bf16.msra.mxu0 %v2244_v28  ;;  %v1213_v28 = vsub.s32 5, %v2516_v7 }
 0x7e8   : > { %v1014_v40 = vpop.permute.xlu1 %1013 }
 0x7ea   : > { %v2398_v19 = vpop.eup %2397 }
 0x7eb   : > { %v913_v20 = vsel %vm202_vm0, %v2398_v19, 0.0  ;;  %v2400_v21 = vpop.eup %2399 }
 0x7ec   : > { %914 = vadd.xlane.f32.xlu0 %v913_v20  ;;  %v910_v24 = vsel %vm202_vm0, %v2400_v21, 0.0 }
 0x7f0   : > { %911 = vadd.xlane.f32.xlu0 %v910_v24 }
 0x806   : > { %2334 = vrot.lane.b32.xlu0 %v2527_v17, %s2448_s27 }
 0x879   : > { %v915_v29 = vpop.xlane.xlu0 %914 }
 0x87a   : > { %2401 = vrcp.f32 %v915_v29  ;;  %v1214_v29 = vrot.slane %v2522_v9, %v1213_v28 }
 0x87d   : > { %v912_v30 = vpop.xlane.xlu0 %911 }
 0x87e   : > { %2403 = vrcp.f32 %v912_v30 }
 0x881   : > { %v2335_v31 = vpop.permute.xlu0 %2334 }
 0x882   : > { %v2337_v32 = vunpack.i.h.bf16 %v2335_v31  ;;  %v2336_v33 = vunpack.i.l.bf16 %v2335_v31 }
 0x884   : > { %v2248_v34 = vpack.c.bf16 %v2337_v32, %v2336_v33  ;;  %v2402_v35 = vpop.eup %2401 }
 0x885   : > { %v919_v38 = vmul.f32 %v2402_v35, %v2398_v19 }
 0x886   : > { %2250 = vmatprep.subr.msk.bf16.mxu0 %vm2491_vm1, %v2248_v34 }
 0x888   : > { %v2404_v36 = vpop.eup %2403 }
 0x889   : > { %v918_v37 = vmul.f32 %v2404_v36, %v2400_v21 }
 0x88b   : > { %2149 = vmatprep.mubr.msk.f32.mxu0 %vm202_vm0, %v918_v37 }
 0x88c   : > { %2150 = vmatmul.mubr.msk.f32.vlgmr.msra.gmra.mrb[6].mxu0 %vm202_vm0, %v919_v38 }
 0x88d   : > { %2253 = vmatpush3.bf16.xpose.msk.msra.mxu0 %vm2491_vm1, %v2248_v34  ;;  %2156 = vmatprep.mubr.msk.f32.mxu0 %vm202_vm0, %v1012_v39 }
 0x894   : > { %2157 = vmatmul.mubr.msk.f32.vlgmr.msra.gmra.mrb[8].mxu0 %vm202_vm0, %v1014_v40 }
 0x95f   : > { %v2625_v41 = vpop.f32.mrb[6].mxu0 }
 0x960   : > { %v2627_v42 = vpop.f32.mrb[7].mxu0 }
 0x967   : > { %v2158_v47 = vpop.f32.mrb[8].mxu0 }
 0x968   : > { %v1099_v48 = vadd.f32 %v2158_v47, %v1010_v46  ;;  %v1093_v49 = vpop.f32.mrb[9].mxu0 }
 0x969   : > { %v1094_v50 = vadd.f32 %v1093_v49, %v1010_v46 }
 0x96a   : > { %v1105_v51 = vsel %vm202_vm0, %v1099_v48, -inf }
 0x96b   : > { %1106 = vmax.xlane.f32.xlu0 %v1105_v51  ;;  %v1102_v52 = vsel %vm202_vm0, %v1094_v50, -inf }
 0x96c   : > { %1103 = vmax.xlane.f32.xlu1 %v1102_v52 }
 0x97d   : > { %2339 = vrot.lane.b32.xlu1 %v2553_v53, %s2448_s27 }
 0x981   : > { %1215 = vrot.lane.b32.xlu1 %v2502_v3, %s2449_s28 }
 0x985   : > { %1217 = vrot.lane.b32.xlu1 %v2510_v5, %s2449_s28 }
 0x9f8   : > { %v1107_v54 = vpop.xlane.xlu0 %1106 }
 0x9f9   : > { %v1109_v55 = vsub.f32 %v1099_v48, %v1107_v54  ;;  %v1104_v56 = vpop.xlane.xlu1 %1103 }
 0x9fa   : > { %v1108_v57 = vsub.f32 %v1094_v50, %v1104_v56 }
 0x9fb   : > { %v1112_v58 = vmul.f32 1.442695, %v1109_v55 }
 0x9fc   : > { %v1110_v59 = vmul.f32 1.442695, %v1108_v57 }
 0x9fd   : > { %2405 = vpow2.f32 %v1112_v58  ;;  %v2340_v4 = vpop.permute.xlu1 %2339 }
 0x9fe   : > { %2407 = vpow2.f32 %v1110_v59  ;;  %v2342_v6 = vunpack.i.h.bf16 %v2340_v4  ;;  %v2341_v8 = vunpack.i.l.bf16 %v2340_v4 }
 0xa00   : > { %v2254_v10 = vpack.c.bf16 %v2342_v6, %v2341_v8 }
 0xa01   : > { %v1216_v24 = vpop.permute.xlu1 %1215 }
 0xa02   : > { %2255 = vmatprep.subr.bf16.mxu1 %v2254_v10 }
 0xa03   : > { %2257 = vmatpush3.bf16.msra.mxu1 %v2254_v10 }
 0xa05   : > { %v1218_v25 = vpop.permute.xlu1 %1217 }
 0xa07   : > { %v2406_v60 = vpop.eup %2405 }
 0xa08   : > { %v1117_v63 = vsel %vm202_vm0, %v2406_v60, 0.0  ;;  %v2408_v1 = vpop.eup %2407 }
 0xa09   : > { %1118 = vadd.xlane.f32.xlu0 %v1117_v63  ;;  %v1114_v2 = vsel %vm202_vm0, %v2408_v1, 0.0 }
 0xa0d   : > { %1115 = vadd.xlane.f32.xlu0 %v1114_v2 }
 0xa23   : > { %2344 = vrot.lane.b32.xlu0 %v2527_v17, %s2449_s28 }
 0xa96   : > { %v1119_v11 = vpop.xlane.xlu0 %1118 }
 0xa97   : > { %2409 = vrcp.f32 %v1119_v11 }
 0xa9a   : > { %v1116_v12 = vpop.xlane.xlu0 %1115 }
 0xa9b   : > { %2411 = vrcp.f32 %v1116_v12  ;;  %v1417_v12 = vsub.s32 6, %v2516_v7 }
 0xa9e   : > { %v2345_v13 = vpop.permute.xlu0 %2344 }
 0xa9f   : > { %v2347_v14 = vunpack.i.h.bf16 %v2345_v13  ;;  %v2346_v15 = vunpack.i.l.bf16 %v2345_v13  ;;  %v1418_v13 = vrot.slane %v2522_v9, %v1417_v12 }
 0xaa1   : > { %v2258_v16 = vpack.c.bf16 %v2347_v14, %v2346_v15  ;;  %v2410_v18 = vpop.eup %2409 }
 0xaa2   : > { %v1123_v21 = vmul.f32 %v2410_v18, %v2406_v60 }
 0xaa3   : > { %2260 = vmatprep.subr.msk.bf16.mxu1 %vm2491_vm1, %v2258_v16 }
 0xaa5   : > { %v2412_v19 = vpop.eup %2411 }
 0xaa6   : > { %v1122_v20 = vmul.f32 %v2412_v19, %v2408_v1 }
 0xaa8   : > { %2163 = vmatprep.mubr.msk.f32.mxu1 %vm202_vm0, %v1122_v20 }
 0xaa9   : > { %2164 = vmatmul.mubr.msk.f32.vlgmr.msra.gmra.mrb[8].mxu1 %vm202_vm0, %v1123_v21 }
 0xaaa   : > { %2263 = vmatpush3.bf16.xpose.msk.msra.mxu1 %vm2491_vm1, %v2258_v16  ;;  %2170 = vmatprep.mubr.msk.f32.mxu1 %vm202_vm0, %v1216_v24 }
 0xab1   : > { %2171 = vmatmul.mubr.msk.f32.vlgmr.msra.gmra.mrb[10].mxu1 %vm202_vm0, %v1218_v25 }
 0xb7c   : > { %v2651_v26 = vpop.f32.mrb[8].mxu1 }
 0xb7d   : > { %v2653_v27 = vpop.f32.mrb[9].mxu1 }
 0xb84   : > { %v2172_v30 = vpop.f32.mrb[10].mxu1 }
 0xb85   : > { %v1303_v31 = vadd.f32 %v2172_v30, %v1214_v29  ;;  %v1297_v32 = vpop.f32.mrb[11].mxu1 }
 0xb86   : > { %v1298_v33 = vadd.f32 %v1297_v32, %v1214_v29 }
 0xb87   : > { %v1309_v34 = vsel %vm202_vm0, %v1303_v31, -inf }
 0xb88   : > { %1310 = vmax.xlane.f32.xlu0 %v1309_v34  ;;  %v1306_v35 = vsel %vm202_vm0, %v1298_v33, -inf }
 0xb89   : > { %1307 = vmax.xlane.f32.xlu1 %v1306_v35 }
 0xb9a   : > { %2349 = vrot.lane.b32.xlu1 %v2553_v53, %s2449_s28 }
 0xb9e   : > { %1419 = vrot.lane.b32.xlu1 %v2502_v3, %s2450_s29 }
 0xba2   : > { %1421 = vrot.lane.b32.xlu1 %v2510_v5, %s2450_s29 }
 0xc15   : > { %v1311_v36 = vpop.xlane.xlu0 %1310 }
 0xc16   : > { %v1313_v37 = vsub.f32 %v1303_v31, %v1311_v36  ;;  %v1308_v38 = vpop.xlane.xlu1 %1307 }
 0xc17   : > { %v1312_v39 = vsub.f32 %v1298_v33, %v1308_v38 }
 0xc18   : > { %v1316_v40 = vmul.f32 1.442695, %v1313_v37 }
 0xc19   : > { %v1314_v45 = vmul.f32 1.442695, %v1312_v39 }
 0xc1a   : > { %2413 = vpow2.f32 %v1316_v40  ;;  %v2350_v50 = vpop.permute.xlu1 %2349 }
 0xc1b   : > { %2415 = vpow2.f32 %v1314_v45  ;;  %v2352_v51 = vunpack.i.h.bf16 %v2350_v50  ;;  %v2351_v52 = vunpack.i.l.bf16 %v2350_v50 }
 0xc1d   : > { %v2264_v54 = vpack.c.bf16 %v2352_v51, %v2351_v52 }
 0xc1e   : > { %v1420_v6 = vpop.permute.xlu1 %1419 }
 0xc1f   : > { %2265 = vmatprep.subr.bf16.mxu0 %v2264_v54 }
 0xc20   : > { %2267 = vmatpush3.bf16.msra.mxu0 %v2264_v54 }
 0xc22   : > { %v1422_v8 = vpop.permute.xlu1 %1421 }
 0xc24   : > { %v2414_v46 = vpop.eup %2413 }
 0xc25   : > { %v1321_v47 = vsel %vm202_vm0, %v2414_v46, 0.0  ;;  %v2416_v48 = vpop.eup %2415 }
 0xc26   : > { %1322 = vadd.xlane.f32.xlu0 %v1321_v47  ;;  %v1318_v49 = vsel %vm202_vm0, %v2416_v48, 0.0 }
 0xc2a   : > { %1319 = vadd.xlane.f32.xlu0 %v1318_v49 }
 0xc40   : > { %2354 = vrot.lane.b32.xlu0 %v2527_v17, %s2450_s29 }
 0xcb3   : > { %v1323_v55 = vpop.xlane.xlu0 %1322 }
 0xcb4   : > { %2417 = vrcp.f32 %v1323_v55  ;;  %v1621_v55 = vsub.s32 7, %v2516_v7 }
 0xcb7   : > { %v1320_v56 = vpop.xlane.xlu0 %1319 }
 0xcb8   : > { %2419 = vrcp.f32 %v1320_v56  ;;  %v1622_v56 = vrot.slane %v2522_v9, %v1621_v55 }
 0xcbb   : > { %v2355_v57 = vpop.permute.xlu0 %2354 }
 0xcbc   : > { %v2357_v58 = vunpack.i.h.bf16 %v2355_v57  ;;  %v2356_v59 = vunpack.i.l.bf16 %v2355_v57 }
 0xcbe   : > { %v2268_v60 = vpack.c.bf16 %v2357_v58, %v2356_v59  ;;  %v2418_v63 = vpop.eup %2417 }
 0xcbf   : > { %v1327_v4 = vmul.f32 %v2418_v63, %v2414_v46 }
 0xcc0   : > { %2270 = vmatprep.subr.msk.bf16.mxu0 %vm2491_vm1, %v2268_v60 }
 0xcc2   : > { %v2420_v1 = vpop.eup %2419 }
 0xcc3   : > { %v1326_v2 = vmul.f32 %v2420_v1, %v2416_v48 }
 0xcc5   : > { %2177 = vmatprep.mubr.msk.f32.mxu0 %vm202_vm0, %v1326_v2 }
 0xcc6   : > { %2178 = vmatmul.mubr.msk.f32.vlgmr.msra.gmra.mrb[10].mxu0 %vm202_vm0, %v1327_v4 }
 0xcc7   : > { %2273 = vmatpush3.bf16.xpose.msk.msra.mxu0 %vm2491_vm1, %v2268_v60  ;;  %2184 = vmatprep.mubr.msk.f32.mxu0 %vm202_vm0, %v1420_v6 }
 0xcce   : > { %2185 = vmatmul.mubr.msk.f32.vlgmr.msra.gmra.mrb[12].mxu0 %vm202_vm0, %v1422_v8 }
 0xd99   : > { %v2677_v10 = vpop.f32.mrb[10].mxu0 }
 0xd9a   : > { %v2679_v11 = vpop.f32.mrb[11].mxu0 }
 0xda1   : > { %v2186_v14 = vpop.f32.mrb[12].mxu0 }
 0xda2   : > { %v1507_v15 = vadd.f32 %v2186_v14, %v1418_v13  ;;  %v1501_v16 = vpop.f32.mrb[13].mxu0 }
 0xda3   : > { %v1502_v18 = vadd.f32 %v1501_v16, %v1418_v13 }
 0xda4   : > { %v1513_v19 = vsel %vm202_vm0, %v1507_v15, -inf }
 0xda5   : > { %1514 = vmax.xlane.f32.xlu0 %v1513_v19  ;;  %v1510_v20 = vsel %vm202_vm0, %v1502_v18, -inf }
 0xda6   : > { %1511 = vmax.xlane.f32.xlu1 %v1510_v20 }
 0xdb7   : > { %2359 = vrot.lane.b32.xlu1 %v2553_v53, %s2450_s29 }
 0xdbb   : > { %1623 = vrot.lane.b32.xlu1 %v2502_v3, %s2451_s30 }
 0xdbf   : > { %1625 = vrot.lane.b32.xlu1 %v2510_v5, %s2451_s30 }
 0xe32   : > { %v1515_v21 = vpop.xlane.xlu0 %1514 }
 0xe33   : > { %v1517_v24 = vsub.f32 %v1507_v15, %v1515_v21  ;;  %v1512_v25 = vpop.xlane.xlu1 %1511 }
 0xe34   : > { %v1516_v28 = vsub.f32 %v1502_v18, %v1512_v25 }
 0xe35   : > { %v1520_v29 = vmul.f32 1.442695, %v1517_v24 }
 0xe36   : > { %v1518_v30 = vmul.f32 1.442695, %v1516_v28 }
 0xe37   : > { %2421 = vpow2.f32 %v1520_v29  ;;  %v2360_v3 = vpop.permute.xlu1 %2359 }
 0xe38   : > { %2423 = vpow2.f32 %v1518_v30  ;;  %v2362_v35 = vunpack.i.h.bf16 %v2360_v3  ;;  %v2361_v36 = vunpack.i.l.bf16 %v2360_v3 }
 0xe3a   : > { %v2274_v5 = vpack.c.bf16 %v2362_v35, %v2361_v36 }
 0xe3b   : > { %v1624_v51 = vpop.permute.xlu1 %1623 }
 0xe3c   : > { %2275 = vmatprep.subr.bf16.mxu1 %v2274_v5 }
 0xe3d   : > { %2277 = vmatpush3.bf16.msra.mxu1 %v2274_v5 }
 0xe41   : > { %v2422_v31 = vpop.eup %2421 }
 0xe42   : > { %v1525_v32 = vsel %vm202_vm0, %v2422_v31, 0.0  ;;  %v2424_v33 = vpop.eup %2423 }
 0xe43   : > { %1526 = vadd.xlane.f32.xlu0 %v1525_v32  ;;  %v1522_v34 = vsel %vm202_vm0, %v2424_v33, 0.0 }
 0xe47   : > { %1523 = vadd.xlane.f32.xlu0 %v1522_v34 }
 0xe5d   : > { %2364 = vrot.lane.b32.xlu0 %v2527_v17, %s2451_s30  ;;  %v1626_v17 = vpop.permute.xlu1 %1625 }
 0xed0   : > { %v1527_v37 = vpop.xlane.xlu0 %1526 }
 0xed1   : > { %2425 = vrcp.f32 %v1527_v37 }
 0xed4   : > { %v1524_v38 = vpop.xlane.xlu0 %1523 }
 0xed5   : > { %2427 = vrcp.f32 %v1524_v38 }
 0xed8   : > { %v2365_v39 = vpop.permute.xlu0 %2364 }
 0xed9   : > { %v2367_v40 = vunpack.i.h.bf16 %v2365_v39  ;;  %v2366_v45 = vunpack.i.l.bf16 %v2365_v39 }
 0xedb   : > { %v2278_v46 = vpack.c.bf16 %v2367_v40, %v2366_v45  ;;  %v2426_v47 = vpop.eup %2425 }
 0xedc   : > { %v1531_v50 = vmul.f32 %v2426_v47, %v2422_v31 }
 0xedd   : > { %2280 = vmatprep.subr.msk.bf16.mxu1 %vm2491_vm1, %v2278_v46 }
 0xedf   : > { %v2428_v48 = vpop.eup %2427 }
 0xee0   : > { %v1530_v49 = vmul.f32 %v2428_v48, %v2424_v33 }
 0xee2   : > { %2191 = vmatprep.mubr.msk.f32.mxu1 %vm202_vm0, %v1530_v49 }
 0xee3   : > { %2192 = vmatmul.mubr.msk.f32.vlgmr.msra.gmra.mrb[12].mxu1 %vm202_vm0, %v1531_v50 }
 0xee4   : > { %2283 = vmatpush3.bf16.xpose.msk.msra.mxu1 %vm2491_vm1, %v2278_v46  ;;  %2198 = vmatprep.mubr.msk.f32.mxu1 %vm202_vm0, %v1624_v51 }
 0xeeb   : > { %2199 = vmatmul.mubr.msk.f32.vlgmr.msra.gmra.mrb[14].mxu1 %vm202_vm0, %v1626_v17 }
 0xfb6   : > { %v2193_v52 = vpop.f32.mrb[12].mxu1 }
 0xfb7   : > { %v1610_v54 = vpop.f32.mrb[13].mxu1 }
 0xfbe   : > { %v2200_v57 = vpop.f32.mrb[14].mxu1 }
 0xfbf   : > { %v1711_v58 = vadd.f32 %v2200_v57, %v1622_v56  ;;  %v1705_v59 = vpop.f32.mrb[15].mxu1 }
 0xfc0   : > { %v1706_v60 = vadd.f32 %v1705_v59, %v1622_v56 }
 0xfc1   : > { %v1717_v63 = vsel %vm202_vm0, %v1711_v58, -inf }
 0xfc2   : > { %1718 = vmax.xlane.f32.xlu0 %v1717_v63  ;;  %v1714_v0 = vsel %vm202_vm0, %v1706_v60, -inf }
 0xfc3   : > { %1715 = vmax.xlane.f32.xlu1 %v1714_v0 }
 0xfd4   : > { %2369 = vrot.lane.b32.xlu1 %v2553_v53, %s2451_s30 }
 0xfd8   : > { %1827 = vrot.lane.b32.xlu1 %v2573_v22, %s2451_s30 }
 0xfdc   : > { %1833 = vrot.lane.b32.xlu1 %v2601_v62, %s2450_s29 }
 0xfe0   : > { %1835 = vrot.lane.b32.xlu1 %v2599_v61, %s2450_s29 }
 0xfe4   : > { %1843 = vrot.lane.b32.xlu1 %v2625_v41, %s2449_s28 }
 0xfe8   : > { %1851 = vrot.lane.b32.xlu1 %v2651_v26, %s2448_s27 }
 0xfec   : > { %1859 = vrot.lane.b32.xlu1 %v2677_v10, %s2447_s26 }
 0xff0   : > { %1867 = vrot.lane.b32.xlu1 %v2193_v52, %s2446_s25 }
0x104f   : > { %v1719_v7 = vpop.xlane.xlu0 %1718 }
0x1050   : > { %v1721_v9 = vsub.f32 %v1711_v58, %v1719_v7  ;;  %v1716_v53 = vpop.xlane.xlu1 %1715 }
0x1051   : > { %v1720_v22 = vsub.f32 %v1706_v60, %v1716_v53 }
0x1052   : > { %v1724_v1 = vmul.f32 1.442695, %v1721_v9 }
0x1053   : > { %v1722_v62 = vmul.f32 1.442695, %v1720_v22 }
0x1054   : > { %v2370_v2 = vpop.permute.xlu1 %2369 }
0x1055   : > { %2429 = vpow2.f32 %v1722_v62  ;;  %v2372_v61 = vunpack.i.h.bf16 %v2370_v2  ;;  %v2371_v4 = vunpack.i.l.bf16 %v2370_v2 }
0x1056   : > { %2431 = vpow2.f32 %v1724_v1 }
0x1057   : > { %v2284_v41 = vpack.c.bf16 %v2372_v61, %v2371_v4 }
0x1059   : > { %2285 = vmatprep.subr.bf16.mxu0 %v2284_v41 }
0x105a   : > { %2287 = vmatpush3.bf16.msra.mxu0 %v2284_v41 }
0x105f   : > { %v2430_v26 = vpop.eup %2429 }
0x1060   : > { %v1726_v6 = vsel %vm202_vm0, %v2430_v26, 0.0  ;;  %v2432_v8 = vpop.eup %2431 }
0x1061   : > { %1727 = vadd.xlane.f32.xlu0 %v1726_v6  ;;  %v1729_v10 = vsel %vm202_vm0, %v2432_v8, 0.0 }
0x1065   : > { %1730 = vadd.xlane.f32.xlu0 %v1729_v10 }
0x107b   : > { %1825 = vrot.lane.b32.xlu0 %v2575_v23, %s2451_s30 }
0x107f   : > { %1841 = vrot.lane.b32.xlu0 %v2627_v42, %s2449_s28 }
0x1083   : > { %1849 = vrot.lane.b32.xlu0 %v2653_v27, %s2448_s27 }
0x1087   : > { %1857 = vrot.lane.b32.xlu0 %v2679_v11, %s2447_s26  ;;  %v1828_v11 = vpop.permute.xlu1 %1827 }
0x1088   : > { %v1880_v32 = vsel %vm202_vm0, %v2545_v43, %v1828_v11 }
0x108b   : > { %1865 = vrot.lane.b32.xlu0 %v1610_v54, %s2446_s25  ;;  %v1834_v18 = vpop.permute.xlu1 %1833 }
0x108f   : > { %v1836_v19 = vpop.permute.xlu1 %1835 }
0x1090   : > { %v1883_v33 = vsel %vm1881_vm2, %v1880_v32, %v1836_v19 }
0x1093   : > { %v1844_v21 = vpop.permute.xlu1 %1843 }
0x1094   : > { %v1886_v3 = vsel %vm1884_vm3, %v1883_v33, %v1844_v21 }
0x1097   : > { %v1852_v25 = vpop.permute.xlu1 %1851 }
0x1098   : > { %v1889_v5 = vsel %vm1887_vm4, %v1886_v3, %v1852_v25 }
0x109b   : > { %v1860_v29 = vpop.permute.xlu1 %1859 }
0x109c   : > { %v1892_v38 = vsel %vm1890_vm5, %v1889_v5, %v1860_v29 }
0x109f   : > { %v1868_v34 = vpop.permute.xlu1 %1867 }
0x10ee   : > { %v1728_v12 = vpop.xlane.xlu0 %1727 }
0x10ef   : > { %2433 = vrcp.f32 %v1728_v12 }
0x10f2   : > { %v1731_v13 = vpop.xlane.xlu0 %1730 }
0x10f3   : > { %2435 = vrcp.f32 %v1731_v13 }
0x10f6   : > { %v1826_v20 = vpop.permute.xlu0 %1825 }
0x10f7   : > { %v1879_v31 = vsel %vm202_vm0, %v2547_v44, %v1826_v20  ;;  %v1895_v44 = vsel %vm1893_vm6, %v1892_v38, %v1868_v34 }
0x10f8   : > { %v1882_v35 = vsel %vm1881_vm2, %v1879_v31, %v1834_v18 }
0x10f9   : > { %v2434_v14 = vpop.eup %2433 }
0x10fa   : > { %v1734_v15 = vmul.f32 %v2434_v14, %v2430_v26  ;;  %v1842_v24 = vpop.permute.xlu0 %1841 }
0x10fb   : > { %v1885_v37 = vsel %vm1884_vm3, %v1882_v35, %v1842_v24 }
0x10fc   : > { %2205 = vmatprep.mubr.msk.f32.mxu0 %vm202_vm0, %v1734_v15 }
0x10fd   : > { %v2436_v23 = vpop.eup %2435 }
0x10fe   : > { %v1735_v16 = vmul.f32 %v2436_v23, %v2432_v8  ;;  %v1850_v28 = vpop.permute.xlu0 %1849 }
0x10ff   : > { %v1888_v39 = vsel %vm1887_vm4, %v1885_v37, %v1850_v28 }
0x1100   : > { %2206 = vmatmul.mubr.msk.f32.vlgmr.msra.gmra.mrb[14].mxu0 %vm202_vm0, %v1735_v16 }
0x1102   : > { %v1858_v30 = vpop.permute.xlu0 %1857 }
0x1103   : > { %v1891_v43 = vsel %vm1890_vm5, %v1888_v39, %v1858_v30 }
0x1106   : > { %v1866_v36 = vpop.permute.xlu0 %1865 }
0x1107   : > { %v1894_v45 = vsel %vm1893_vm6, %v1891_v43, %v1866_v36 }
0x11d3   : > { %v2207_v42 = vpop.f32.mrb[14].mxu0 }
0x11d4   : > { %1875 = vrot.lane.b32.xlu1 %v2207_v42, %s2445_s22  ;;  %v1814_v27 = vpop.f32.mrb[15].mxu0 }
0x11d5   : > { %1873 = vrot.lane.b32.xlu0 %v1814_v27, %s2445_s22 }
0x1246   : > { %v1876_v40 = vpop.permute.xlu1 %1875 }
0x1247   : > { %v1898_v46 = vsel %vm1896_vm7, %v1895_v44, %v1876_v40  ;;  %v1874_v47 = vpop.permute.xlu0 %1873 }
0x1248   : > { %1900 = vst [vmem:[%s190_s6 + $0x8] sm:$0xff] %v1898_v46  ;;  %v1897_v48 = vsel %vm1896_vm7, %v1894_v45, %v1874_v47 }
0x1249   : > { %1899 = vst [vmem:[%s190_s6] sm:$0xff] %v1897_v48 }
0x124a PF: > { %s13_s12 = sadd.s32 1, %s2443_s12  }
0x124b   : > { %p10_p4 = scmp.ge.s32.totalorder %s13_s12, 10  }
0x124d   :  { %12 = sbr.rel (!%p10_p4) target bundleno = 1 (0x1), region = 65 }

// kernel: transformer_decoder_layer.12
= control target key start
LH: loop header
LB: loop body
LE: loop exit
PB: predicated region body
PF: predicated region fallthrough
CT: control target
= control target key end

     0   :  { %s514_s12 = smov 0   ;;  %s662_s0 = inlined_call_operand.vmem [shape: f32[128,128], index: 0, kind: input, shape index: {}]   ;;  %s663_s1 = inlined_call_operand.vmem [shape: f32[128,256], index: 1, kind: input, shape index: {}]   ;;  %s664_s2 = inlined_call_operand.vmem [shape: f32[1,256], index: 2, kind: input, shape index: {}]   ;;  %s665_s3 = inlined_call_operand.vmem [shape: f32[128,256], index: 3, kind: output, shape index: {}]  }
   0x1 LB: > { %s415_s13 = sadd.s32 4294967295, %s491_s12   ;;  %p419_p0 = scmp.ge.s32.totalorder %s491_s12, 1  ;;  %s491_s12 = sphi %s514_s12, %s13_s12  }
   0x2   : > { %p138_p1 = scmp.lt.s32.totalorder %s491_s12, 3 }
   0x4   : > { %p139_p2 = pnand %p419_p0, %p138_p1 }
   0x5   : > { %v185_v0 = vld [vmem:[%s663_s1 + $0x8] sm:$0xff] (!%p139_p2)  ;;  %v187_v1 = vld [vmem:[%s663_s1 + $0x18] sm:$0xff] (!%p139_p2)  ;;  %v184_v2 = vld [vmem:[%s663_s1] sm:$0xff] (!%p139_p2)  ;;  %v493_v7 = vmov (!%p139_p2), 0.0   ;;  %s420_s6 = sshll.u32 (!%p139_p2), %s415_s13, 3  ;;  %v218_v57 = vlaneseq (!%p139_p2) }
   0x6   : > { %142 = sbr.rel (%p139_p2) target bundleno = 268 (0x10c), region = 32  ;;  %v428_v3 = vpack.c.bf16 (!%p139_p2), %v187_v1, %v185_v0  ;;  %v186_v4 = vld [vmem:[%s663_s1 + $0x10] sm:$0xff] (!%p139_p2)  ;;  %v189_v5 = vld [vmem:[%s663_s1 + $0x28] sm:$0xff] (!%p139_p2)  ;;  %v191_v6 = vld [vmem:[%s663_s1 + $0x38] sm:$0xff] (!%p139_p2)  ;;  %292 = vmatprep.mubr.f32.mxu0 (!%p139_p2), %v493_v7  ;;  %316 = vmatprep.mubr.f32.mxu1 (!%p139_p2), %v493_v7  ;;  %p164_p3 = scmp.lt.s32.totalorder (!%p139_p2), %s420_s6, 15 }
   0x7   : > { %v430_v8 = vpack.c.bf16 (!%p139_p2), %v186_v4, %v184_v2  ;;  %v432_v9 = vpack.c.bf16 (!%p139_p2), %v191_v6, %v189_v5  ;;  %v188_v10 = vld [vmem:[%s663_s1 + $0x20] sm:$0xff] (!%p139_p2)  ;;  %v190_v11 = vld [vmem:[%s663_s1 + $0x30] sm:$0xff] (!%p139_p2)  ;;  %v193_v12 = vld [vmem:[%s663_s1 + $0x48] sm:$0xff] (!%p139_p2)  ;;  %v219_v58 = vshrl.u32 (!%p139_p2), %v218_v57, 7 }
   0x8   : > { %429 = vmatprep.subr.bf16.mxu0 (!%p139_p2), %v428_v3  ;;  %460 = vmatprep.subr.bf16.mxu1 (!%p139_p2), %v428_v3  ;;  %v195_v13 = vld [vmem:[%s663_s1 + $0x58] sm:$0xff] (!%p139_p2)  ;;  %v434_v14 = vpack.c.bf16 (!%p139_p2), %v190_v11, %v188_v10  ;;  %v192_v16 = vld [vmem:[%s663_s1 + $0x40] sm:$0xff] (!%p139_p2)  ;;  %v194_v17 = vld [vmem:[%s663_s1 + $0x50] sm:$0xff] (!%p139_p2) }
   0x9   : > { %431 = vmatpush1.bf16.msra.mxu0 (!%p139_p2), %v430_v8  ;;  %468 = vmatpush1.bf16.msra.mxu1 (!%p139_p2), %v430_v8  ;;  %v436_v15 = vpack.c.bf16 (!%p139_p2), %v195_v13, %v193_v12  ;;  %v197_v18 = vld [vmem:[%s663_s1 + $0x68] sm:$0xff] (!%p139_p2)  ;;  %v199_v19 = vld [vmem:[%s663_s1 + $0x78] sm:$0xff] (!%p139_p2)  ;;  %v438_v20 = vpack.c.bf16 (!%p139_p2), %v194_v17, %v192_v16  ;;  %v196_v22 = vld [vmem:[%s663_s1 + $0x60] sm:$0xff] (!%p139_p2)  ;;  %v220_v59 = vsub.s32 (!%p139_p2), 0, %v219_v58  ;;  %v224_v61 = vsub.s32 (!%p139_p2), 1, %v219_v58 }
   0xa   : > { %433 = vmatprep.subr.bf16.mxu0 (!%p139_p2), %v432_v9  ;;  %461 = vmatprep.subr.bf16.mxu1 (!%p139_p2), %v432_v9  ;;  %v440_v21 = vpack.c.bf16 (!%p139_p2), %v199_v19, %v197_v18  ;;  %v198_v23 = vld [vmem:[%s663_s1 + $0x70] sm:$0xff] (!%p139_p2)  ;;  %v201_v24 = vld [vmem:[%s663_s1 + $0x88] sm:$0xff] (!%p139_p2)  ;;  %v203_v25 = vld [vmem:[%s663_s1 + $0x98] sm:$0xff] (!%p139_p2) }
   0xb   : > { %v442_v26 = vpack.c.bf16 (!%p139_p2), %v198_v23, %v196_v22  ;;  %v444_v27 = vpack.c.bf16 (!%p139_p2), %v203_v25, %v201_v24  ;;  %v200_v28 = vld [vmem:[%s663_s1 + $0x80] sm:$0xff] (!%p139_p2)  ;;  %v202_v29 = vld [vmem:[%s663_s1 + $0x90] sm:$0xff] (!%p139_p2)  ;;  %v205_v30 = vld [vmem:[%s663_s1 + $0xa8] sm:$0xff] (!%p139_p2) }
   0xc   : > { %v207_v31 = vld [vmem:[%s663_s1 + $0xb8] sm:$0xff] (!%p139_p2)  ;;  %v446_v32 = vpack.c.bf16 (!%p139_p2), %v202_v29, %v200_v28  ;;  %v204_v34 = vld [vmem:[%s663_s1 + $0xa0] sm:$0xff] (!%p139_p2)  ;;  %v206_v35 = vld [vmem:[%s663_s1 + $0xb0] sm:$0xff] (!%p139_p2) }
   0xd   : > { %435 = vmatpush1.bf16.msra.mxu0 %v434_v14  ;;  %469 = vmatpush1.bf16.msra.mxu1 %v434_v14  ;;  %v448_v33 = vpack.c.bf16 %v207_v31, %v205_v30  ;;  %v209_v36 = vld [vmem:[%s663_s1 + $0xc8] sm:$0xff]  ;;  %v211_v37 = vld [vmem:[%s663_s1 + $0xd8] sm:$0xff]  ;;  %v450_v38 = vpack.c.bf16 %v206_v35, %v204_v34  ;;  %v208_v40 = vld [vmem:[%s663_s1 + $0xc0] sm:$0xff]  ;;  %s667_s6 = smov (!%p164_p3, %s420_s6), 15 }
   0xe   : > { %437 = vmatprep.subr.bf16.mxu0 %v436_v15  ;;  %462 = vmatprep.subr.bf16.mxu1 %v436_v15  ;;  %v452_v39 = vpack.c.bf16 %v211_v37, %v209_v36  ;;  %v210_v41 = vld [vmem:[%s663_s1 + $0xd0] sm:$0xff]  ;;  %v213_v42 = vld [vmem:[%s663_s1 + $0xe8] sm:$0xff]  ;;  %v215_v43 = vld [vmem:[%s663_s1 + $0xf8] sm:$0xff]  ;;  %s421_s28 = sshll.u32 %s667_s6, 3  ;;  %s427_s8 = sshll.u32 %s667_s6, 4 }
   0xf   : > { %v454_v44 = vpack.c.bf16 %v210_v41, %v208_v40  ;;  %v456_v45 = vpack.c.bf16 %v215_v43, %v213_v42  ;;  %v212_v46 = vld [vmem:[%s663_s1 + $0xe0] sm:$0xff]  ;;  %v214_v47 = vld [vmem:[%s663_s1 + $0xf0] sm:$0xff]  ;;  %s167_s4 = scalar_lea.vmem %s662_s0, %s421_s28  ;;  %s641_s11 = scalar_lea.vmem %s665_s3, %s427_s8 }
  0x10   : > { %v458_v48 = vpack.c.bf16 %v214_v47, %v212_v46  ;;  %v176_v49 = vld [vmem:[%s167_s4] sm:$0xff]  ;;  %v177_v51 = vld [vmem:[%s167_s4 + $0x8] sm:$0xff]  ;;  %v178_v53 = vld [vmem:[%s167_s4 + $0x10] sm:$0xff] }
  0x11   : > { %439 = vmatpush1.bf16.msra.mxu0 %v438_v20  ;;  %470 = vmatpush1.bf16.msra.mxu1 %v438_v20  ;;  %v180_v50 = vld [vmem:[%s167_s4 + $0x20] sm:$0xff]  ;;  %v181_v52 = vld [vmem:[%s167_s4 + $0x28] sm:$0xff]  ;;  %v182_v54 = vld [vmem:[%s167_s4 + $0x30] sm:$0xff] }
  0x12   : > { %441 = vmatprep.subr.bf16.mxu0 %v440_v21  ;;  %463 = vmatprep.subr.bf16.mxu1 %v440_v21  ;;  %v179_v55 = vld [vmem:[%s167_s4 + $0x18] sm:$0xff]  ;;  %v216_v60 = vld [vmem:[%s664_s2] sm:$0x3] }
  0x13   : > { %v183_v56 = vld [vmem:[%s167_s4 + $0x38] sm:$0xff]  ;;  %v221_v62 = vrot.slane %v216_v60, %v220_v59  ;;  %v225_v63 = vrot.slane %v216_v60, %v224_v61 }
  0x15   : > { %443 = vmatpush1.bf16.msra.mxu0 %v442_v26  ;;  %471 = vmatpush1.bf16.msra.mxu1 %v442_v26 }
  0x16   : > { %445 = vmatprep.subr.bf16.mxu0 %v444_v27  ;;  %464 = vmatprep.subr.bf16.mxu1 %v444_v27 }
  0x19   : > { %447 = vmatpush1.bf16.msra.mxu0 %v446_v32  ;;  %472 = vmatpush1.bf16.msra.mxu1 %v446_v32 }
  0x1a   : > { %449 = vmatprep.subr.bf16.mxu0 %v448_v33  ;;  %465 = vmatprep.subr.bf16.mxu1 %v448_v33 }
  0x1d   : > { %451 = vmatpush1.bf16.msra.mxu0 %v450_v38  ;;  %473 = vmatpush1.bf16.msra.mxu1 %v450_v38 }
  0x1e   : > { %453 = vmatprep.subr.bf16.mxu0 %v452_v39  ;;  %466 = vmatprep.subr.bf16.mxu1 %v452_v39 }
  0x21   : > { %455 = vmatpush1.bf16.msra.mxu0 %v454_v44  ;;  %474 = vmatpush1.bf16.msra.mxu1 %v454_v44 }
  0x22   : > { %457 = vmatprep.subr.bf16.mxu0 %v456_v45  ;;  %467 = vmatprep.subr.bf16.mxu1 %v456_v45 }
  0x25   : > { %459 = vmatpush1.bf16.msra.mxu0 %v458_v48  ;;  %475 = vmatpush1.bf16.msra.mxu1 %v458_v48 }
  0x28   : > { %293 = vmatmul.mubr.f32.vlgmr.msra.gmra.mrb[0].mxu0 %v176_v49  ;;  %317 = vmatmul.mubr.f32.vlgmr.msra.gmra.mrb[0].mxu1 %v180_v50 }
  0x29   : > { %298 = vmatprep.mubr.f32.mxu0 %v493_v7  ;;  %322 = vmatprep.mubr.f32.mxu1 %v493_v7 }
  0x2c   : > { %299 = vmatmul.mubr.f32.gmra.mrb[2].mxu0 %v177_v51  ;;  %323 = vmatmul.mubr.f32.gmra.mrb[2].mxu1 %v181_v52 }
  0x2d   : > { %304 = vmatprep.mubr.f32.mxu0 %v493_v7  ;;  %328 = vmatprep.mubr.f32.mxu1 %v493_v7 }
  0x30   : > { %305 = vmatmul.mubr.f32.gmra.mrb[4].mxu0 %v178_v53  ;;  %329 = vmatmul.mubr.f32.gmra.mrb[4].mxu1 %v182_v54 }
  0x31   : > { %310 = vmatprep.mubr.f32.mxu0 %v493_v7  ;;  %334 = vmatprep.mubr.f32.mxu1 %v493_v7 }
  0x34   : > { %311 = vmatmul.mubr.f32.gmra.mrb[6].mxu0 %v179_v55  ;;  %335 = vmatmul.mubr.f32.gmra.mrb[6].mxu1 %v183_v56 }
  0xfb   : > { %v294_v0 = vpop.f32.mrb[0].mxu0  ;;  %v318_v1 = vpop.f32.mrb[0].mxu1 }
  0xfc   : > { %v295_v2 = vadd.f32 %v294_v0, %v221_v62  ;;  %v319_v3 = vadd.f32 %v318_v1, %v221_v62  ;;  %v296_v4 = vpop.f32.mrb[1].mxu0  ;;  %v320_v5 = vpop.f32.mrb[1].mxu1 }
  0xfd   : > { %v297_v6 = vadd.f32 %v296_v4, %v225_v63  ;;  %v321_v7 = vadd.f32 %v320_v5, %v225_v63 }
  0xfe   : > { %341 = vst [vmem:[%s641_s11] sm:$0xff] %v295_v2  ;;  %349 = vst [vmem:[%s641_s11 + $0x40] sm:$0xff] %v319_v3 }
  0xff   : > { %342 = vst [vmem:[%s641_s11 + $0x8] sm:$0xff] %v297_v6  ;;  %350 = vst [vmem:[%s641_s11 + $0x48] sm:$0xff] %v321_v7  ;;  %v300_v8 = vpop.f32.mrb[2].mxu0  ;;  %v324_v9 = vpop.f32.mrb[2].mxu1 }
 0x100   : > { %v301_v10 = vadd.f32 %v300_v8, %v221_v62  ;;  %v325_v11 = vadd.f32 %v324_v9, %v221_v62  ;;  %v302_v12 = vpop.f32.mrb[3].mxu0  ;;  %v326_v13 = vpop.f32.mrb[3].mxu1 }
 0x101   : > { %v303_v14 = vadd.f32 %v302_v12, %v225_v63  ;;  %v327_v15 = vadd.f32 %v326_v13, %v225_v63 }
 0x102   : > { %343 = vst [vmem:[%s641_s11 + $0x10] sm:$0xff] %v301_v10  ;;  %351 = vst [vmem:[%s641_s11 + $0x50] sm:$0xff] %v325_v11 }
 0x103   : > { %344 = vst [vmem:[%s641_s11 + $0x18] sm:$0xff] %v303_v14  ;;  %352 = vst [vmem:[%s641_s11 + $0x58] sm:$0xff] %v327_v15  ;;  %v306_v16 = vpop.f32.mrb[4].mxu0  ;;  %v330_v17 = vpop.f32.mrb[4].mxu1 }
 0x104   : > { %v307_v18 = vadd.f32 %v306_v16, %v221_v62  ;;  %v331_v19 = vadd.f32 %v330_v17, %v221_v62  ;;  %v308_v20 = vpop.f32.mrb[5].mxu0  ;;  %v332_v21 = vpop.f32.mrb[5].mxu1 }
 0x105   : > { %v309_v22 = vadd.f32 %v308_v20, %v225_v63  ;;  %v333_v23 = vadd.f32 %v332_v21, %v225_v63 }
 0x106   : > { %345 = vst [vmem:[%s641_s11 + $0x20] sm:$0xff] %v307_v18  ;;  %353 = vst [vmem:[%s641_s11 + $0x60] sm:$0xff] %v331_v19 }
 0x107   : > { %346 = vst [vmem:[%s641_s11 + $0x28] sm:$0xff] %v309_v22  ;;  %354 = vst [vmem:[%s641_s11 + $0x68] sm:$0xff] %v333_v23  ;;  %v312_v24 = vpop.f32.mrb[6].mxu0  ;;  %v336_v25 = vpop.f32.mrb[6].mxu1 }
 0x108   : > { %v313_v26 = vadd.f32 %v312_v24, %v221_v62  ;;  %v337_v27 = vadd.f32 %v336_v25, %v221_v62  ;;  %v314_v28 = vpop.f32.mrb[7].mxu0  ;;  %v338_v29 = vpop.f32.mrb[7].mxu1 }
 0x109   : > { %v315_v30 = vadd.f32 %v314_v28, %v225_v63  ;;  %v339_v31 = vadd.f32 %v338_v29, %v225_v63 }
 0x10a   : > { %347 = vst [vmem:[%s641_s11 + $0x30] sm:$0xff] %v313_v26  ;;  %355 = vst [vmem:[%s641_s11 + $0x70] sm:$0xff] %v337_v27 }
 0x10b   : > { %348 = vst [vmem:[%s641_s11 + $0x38] sm:$0xff] %v315_v30  ;;  %356 = vst [vmem:[%s641_s11 + $0x78] sm:$0xff] %v339_v31 }
 0x10c PF: > { %s13_s12 = sadd.s32 1, %s491_s12  }
 0x10d   : > { %p10_p4 = scmp.ge.s32.totalorder %s13_s12, 4  }
 0x10f   :  { %12 = sbr.rel (!%p10_p4) target bundleno = 1 (0x1), region = 62 }

// kernel: transformer_decoder_layer.15
= control target key start
LH: loop header
LB: loop body
LE: loop exit
PB: predicated region body
PF: predicated region fallthrough
CT: control target
= control target key end

     0   :  { %10 = vsyncpa [#allocation3], 0  ;;  %s1252_s0 = inlined_call_operand.vmem [shape: f32[128,128], index: 0, kind: input, shape index: {}]   ;;  %s1253_s1 = inlined_call_operand.vmem [shape: f32[128,256], index: 1, kind: input, shape index: {}]   ;;  %s1254_s2 = inlined_call_operand.vmem [shape: f32[1,256], index: 2, kind: input, shape index: {}]   ;;  %s1255_s3 = inlined_call_operand.vmem [shape: f32[256,128], index: 3, kind: input, shape index: {}]   ;;  %s1256_s4 = inlined_call_operand.vmem [shape: f32[1,128], index: 4, kind: input, shape index: {}]   ;;  %s1257_s5 = inlined_call_operand.hbm [shape: f32[128,128], index: 5, kind: output, shape index: {}]  }
   0x1   :  { %12 = vsyncpa [#allocation3 + $0x1], 0  ;;  %s909_s18 = smov 0   ;;  %s911_s19 = smov 0  }
   0x2   :  { %s913_s20 = smov 0   ;;  %s915_s21 = smov 0  }
   0x3 LB: > { %s930_s22 = sadd.s32 4294967295, %s873_s21   ;;  %s635_s23 = sadd.s32 4294967294, %s873_s21   ;;  %s873_s21 = sphi %s915_s21, %s1264_s21   ;;  %s869_s20 = sphi %s913_s20, %s1263_s20   ;;  %s865_s19 = sphi %s911_s19, %s1262_s19   ;;  %s861_s18 = sphi %s909_s18, %s1261_s18  }
   0x4   : > { %s934_s24 = sadd.s32 1, %s873_s21   ;;  %s135_s25 = sadd.s32 1, %s869_s20 }
   0x5   : > { %s132_s26 = ssub.s32 %s873_s21, %s934_s24  ;;  %p145_p0 = scmp.ne.s32.totalorder %s869_s20, %s865_s19 }
   0x6   : > { %p133_p1 = scmp.eq.s32.totalorder %s132_s26, 0  ;;  %p146_p2 = scmp.eq.s32.totalorder %s930_s22, 1 }
   0x7   : > { %p151_p3 = scmp.ne.s32.totalorder %s865_s19, %s861_s18  ;;  %p152_p4 = scmp.eq.s32.totalorder %s635_s23, 1 }
   0x8   : > { %s945_s27 = scalar_select %p133_p1, %s869_s20, %s135_s25  }
   0x9   : > { %p947_p5 = por %p146_p2, %p145_p0  ;;  %p951_p6 = por %p152_p4, %p151_p3 }
   0xa   : > { %p638_p7 = scmp.ge.s32.totalorder %s873_s21, 1  ;;  %p191_p8 = scmp.lt.s32.totalorder %s873_s21, 3 }
   0xc   : > { %p192_p9 = pnand %p638_p7, %p191_p8 }
   0xd   : > { %v235_v0 = vld [vmem:[%s1253_s1 + $0x8] sm:$0xff] (!%p192_p9)  ;;  %v237_v1 = vld [vmem:[%s1253_s1 + $0x18] sm:$0xff] (!%p192_p9)  ;;  %v234_v2 = vld [vmem:[%s1253_s1] sm:$0xff] (!%p192_p9)  ;;  %v875_v7 = vmov (!%p192_p9), 0.0   ;;  %s640_s11 = sshll.u32 (!%p192_p9), %s930_s22, 3  ;;  %s648_s6 = sshll.u32 (!%p192_p9), %s930_s22, 10 }
   0xe   : > { %195 = sbr.rel (%p192_p9) target bundleno = 526 (0x20e), region = 40  ;;  %v705_v3 = vpack.c.bf16 (!%p192_p9), %v237_v1, %v235_v0  ;;  %v236_v4 = vld [vmem:[%s1253_s1 + $0x10] sm:$0xff] (!%p192_p9)  ;;  %v239_v5 = vld [vmem:[%s1253_s1 + $0x28] sm:$0xff] (!%p192_p9)  ;;  %v241_v6 = vld [vmem:[%s1253_s1 + $0x38] sm:$0xff] (!%p192_p9)  ;;  %342 = vmatprep.mubr.f32.mxu0 (!%p192_p9), %v875_v7  ;;  %p1069_p10 = scmp.lt.s32.totalorder (!%p192_p9), %s640_s11, 15 }
   0xf   : > { %v707_v8 = vpack.c.bf16 (!%p192_p9), %v236_v4, %v234_v2  ;;  %v709_v9 = vpack.c.bf16 (!%p192_p9), %v241_v6, %v239_v5  ;;  %v238_v10 = vld [vmem:[%s1253_s1 + $0x20] sm:$0xff] (!%p192_p9)  ;;  %v240_v11 = vld [vmem:[%s1253_s1 + $0x30] sm:$0xff] (!%p192_p9)  ;;  %v243_v12 = vld [vmem:[%s1253_s1 + $0x48] sm:$0xff] (!%p192_p9)  ;;  %s1204_s15 = scalar_lea.hbm (!%p192_p9), %s1257_s5, %s648_s6  ;;  %s876_s10 = smov (!%p192_p9), [#allocation2]  }
  0x10   : > { %706 = vmatprep.subr.bf16.mxu0 (!%p192_p9), %v705_v3  ;;  %v245_v13 = vld [vmem:[%s1253_s1 + $0x58] sm:$0xff] (!%p192_p9)  ;;  %v711_v14 = vpack.c.bf16 (!%p192_p9), %v240_v11, %v238_v10  ;;  %v242_v16 = vld [vmem:[%s1253_s1 + $0x40] sm:$0xff] (!%p192_p9)  ;;  %v244_v17 = vld [vmem:[%s1253_s1 + $0x50] sm:$0xff] (!%p192_p9)  ;;  %s815_s12 = sshll.u32 (!%p192_p9), %s876_s10, 4  ;;  %s816_s12 = int_to_ptr.vmem [resolvable:$false] %s815_s12 }
  0x11   : > { %708 = vmatpush1.bf16.msra.mxu0 (!%p192_p9), %v707_v8  ;;  %v713_v15 = vpack.c.bf16 (!%p192_p9), %v245_v13, %v243_v12  ;;  %v247_v18 = vld [vmem:[%s1253_s1 + $0x68] sm:$0xff] (!%p192_p9)  ;;  %v249_v19 = vld [vmem:[%s1253_s1 + $0x78] sm:$0xff] (!%p192_p9)  ;;  %v715_v20 = vpack.c.bf16 (!%p192_p9), %v244_v17, %v242_v16  ;;  %v246_v22 = vld [vmem:[%s1253_s1 + $0x60] sm:$0xff] (!%p192_p9)  ;;  %s817_s13 = scalar_lea.vmem (!%p192_p9), %s816_s12, 2048 }
  0x12   : > { %710 = vmatprep.subr.bf16.mxu0 (!%p192_p9), %v709_v9  ;;  %v717_v21 = vpack.c.bf16 (!%p192_p9), %v249_v19, %v247_v18  ;;  %v248_v23 = vld [vmem:[%s1253_s1 + $0x70] sm:$0xff] (!%p192_p9)  ;;  %v251_v24 = vld [vmem:[%s1253_s1 + $0x88] sm:$0xff] (!%p192_p9)  ;;  %v253_v25 = vld [vmem:[%s1253_s1 + $0x98] sm:$0xff] (!%p192_p9) }
  0x13   : > { %v719_v26 = vpack.c.bf16 (!%p192_p9), %v248_v23, %v246_v22  ;;  %v250_v27 = vld [vmem:[%s1253_s1 + $0x80] sm:$0xff] (!%p192_p9)  ;;  %v252_v28 = vld [vmem:[%s1253_s1 + $0x90] sm:$0xff] (!%p192_p9)  ;;  %v255_v29 = vld [vmem:[%s1253_s1 + $0xa8] sm:$0xff] (!%p192_p9)  ;;  %v721_v30 = vpack.c.bf16 (!%p192_p9), %v253_v25, %v251_v24 }
  0x14   : > { %v257_v31 = vld [vmem:[%s1253_s1 + $0xb8] sm:$0xff] (!%p192_p9)  ;;  %v423_v32 = vld [vmem:[%s1255_s3 + $0x80] sm:$0xff] (!%p192_p9)  ;;  %v424_v33 = vld [vmem:[%s1255_s3 + $0x88] sm:$0xff] (!%p192_p9)  ;;  %v723_v42 = vpack.c.bf16 (!%p192_p9), %v252_v28, %v250_v27 }
  0x15   : > { %712 = vmatpush1.bf16.msra.mxu0 %v711_v14  ;;  %v737_v34 = vpack.c.bf16 %v424_v33, %v423_v32  ;;  %v407_v35 = vld [vmem:[%s1255_s3] sm:$0xff]  ;;  %v408_v36 = vld [vmem:[%s1255_s3 + $0x8] sm:$0xff]  ;;  %v425_v37 = vld [vmem:[%s1255_s3 + $0x90] sm:$0xff]  ;;  %v725_v46 = vpack.c.bf16 %v257_v31, %v255_v29  ;;  %s1266_s11 = smov (!%p1069_p10, %s640_s11), 15 }
  0x16   : > { %714 = vmatprep.subr.bf16.mxu0 %v713_v15  ;;  %v739_v38 = vpack.c.bf16 %v408_v36, %v407_v35  ;;  %v426_v39 = vld [vmem:[%s1255_s3 + $0x98] sm:$0xff]  ;;  %v409_v40 = vld [vmem:[%s1255_s3 + $0x10] sm:$0xff]  ;;  %v427_v44 = vld [vmem:[%s1255_s3 + $0xa0] sm:$0xff]  ;;  %s641_s14 = sshll.u32 %s1266_s11, 3 }
  0x17   : > { %v410_v41 = vld [vmem:[%s1255_s3 + $0x18] sm:$0xff]  ;;  %738 = vmatprep.subr.bf16.mxu1 %v737_v34  ;;  %v741_v43 = vpack.c.bf16 %v426_v39, %v425_v37  ;;  %v428_v45 = vld [vmem:[%s1255_s3 + $0xa8] sm:$0xff]  ;;  %v254_v47 = vld [vmem:[%s1253_s1 + $0xa0] sm:$0xff]  ;;  %s1134_s9 = scalar_lea.vmem %s1252_s0, %s641_s14  ;;  %s216_s14 = sand.u32 1, %s865_s19  }
  0x18   : > { %v256_v48 = vld [vmem:[%s1253_s1 + $0xb0] sm:$0xff]  ;;  %v259_v49 = vld [vmem:[%s1253_s1 + $0xc8] sm:$0xff]  ;;  %740 = vmatpush3.bf16.msra.mxu1 %v739_v38  ;;  %v743_v50 = vpack.c.bf16 %v410_v41, %v409_v40  ;;  %v261_v51 = vld [vmem:[%s1253_s1 + $0xd8] sm:$0xff]  ;;  %v745_v52 = vpack.c.bf16 %v428_v45, %v427_v44  ;;  %v268_v41 = vlaneseq  ;;  %s639_s23 = sshll.u32 %s216_s14, 6 }
  0x19   : > { %716 = vmatpush1.bf16.msra.mxu0 %v715_v20  ;;  %742 = vmatprep.subr.bf16.mxu1 %v741_v43  ;;  %v411_v53 = vld [vmem:[%s1255_s3 + $0x20] sm:$0xff]  ;;  %v412_v54 = vld [vmem:[%s1255_s3 + $0x28] sm:$0xff]  ;;  %v429_v55 = vld [vmem:[%s1255_s3 + $0xb0] sm:$0xff]  ;;  %v727_v57 = vpack.c.bf16 %v256_v48, %v254_v47  ;;  %v729_v58 = vpack.c.bf16 %v261_v51, %v259_v49  ;;  %s1190_s30 = scalar_lea.vmem [#allocation2], %s639_s23 }
  0x1a   : > { %718 = vmatprep.subr.bf16.mxu0 %v717_v21  ;;  %v430_v56 = vld [vmem:[%s1255_s3 + $0xb8] sm:$0xff]  ;;  %v258_v59 = vld [vmem:[%s1253_s1 + $0xc0] sm:$0xff]  ;;  %v260_v60 = vld [vmem:[%s1253_s1 + $0xd0] sm:$0xff]  ;;  %v747_v62 = vpack.c.bf16 %v412_v54, %v411_v53  ;;  %s573_s7 = sshll.u32 %s1190_s30, 4  ;;  %s1206_s7 = int_to_ptr.vmem [resolvable:$true] %s573_s7 }
  0x1b   : > { %v263_v61 = vld [vmem:[%s1253_s1 + $0xe8] sm:$0xff]  ;;  %v265_v63 = vld [vmem:[%s1253_s1 + $0xf8] sm:$0xff]  ;;  %v749_v0 = vpack.c.bf16 %v430_v56, %v429_v55  ;;  %v413_v1 = vld [vmem:[%s1255_s3 + $0x30] sm:$0xff]  ;;  %v731_v5 = vpack.c.bf16 %v260_v60, %v258_v59  ;;  %s811_s22 = scalar_lea.vmem %s1206_s7, 1024  ;;  %p818_p0 = scmp.lt.s32.totalorder %s1206_s7, %s816_s12 }
  0x1c   : > { %744 = vmatpush3.bf16.msra.mxu1 %v743_v50  ;;  %v414_v2 = vld [vmem:[%s1255_s3 + $0x38] sm:$0xff]  ;;  %v431_v3 = vld [vmem:[%s1255_s3 + $0xc0] sm:$0xff]  ;;  %v432_v4 = vld [vmem:[%s1255_s3 + $0xc8] sm:$0xff]  ;;  %v733_v6 = vpack.c.bf16 %v265_v63, %v263_v61  ;;  %p812_p11 = scmp.ne.s32.totalorder %s1206_s7, %s811_s22  ;;  %p819_p1 = scmp.lt.s32.totalorder %s817_s13, %s811_s22 }
  0x1d   : > { %720 = vmatpush1.bf16.msra.mxu0 %v719_v26  ;;  %746 = vmatprep.subr.bf16.mxu1 %v745_v52  ;;  %v262_v8 = vld [vmem:[%s1253_s1 + $0xe0] sm:$0xff]  ;;  %v264_v9 = vld [vmem:[%s1253_s1 + $0xf0] sm:$0xff]  ;;  %v751_v10 = vpack.c.bf16 %v414_v2, %v413_v1  ;;  %v753_v11 = vpack.c.bf16 %v432_v4, %v431_v3  ;;  %v416_v13 = vld [vmem:[%s1255_s3 + $0x48] sm:$0xff] }
  0x1e   : > { %722 = vmatprep.subr.bf16.mxu0 %v721_v30  ;;  %v415_v12 = vld [vmem:[%s1255_s3 + $0x40] sm:$0xff]  ;;  %v433_v14 = vld [vmem:[%s1255_s3 + $0xd0] sm:$0xff]  ;;  %v434_v15 = vld [vmem:[%s1255_s3 + $0xd8] sm:$0xff]  ;;  %v735_v16 = vpack.c.bf16 %v264_v9, %v262_v8  ;;  %p813_p12 = pnand %p812_p11, %p947_p5  ;;  %p820_p2 = por %p819_p1, %p818_p0 }
  0x1f   : > { %v755_v17 = vpack.c.bf16 %v416_v13, %v415_v12  ;;  %v757_v18 = vpack.c.bf16 %v434_v15, %v433_v14  ;;  %v417_v19 = vld [vmem:[%s1255_s3 + $0x50] sm:$0xff]  ;;  %v418_v20 = vld [vmem:[%s1255_s3 + $0x58] sm:$0xff]  ;;  %v435_v21 = vld [vmem:[%s1255_s3 + $0xe0] sm:$0xff] }
  0x20   : > { %748 = vmatpush3.bf16.msra.mxu1 %v747_v62  ;;  %v436_v22 = vld [vmem:[%s1255_s3 + $0xe8] sm:$0xff]  ;;  %v226_v23 = vld [vmem:[%s1134_s9] sm:$0xff]  ;;  %v759_v24 = vpack.c.bf16 %v418_v20, %v417_v19  ;;  %v228_v27 = vld [vmem:[%s1134_s9 + $0x10] sm:$0xff]  ;;  %p814_p13 = pneg %p813_p12 }
  0x21   : > { %724 = vmatpush1.bf16.msra.mxu0 %v723_v42  ;;  %750 = vmatprep.subr.bf16.mxu1 %v749_v0  ;;  %v761_v25 = vpack.c.bf16 %v436_v22, %v435_v21  ;;  %v227_v26 = vld [vmem:[%s1134_s9 + $0x8] sm:$0xff]  ;;  %v229_v28 = vld [vmem:[%s1134_s9 + $0x18] sm:$0xff]  ;;  %v230_v29 = vld [vmem:[%s1134_s9 + $0x20] sm:$0xff]  ;;  %v269_v42 = vshrl.u32 %v268_v41, 7 }
  0x22   : > { %726 = vmatprep.subr.bf16.mxu0 %v725_v46  ;;  %v231_v30 = vld [vmem:[%s1134_s9 + $0x28] sm:$0xff]  ;;  %v232_v31 = vld [vmem:[%s1134_s9 + $0x30] sm:$0xff]  ;;  %v233_v32 = vld [vmem:[%s1134_s9 + $0x38] sm:$0xff]  ;;  %s1211_s9 = scalar_lea.sflag [#allocation3], %s216_s14  ;;  %p821_p3 = pnand %p820_p2, %p814_p13 }
  0x23   : > { %v419_v33 = vld [vmem:[%s1255_s3 + $0x60] sm:$0xff]  ;;  %v420_v34 = vld [vmem:[%s1255_s3 + $0x68] sm:$0xff]  ;;  %v437_v36 = vld [vmem:[%s1255_s3 + $0xf0] sm:$0xff]  ;;  %v270_v43 = vsub.s32 0, %v269_v42  ;;  %v274_v45 = vsub.s32 1, %v269_v42 }
  0x24   : > { %752 = vmatpush3.bf16.msra.mxu1 %v751_v10  ;;  %v763_v35 = vpack.c.bf16 %v420_v34, %v419_v33  ;;  %v421_v38 = vld [vmem:[%s1255_s3 + $0x70] sm:$0xff]  ;;  %v422_v39 = vld [vmem:[%s1255_s3 + $0x78] sm:$0xff]  ;;  %v266_v44 = vld [vmem:[%s1254_s2] sm:$0x3] }
  0x25   : > { %728 = vmatpush1.bf16.msra.mxu0 %v727_v57  ;;  %754 = vmatprep.subr.bf16.mxu1 %v753_v11  ;;  %v767_v40 = vpack.c.bf16 %v422_v39, %v421_v38  ;;  %v271_v46 = vrot.slane %v266_v44, %v270_v43  ;;  %v275_v47 = vrot.slane %v266_v44, %v274_v45  ;;  %v642_v34 = vld [vmem:[%s1256_s4] ss:$0 sm:$0xff] }
  0x26   : > { %730 = vmatprep.subr.bf16.mxu0 %v729_v58 }
  0x28   : > { %756 = vmatpush3.bf16.msra.mxu1 %v755_v17 }
  0x29   : > { %732 = vmatpush1.bf16.msra.mxu0 %v731_v5  ;;  %758 = vmatprep.subr.bf16.mxu1 %v757_v18 }
  0x2a   : > { %734 = vmatprep.subr.bf16.mxu0 %v733_v6 }
  0x2c   : > { %760 = vmatpush3.bf16.msra.mxu1 %v759_v24 }
  0x2d   : > { %736 = vmatpush1.bf16.msra.mxu0 %v735_v16  ;;  %762 = vmatprep.subr.bf16.mxu1 %v761_v25 }
  0x30   : > { %343 = vmatmul.mubr.f32.vlgmr.msra.gmra.mrb[0].mxu0 %v226_v23  ;;  %764 = vmatpush3.bf16.msra.mxu1 %v763_v35 }
  0x31   : > { %348 = vmatprep.mubr.f32.mxu0 %v875_v7 }
  0x34   : > { %349 = vmatmul.mubr.f32.gmra.mrb[2].mxu0 %v227_v26 }
  0x35   : > { %354 = vmatprep.mubr.f32.mxu0 %v875_v7 }
  0x38   : > { %355 = vmatmul.mubr.f32.gmra.mrb[4].mxu0 %v228_v27 }
  0x39   : > { %360 = vmatprep.mubr.f32.mxu0 %v875_v7 }
  0x3c   : > { %361 = vmatmul.mubr.f32.gmra.mrb[6].mxu0 %v229_v28 }
  0x3d   : > { %366 = vmatprep.mubr.f32.mxu0 %v875_v7 }
  0x40   : > { %367 = vmatmul.mubr.f32.gmra.mrb[8].mxu0 %v230_v29 }
  0x41   : > { %372 = vmatprep.mubr.f32.mxu0 %v875_v7 }
  0x44   : > { %373 = vmatmul.mubr.f32.gmra.mrb[10].mxu0 %v231_v30 }
  0x45   : > { %378 = vmatprep.mubr.f32.mxu0 %v875_v7 }
  0x48   : > { %379 = vmatmul.mubr.f32.gmra.mrb[12].mxu0 %v232_v31 }
  0x49   : > { %384 = vmatprep.mubr.f32.mxu0 %v875_v7  ;;  %v438_v7 = vld [vmem:[%s1255_s3 + $0xf8] sm:$0xff] }
  0x4a   : > { %v765_v37 = vpack.c.bf16 %v438_v7, %v437_v36 }
  0x4c   : > { %385 = vmatmul.mubr.f32.gmra.mrb[14].mxu0 %v233_v32  ;;  %766 = vmatprep.subr.bf16.mxu1 %v765_v37 }
  0x4d   : > { %768 = vmatpush3.bf16.msra.mxu1 %v767_v40 }
 0x103   : > { %v344_v48 = vpop.f32.mrb[0].mxu0 }
 0x104   : > { %v345_v49 = vadd.f32 %v344_v48, %v271_v46  ;;  %v346_v50 = vpop.f32.mrb[1].mxu0 }
 0x105   : > { %v347_v51 = vadd.f32 %v346_v50, %v275_v47 }
 0x106   : > { %v391_v54 = vmax.f32 %v345_v49, 0.0 }
 0x107   : > { %v350_v52 = vpop.f32.mrb[2].mxu0  ;;  %v392_v53 = vmax.f32 %v347_v51, 0.0 }
 0x108   : > { %v351_v55 = vadd.f32 %v350_v52, %v271_v46  ;;  %v352_v56 = vpop.f32.mrb[3].mxu0 }
 0x109   : > { %v353_v57 = vadd.f32 %v352_v56, %v275_v47  ;;  %510 = vmatprep.mubr.f32.mxu1 %v392_v53 }
 0x10a   : > { %511 = vmatmul.mubr.f32.vlgmr.msra.gmra.mrb[0].mxu1 %v391_v54  ;;  %v393_v60 = vmax.f32 %v351_v55, 0.0 }
 0x10b   : > { %v394_v58 = vmax.f32 %v353_v57, 0.0  ;;  %v356_v59 = vpop.f32.mrb[4].mxu0 }
 0x10c   : > { %v357_v61 = vadd.f32 %v356_v59, %v271_v46  ;;  %v358_v62 = vpop.f32.mrb[5].mxu0 }
 0x10d   : > { %v359_v63 = vadd.f32 %v358_v62, %v275_v47  ;;  %515 = vmatprep.mubr.f32.mxu1 %v394_v58 }
 0x10e   : > { %516 = vmatmul.mubr.f32.gmra.mrb[2].mxu1 %v393_v60  ;;  %v395_v2 = vmax.f32 %v357_v61, 0.0 }
 0x10f   : > { %v396_v0 = vmax.f32 %v359_v63, 0.0  ;;  %v362_v1 = vpop.f32.mrb[6].mxu0 }
 0x110   : > { %v363_v3 = vadd.f32 %v362_v1, %v271_v46  ;;  %v364_v4 = vpop.f32.mrb[7].mxu0 }
 0x111   : > { %v365_v5 = vadd.f32 %v364_v4, %v275_v47  ;;  %520 = vmatprep.mubr.f32.mxu1 %v396_v0 }
 0x112   : > { %521 = vmatmul.mubr.f32.gmra.mrb[4].mxu1 %v395_v2  ;;  %v397_v9 = vmax.f32 %v363_v3, 0.0 }
 0x113   : > { %v398_v6 = vmax.f32 %v365_v5, 0.0  ;;  %v368_v8 = vpop.f32.mrb[8].mxu0 }
 0x114   : > { %v369_v10 = vadd.f32 %v368_v8, %v271_v46  ;;  %v370_v11 = vpop.f32.mrb[9].mxu0 }
 0x115   : > { %v371_v12 = vadd.f32 %v370_v11, %v275_v47  ;;  %525 = vmatprep.mubr.f32.mxu1 %v398_v6 }
 0x116   : > { %526 = vmatmul.mubr.f32.gmra.mrb[6].mxu1 %v397_v9  ;;  %v399_v15 = vmax.f32 %v369_v10, 0.0 }
 0x117   : > { %v400_v13 = vmax.f32 %v371_v12, 0.0  ;;  %v374_v14 = vpop.f32.mrb[10].mxu0 }
 0x118   : > { %v375_v16 = vadd.f32 %v374_v14, %v271_v46  ;;  %v376_v17 = vpop.f32.mrb[11].mxu0 }
 0x119   : > { %v377_v18 = vadd.f32 %v376_v17, %v275_v47  ;;  %530 = vmatprep.mubr.f32.mxu1 %v400_v13 }
 0x11a   : > { %531 = vmatmul.mubr.f32.gmra.mrb[8].mxu1 %v399_v15  ;;  %v401_v21 = vmax.f32 %v375_v16, 0.0 }
 0x11b   : > { %v402_v19 = vmax.f32 %v377_v18, 0.0  ;;  %v380_v20 = vpop.f32.mrb[12].mxu0 }
 0x11c   : > { %v381_v22 = vadd.f32 %v380_v20, %v271_v46  ;;  %v382_v23 = vpop.f32.mrb[13].mxu0 }
 0x11d   : > { %v383_v24 = vadd.f32 %v382_v23, %v275_v47  ;;  %535 = vmatprep.mubr.f32.mxu1 %v402_v19 }
 0x11e   : > { %536 = vmatmul.mubr.f32.gmra.mrb[10].mxu1 %v401_v21  ;;  %v403_v27 = vmax.f32 %v381_v22, 0.0 }
 0x11f   : > { %v404_v25 = vmax.f32 %v383_v24, 0.0  ;;  %v386_v26 = vpop.f32.mrb[14].mxu0 }
 0x120   : > { %v387_v28 = vadd.f32 %v386_v26, %v271_v46  ;;  %v388_v29 = vpop.f32.mrb[15].mxu0 }
 0x121   : > { %v389_v30 = vadd.f32 %v388_v29, %v275_v47  ;;  %540 = vmatprep.mubr.f32.mxu1 %v404_v25 }
 0x122   : > { %541 = vmatmul.mubr.f32.gmra.mrb[12].mxu1 %v403_v27  ;;  %v405_v32 = vmax.f32 %v387_v28, 0.0 }
 0x123   : > { %v406_v31 = vmax.f32 %v389_v30, 0.0 }
 0x125   : > { %545 = vmatprep.mubr.f32.mxu1 %v406_v31 }
 0x126   : > { %546 = vmatmul.mubr.f32.gmra.mrb[14].mxu1 %v405_v32 }
 0x1dd   : > { %v681_v33 = vpop.f32.mrb[0].mxu1 }
 0x1de   : > { %v682_v35 = vpop.f32.mrb[1].mxu1 }
 0x1df   : > { %v683_v36 = vadd.f32 %v682_v35, %v681_v33 }
 0x1e1   : > { %v513_v7 = vadd.f32 %v683_v36, %v642_v34  ;;  %v684_v37 = vpop.f32.mrb[2].mxu1 }
 0x1e2   : > { %v685_v38 = vpop.f32.mrb[3].mxu1 }
 0x1e3   : > { %551 = vst [vmem:[%s1190_s30] sm:$0xff] %v513_v7  ;;  %v686_v39 = vadd.f32 %v685_v38, %v684_v37 }
 0x1e5   : > { %v518_v40 = vadd.f32 %v686_v39, %v642_v34  ;;  %v687_v41 = vpop.f32.mrb[4].mxu1 }
 0x1e6   : > { %v688_v42 = vpop.f32.mrb[5].mxu1 }
 0x1e7   : > { %552 = vst [vmem:[%s1190_s30 + $0x8] sm:$0xff] %v518_v40  ;;  %v689_v43 = vadd.f32 %v688_v42, %v687_v41 }
 0x1e9   : > { %v523_v44 = vadd.f32 %v689_v43, %v642_v34  ;;  %v690_v45 = vpop.f32.mrb[6].mxu1 }
 0x1ea   : > { %v691_v46 = vpop.f32.mrb[7].mxu1 }
 0x1eb   : > { %553 = vst [vmem:[%s1190_s30 + $0x10] sm:$0xff] %v523_v44  ;;  %v692_v47 = vadd.f32 %v691_v46, %v690_v45 }
 0x1ed   : > { %v528_v48 = vadd.f32 %v692_v47, %v642_v34  ;;  %v693_v49 = vpop.f32.mrb[8].mxu1 }
 0x1ee   : > { %v694_v50 = vpop.f32.mrb[9].mxu1 }
 0x1ef   : > { %554 = vst [vmem:[%s1190_s30 + $0x18] sm:$0xff] %v528_v48  ;;  %v695_v51 = vadd.f32 %v694_v50, %v693_v49 }
 0x1f1   : > { %v533_v52 = vadd.f32 %v695_v51, %v642_v34  ;;  %v696_v53 = vpop.f32.mrb[10].mxu1 }
 0x1f2   : > { %v697_v54 = vpop.f32.mrb[11].mxu1 }
 0x1f3   : > { %555 = vst [vmem:[%s1190_s30 + $0x20] sm:$0xff] %v533_v52  ;;  %v698_v55 = vadd.f32 %v697_v54, %v696_v53 }
 0x1f5   : > { %v538_v56 = vadd.f32 %v698_v55, %v642_v34  ;;  %v699_v57 = vpop.f32.mrb[12].mxu1 }
 0x1f6   : > { %v700_v58 = vpop.f32.mrb[13].mxu1 }
 0x1f7   : > { %556 = vst [vmem:[%s1190_s30 + $0x28] sm:$0xff] %v538_v56  ;;  %v701_v59 = vadd.f32 %v700_v58, %v699_v57 }
 0x1f9   : > { %v543_v60 = vadd.f32 %v701_v59, %v642_v34  ;;  %v702_v61 = vpop.f32.mrb[14].mxu1 }
 0x1fa   : > { %v703_v62 = vpop.f32.mrb[15].mxu1 }
 0x1fb   : > { %557 = vst [vmem:[%s1190_s30 + $0x30] sm:$0xff] %v543_v60  ;;  %v704_v63 = vadd.f32 %v703_v62, %v702_v61 }
 0x1fd   : > { %v548_v0 = vadd.f32 %v704_v63, %v642_v34 }
 0x1ff   : > { %558 = vst [vmem:[%s1190_s30 + $0x38] sm:$0xff] %v548_v0 }
 0x200   : > { %824 = shalt.err (!%p821_p3)
}
 0x201   : > { %s825_s16 = scalar_lea.hbm %s1204_s15, 1024  ;;  %s829_s23 = scalar_lea.hbm %s1257_s5, 2048 }
 0x202   : > { %p826_p4 = scmp.ne.s32.totalorder %s1204_s15, %s825_s16  ;;  %p830_p9 = scmp.lt.u32.totalorder %s1204_s15, %s1257_s5 }
 0x203   : > { %p831_p10 = scmp.lt.u32.totalorder %s829_s23, %s825_s16  ;;  %p833_p12 = scmp.lt.u32.totalorder %s825_s16, %s1204_s15 }
 0x204   : > { %p827_p7 = pnand %p826_p4, %p947_p5 }
 0x205   : > { %p832_p11 = por %p831_p10, %p830_p9 }
 0x206   : > { %p828_p8 = pneg %p827_p7 }
 0x207   : > { %p834_p13 = por %p833_p12, %p832_p11 }
 0x209   : > { %p835_p0 = pnand %p834_p13, %p828_p8 }
 0x20b   : > { %838 = shalt.err (!%p835_p0)
}
 0x20c   : > { %s877_s30 = smov 128   ;;  %s878_s6 = smov 8  }
 0x20d   : > { %769 = dma.vmem_to_hbm [thread:$0]  (%p947_p5), %s1206_s7, 1024, %s1204_s15, %s1211_s9, %s877_s30, %s877_s30, %s878_s6  }
 0x20e PF: > { %p775_p1 = scmp.ge.s32.totalorder %s873_s21, 2  ;;  %s588_s11 = sand.u32 1, %s861_s18  }
 0x20f   : > { %s589_s8 = scalar_lea.sflag [#allocation3], %s588_s11 }
 0x210   : > { %p772_p2 = pnand %p775_p1, %p951_p6 }
 0x212   : > { %856 = dma.done.wait (!%p772_p2), %s589_s8, 1024  }
 0x213   : > { %858 = vsyncadd (!%p772_p2), %s589_s8, 4294966272  ;;  %p15_p3 = scmp.ge.s32.totalorder %s934_s24, 4   ;;  %s1261_s18 = smov %s865_s19 }
 0x214   : > { %s1262_s19 = smov %s869_s20  ;;  %s1263_s20 = smov %s945_s27 }
 0x215   : > { %s1264_s21 = smov %s934_s24  ;;  %17 = sbr.rel (!%p15_p3) target bundleno = 3 (0x3), region = 75 }
 0x21c   :  { %594 = vsyncpa [#allocation3], 1 }
 0x21d   :  { %596 = vsyncpa [#allocation3 + $0x1], 1 }

</bundles_post_ra>
